<compile_context>
chip_gen: v7x
topology: tpu7x:2x2x1
jax: 0.10.0
libtpu: 0.0.40
codegen_flags: <defaults>
</compile_context>

<pallas_src>
import functools

import jax
import jax.numpy as jnp
import numpy as np
from jax.experimental import pallas as pl
from jax.experimental.pallas import tpu as pltpu

K = 7            # conv kernel size
PAD = 3          # "same" padding
LANE = 128       # TPU lane width
SUB = 8          # sublane chunk for the fused cast+sum+max pass
ROW_BLOCK = 8    # output-row block for the 7x7 stencil


def _round_up(v, m):
    return ((v + m - 1) // m) * m


def spatial_attn_kernel(w_ref, b_ref, x_ref, o_ref,
                        sum_ref, max_ref, pad_ref, *,
                        c_total, c_tile, h, w):
    # w_ref   : SMEM (2*K*K,) f32      flattened conv weight [out=1, in=2, K, K]
    # b_ref   : SMEM (1,)     f32      conv bias
    # x_ref   : VMEM (1, c_tile, H*W)  lane-dense input block (one batch, one C tile)
    # o_ref   : VMEM (1, 1, H, W)      output block (resident across the C axis)
    # sum_ref : VMEM (SUB, H*W) f32    per-sublane partial channel sums
    # max_ref : VMEM (SUB, H*W) f32    per-sublane partial channel maxima
    # pad_ref : VMEM (2, HP, WP) f32   zero-padded avg/max planes for the stencil
    c_idx = pl.program_id(1)
    n_c = -(-c_total // c_tile)                    # static number of channel tiles
    tail_valid = c_total - (n_c - 1) * c_tile      # static valid channels in last tile

    @pl.when(c_idx == 0)
    def _init():
        sum_ref[...] = jnp.zeros_like(sum_ref)
        max_ref[...] = jnp.full_like(max_ref, -jnp.inf)

    def accumulate(lo, size):
        # Fused cast + sum + max for one <=8-channel sub-chunk; partial chunks
        # simply touch the first `size` accumulator rows (each channel lands in
        # exactly one row exactly once; untouched rows stay 0 / -inf).
        chunk = x_ref[0, lo:lo + size, :].astype(jnp.float32)       # (size, H*W)
        sum_ref[0:size, :] += chunk
        max_ref[0:size, :] = jnp.maximum(max_ref[0:size, :], chunk)

    def reduce_tile(valid):
        lo = 0
        while lo < valid:
            size = min(SUB, valid - lo)
            accumulate(lo, size)
            lo += size

    if tail_valid == c_tile:
        # C divides evenly into tiles: every tile is full.
        reduce_tile(c_tile)
    else:
        @pl.when(c_idx < n_c - 1)
        def _full_tiles():
            reduce_tile(c_tile)

        @pl.when(c_idx == n_c - 1)
        def _tail_tile():
            reduce_tile(tail_valid)        # never reads the OOB channel rows

    @pl.when(c_idx == n_c - 1)
    def _finalize():
        # Collapse the SUB partial accumulators to the two flat planes and park
        # them back in row 0 of the accumulators.
        inv_c = 1.0 / c_total
        sum_ref[0:1, :] = jnp.sum(sum_ref[...], axis=0, keepdims=True) * inv_c
        max_ref[0:1, :] = jnp.max(max_ref[...], axis=0, keepdims=True)

        # Re-layout the two flat (1, H*W) planes into the zero-padded 2-D
        # stencil scratch, one W-wide row at a time (2*H tiny copies, negligible
        # next to the C*H*W HBM stream).
        pad_ref[...] = jnp.zeros_like(pad_ref)
        for r in range(h):
            pad_ref[0, PAD + r:PAD + r + 1, PAD:PAD + w] = \
                sum_ref[0:1, r * w:(r + 1) * w]
            pad_ref[1, PAD + r:PAD + r + 1, PAD:PAD + w] = \
                max_ref[0:1, r * w:(r + 1) * w]

        # Hoist the 98 scalar SMEM weight reads above the vector loops.
        w_a = [[w_ref[di * K + dj] for dj in range(K)] for di in range(K)]
        w_m = [[w_ref[K * K + di * K + dj] for dj in range(K)] for di in range(K)]
        bias = b_ref[0]

        # Factorized 7x7 stencil, blocked over output rows to bound live vregs.
        r0 = 0
        while r0 < h:
            rb = min(ROW_BLOCK, h - r0)
            rows_a = [pad_ref[0, r0 + di:r0 + di + rb, :] for di in range(K)]  # (rb, WP)
            rows_m = [pad_ref[1, r0 + di:r0 + di + rb, :] for di in range(K)]
            acc = None
            for dj in range(K):
                # Vertical (di) conv for weight column dj, both channels fused per tap.
                col = rows_a[0] * w_a[0][dj] + rows_m[0] * w_m[0][dj]
                for di in range(1, K):
                    col = col + rows_a[di] * w_a[di][dj] + rows_m[di] * w_m[di][dj]
                # Horizontal (dj) shift: a single lane-offset slice per dj (7 total).
                term = col[:, dj:dj + w]
                acc = term if acc is None else acc + term
            out = jax.nn.sigmoid(acc + bias)
            o_ref[0, 0, r0:r0 + rb, :] = out.astype(o_ref.dtype)
            r0 += rb


def spatial_attention_module(x, weight, bias, *, block_bytes=4 << 20):
    """x: (N, C, H, W); weight: (1, 2, K, K); bias: (1,). Returns (N, 1, H, W)."""
    N, C, H, W = x.shape
    hw = H * W
    itemsize = x.dtype.itemsize

    # Channel tile: either the whole channel dim, or a multiple of 8 whose
    # lane-dense (flattened) input block is ~block_bytes.  The byte estimate is
    # exact now that the block's last dim is H*W (no hidden lane padding).
    max_ct = max(SUB, (block_bytes // max(1, hw * itemsize)) // SUB * SUB)
    c_tile = int(C) if C <= max_ct else int(max_ct)
    n_c = pl.cdiv(C, c_tile)

    hp = _round_up(H + K - 1, 8)        # padded stencil rows
    wp = _round_up(W + K - 1, LANE)     # lane-dense padded stencil width

    x_flat = x.reshape(N, C, hw)
    w_flat = weight.reshape(-1).astype(jnp.float32)   # (2*K*K,)
    b = bias.astype(jnp.float32)                      # (1,)

    # Explicit VMEM budget: double-buffered input/output blocks + scratch,
    # with headroom.  Keeps us inside v5e's 16 MiB scoped default and well
    # under v7x's 64 MiB physical VMEM.
    vmem_need = (2 * c_tile * hw * itemsize           # double-buffered x block
                 + 2 * H * W * itemsize               # double-buffered out block
                 + 2 * SUB * hw * 4                   # sum / max accumulators
                 + 2 * hp * wp * 4)                   # padded stencil planes
    vmem_limit = int(min(max(2 * vmem_need, 32 << 20), 48 << 20))

    cost = pl.CostEstimate(
        flops=int(3 * N * C * hw + 4 * K * K * N * hw),
        transcendentals=int(N * hw),
        bytes_accessed=int(N * C * hw * itemsize + N * hw * itemsize + 2 * K * K * 4),
    )

    kernel = functools.partial(spatial_attn_kernel,
                               c_total=C, c_tile=c_tile, h=H, w=W)

    return pl.pallas_call(
        kernel,
        out_shape=jax.ShapeDtypeStruct((N, 1, H, W), x.dtype),
        grid=(N, n_c),
        in_specs=[
            pl.BlockSpec(memory_space=pltpu.MemorySpace.SMEM),          # conv weights
            pl.BlockSpec(memory_space=pltpu.MemorySpace.SMEM),          # conv bias
            pl.BlockSpec((1, c_tile, hw), lambda n, c: (n, c, 0)),      # lane-dense x
        ],
        out_specs=pl.BlockSpec((1, 1, H, W), lambda n, c: (n, 0, 0, 0)),
        scratch_shapes=[
            pltpu.VMEM((SUB, hw), jnp.float32),       # partial channel sums
            pltpu.VMEM((SUB, hw), jnp.float32),       # partial channel maxima
            pltpu.VMEM((2, hp, wp), jnp.float32),     # padded avg/max stencil planes
        ],
        compiler_params=pltpu.CompilerParams(
            dimension_semantics=("parallel", "arbitrary"),
            vmem_limit_bytes=vmem_limit,
        ),
        cost_estimate=cost,
    )(w_flat, b, x_flat)


def reference_jax(x, weight, bias):
    avg = jnp.mean(x, axis=1, keepdims=True)
    mx = jnp.max(x, axis=1, keepdims=True)
    out = jnp.concatenate([avg, mx], axis=1)
    out = jax.lax.conv_general_dilated(
        out, weight, window_strides=(1, 1), padding=((PAD, PAD), (PAD, PAD)),
        dimension_numbers=("NCHW", "OIHW", "NCHW"))
    return jax.nn.sigmoid(out + bias.reshape(1, -1, 1, 1))


if __name__ == "__main__":
    key = jax.random.PRNGKey(0)
    kx, kw, kb = jax.random.split(key, 3)

    # small deterministic shapes consistent with the module's forward
    N, C, H, W = 2, 4, 16, 16
    x = jax.random.normal(kx, (N, C, H, W), dtype=jnp.float32)

    # deterministic Conv2d(2, 1, kernel_size=7)-style init (uniform +/- 1/sqrt(fan_in))
    fan_in = 2 * K * K
    bound = 1.0 / np.sqrt(fan_in)
    weight = jax.random.uniform(kw, (1, 2, K, K), jnp.float32, -bound, bound)
    bias = jax.random.uniform(kb, (1,), jnp.float32, -bound, bound)

    out = spatial_attention_module(x, weight, bias)
    out = jax.block_until_ready(out)

    ref = jax.block_until_ready(reference_jax(x, weight, bias))
    assert out.shape == (N, 1, H, W)
    np.testing.assert_allclose(np.asarray(out), np.asarray(ref), atol=1e-5, rtol=1e-5)

    print("KERNEL_OK")
</pallas_src>

<mosaic_0001>
module attributes {stable_mosaic.version = 11 : i64} {
  func.func @spatial_attn_kernel(%arg0: i32, %arg1: i32, %arg2: memref<98xf32, #tpu.memory_space<smem>>, %arg3: memref<1xf32, #tpu.memory_space<smem>>, %arg4: memref<1x4x256xf32, #tpu.memory_space<vmem>>, %arg5: memref<1x1x16x16xf32, #tpu.memory_space<vmem>>, %arg6: memref<8x256xf32, #tpu.memory_space<vmem>>, %arg7: memref<8x256xf32, #tpu.memory_space<vmem>>, %arg8: memref<2x24x128xf32, #tpu.memory_space<vmem>>) attributes {dimension_semantics = [#tpu.dimension_semantics<parallel>, #tpu.dimension_semantics<arbitrary>], iteration_bounds = array<i64: 2, 1>, scalar_prefetch = 0 : i64, scratch_operands = 3 : i64, tpu.core_type = #tpu.core_type<tc>, window_params = [{transform_indices = @transform_0, window_bounds = array<i64: 98>}, {transform_indices = @transform_1, window_bounds = array<i64: 1>}, {transform_indices = @transform_2, window_bounds = array<i64: 1, 4, 256>}, {transform_indices = @transform_3, window_bounds = array<i64: 1, 1, 16, 16>}]} {
    %c0_i32 = arith.constant 0 : i32
    %0 = arith.cmpi eq, %arg1, %c0_i32 : i32
    %1 = arith.extui %0 : i1 to i32
    %c0_i32_0 = arith.constant 0 : i32
    %2 = arith.cmpi ne, %1, %c0_i32_0 : i32
    scf.if %2 {
      %cst = arith.constant 0.000000e+00 : f32
      %14 = vector.broadcast %cst : f32 to vector<8x256xf32>
      %c0_13 = arith.constant 0 : index
      %c0_14 = arith.constant 0 : index
      %15 = vector.load %arg6[%c0_13, %c0_14] : memref<8x256xf32, #tpu.memory_space<vmem>>, vector<8x256xf32>
      tpu.vector_store %arg6[%c0_13, %c0_14], %14 {strides = array<i32>} : memref<8x256xf32, #tpu.memory_space<vmem>>, vector<8x256xf32>,
      %cst_15 = arith.constant 0xFF800000 : f32
      %16 = vector.broadcast %cst_15 : f32 to vector<8x256xf32>
      %c0_16 = arith.constant 0 : index
      %c0_17 = arith.constant 0 : index
      %17 = vector.load %arg7[%c0_16, %c0_17] : memref<8x256xf32, #tpu.memory_space<vmem>>, vector<8x256xf32>
      tpu.vector_store %arg7[%c0_16, %c0_17], %16 {strides = array<i32>} : memref<8x256xf32, #tpu.memory_space<vmem>>, vector<8x256xf32>,
    } else {
    }
    %c0 = arith.constant 0 : index
    %c0_1 = arith.constant 0 : index
    %c0_2 = arith.constant 0 : index
    %3 = vector.load %arg4[%c0, %c0_1, %c0_2] : memref<1x4x256xf32, #tpu.memory_space<vmem>>, vector<1x4x256xf32>
    %4 = vector.shape_cast %3 : vector<1x4x256xf32> to vector<4x256xf32>
    %c0_3 = arith.constant 0 : index
    %c0_4 = arith.constant 0 : index
    %5 = vector.load %arg6[%c0_3, %c0_4] : memref<8x256xf32, #tpu.memory_space<vmem>>, vector<4x256xf32>
    %6 = arith.addf %5, %4 : vector<4x256xf32>
    %c0_5 = arith.constant 0 : index
    %c0_6 = arith.constant 0 : index
    %7 = vector.load %arg6[%c0_5, %c0_6] : memref<8x256xf32, #tpu.memory_space<vmem>>, vector<4x256xf32>
    tpu.vector_store %arg6[%c0_5, %c0_6], %6 {strides = array<i32>} : memref<8x256xf32, #tpu.memory_space<vmem>>, vector<4x256xf32>,
    %c0_7 = arith.constant 0 : index
    %c0_8 = arith.constant 0 : index
    %8 = vector.load %arg7[%c0_7, %c0_8] : memref<8x256xf32, #tpu.memory_space<vmem>>, vector<4x256xf32>
    %9 = arith.maximumf %8, %4 : vector<4x256xf32>
    %c0_9 = arith.constant 0 : index
    %c0_10 = arith.constant 0 : index
    %10 = vector.load %arg7[%c0_9, %c0_10] : memref<8x256xf32, #tpu.memory_space<vmem>>, vector<4x256xf32>
    tpu.vector_store %arg7[%c0_9, %c0_10], %9 {strides = array<i32>} : memref<8x256xf32, #tpu.memory_space<vmem>>, vector<4x256xf32>,
    %c0_i32_11 = arith.constant 0 : i32
    %11 = arith.cmpi eq, %arg1, %c0_i32_11 : i32
    %12 = arith.extui %11 : i1 to i32
    %c0_i32_12 = arith.constant 0 : i32
    %13 = arith.cmpi ne, %12, %c0_i32_12 : i32
    scf.if %13 {
      %c0_13 = arith.constant 0 : index
      %c0_14 = arith.constant 0 : index
      %14 = vector.load %arg6[%c0_13, %c0_14] : memref<8x256xf32, #tpu.memory_space<vmem>>, vector<8x256xf32>
      %cst = arith.constant dense<0.000000e+00> : vector<256xf32>
      %15 = vector.multi_reduction <add>, %14, %cst [0] : vector<8x256xf32> to vector<256xf32>
      %16 = vector.shape_cast %15 : vector<256xf32> to vector<1x256xf32>
      %cst_15 = arith.constant 2.500000e-01 : f32
      %17 = vector.broadcast %cst_15 : f32 to vector<1x256xf32>
      %18 = arith.mulf %16, %17 : vector<1x256xf32>
      %c0_16 = arith.constant 0 : index
      %c0_17 = arith.constant 0 : index
      %19 = vector.load %arg6[%c0_16, %c0_17] : memref<8x256xf32, #tpu.memory_space<vmem>>, vector<1x256xf32>
      tpu.vector_store %arg6[%c0_16, %c0_17], %18 {strides = array<i32>} : memref<8x256xf32, #tpu.memory_space<vmem>>, vector<1x256xf32>,
      %c0_18 = arith.constant 0 : index
      %c0_19 = arith.constant 0 : index
      %20 = vector.load %arg7[%c0_18, %c0_19] : memref<8x256xf32, #tpu.memory_space<vmem>>, vector<8x256xf32>
      %cst_20 = arith.constant dense<0xFF800000> : vector<256xf32>
      %21 = vector.multi_reduction <maximumf>, %20, %cst_20 [0] : vector<8x256xf32> to vector<256xf32>
      %22 = vector.shape_cast %21 : vector<256xf32> to vector<1x256xf32>
      %c0_21 = arith.constant 0 : index
      %c0_22 = arith.constant 0 : index
      %23 = vector.load %arg7[%c0_21, %c0_22] : memref<8x256xf32, #tpu.memory_space<vmem>>, vector<1x256xf32>
      tpu.vector_store %arg7[%c0_21, %c0_22], %22 {strides = array<i32>} : memref<8x256xf32, #tpu.memory_space<vmem>>, vector<1x256xf32>,
      %cst_23 = arith.constant 0.000000e+00 : f32
      %24 = vector.broadcast %cst_23 : f32 to vector<2x24x128xf32>
      %c0_24 = arith.constant 0 : index
      %c0_25 = arith.constant 0 : index
      %c0_26 = arith.constant 0 : index
      %25 = vector.load %arg8[%c0_24, %c0_25, %c0_26] : memref<2x24x128xf32, #tpu.memory_space<vmem>>, vector<2x24x128xf32>
      tpu.vector_store %arg8[%c0_24, %c0_25, %c0_26], %24 {strides = array<i32>} : memref<2x24x128xf32, #tpu.memory_space<vmem>>, vector<2x24x128xf32>,
      %c0_27 = arith.constant 0 : index
      %c0_28 = arith.constant 0 : index
      %26 = vector.load %arg6[%c0_27, %c0_28] : memref<8x256xf32, #tpu.memory_space<vmem>>, vector<1x16xf32>
      %c0_29 = arith.constant 0 : index
      %c3 = arith.constant 3 : index
      %c3_30 = arith.constant 3 : index
      %27 = vector.load %arg8[%c0_29, %c3, %c3_30] : memref<2x24x128xf32, #tpu.memory_space<vmem>>, vector<1x1x16xf32>
      %28 = vector.shape_cast %27 : vector<1x1x16xf32> to vector<1x16xf32>
      %29 = vector.shape_cast %26 : vector<1x16xf32> to vector<1x1x16xf32>
      tpu.vector_store %arg8[%c0_29, %c3, %c3_30], %29 {strides = array<i32>} : memref<2x24x128xf32, #tpu.memory_space<vmem>>, vector<1x1x16xf32>,
      %c0_31 = arith.constant 0 : index
      %c0_32 = arith.constant 0 : index
      %30 = vector.load %arg7[%c0_31, %c0_32] : memref<8x256xf32, #tpu.memory_space<vmem>>, vector<1x16xf32>
      %c1 = arith.constant 1 : index
      %c3_33 = arith.constant 3 : index
      %c3_34 = arith.constant 3 : index
      %31 = vector.load %arg8[%c1, %c3_33, %c3_34] : memref<2x24x128xf32, #tpu.memory_space<vmem>>, vector<1x1x16xf32>
      %32 = vector.shape_cast %31 : vector<1x1x16xf32> to vector<1x16xf32>
      %33 = vector.shape_cast %30 : vector<1x16xf32> to vector<1x1x16xf32>
      tpu.vector_store %arg8[%c1, %c3_33, %c3_34], %33 {strides = array<i32>} : memref<2x24x128xf32, #tpu.memory_space<vmem>>, vector<1x1x16xf32>,
      %c0_35 = arith.constant 0 : index
      %c16 = arith.constant 16 : index
      %34 = vector.load %arg6[%c0_35, %c16] : memref<8x256xf32, #tpu.memory_space<vmem>>, vector<1x16xf32>
      %c0_36 = arith.constant 0 : index
      %c4 = arith.constant 4 : index
      %c3_37 = arith.constant 3 : index
      %35 = vector.load %arg8[%c0_36, %c4, %c3_37] : memref<2x24x128xf32, #tpu.memory_space<vmem>>, vector<1x1x16xf32>
      %36 = vector.shape_cast %35 : vector<1x1x16xf32> to vector<1x16xf32>
      %37 = vector.shape_cast %34 : vector<1x16xf32> to vector<1x1x16xf32>
      tpu.vector_store %arg8[%c0_36, %c4, %c3_37], %37 {strides = array<i32>} : memref<2x24x128xf32, #tpu.memory_space<vmem>>, vector<1x1x16xf32>,
      %c0_38 = arith.constant 0 : index
      %c16_39 = arith.constant 16 : index
      %38 = vector.load %arg7[%c0_38, %c16_39] : memref<8x256xf32, #tpu.memory_space<vmem>>, vector<1x16xf32>
      %c1_40 = arith.constant 1 : index
      %c4_41 = arith.constant 4 : index
      %c3_42 = arith.constant 3 : index
      %39 = vector.load %arg8[%c1_40, %c4_41, %c3_42] : memref<2x24x128xf32, #tpu.memory_space<vmem>>, vector<1x1x16xf32>
      %40 = vector.shape_cast %39 : vector<1x1x16xf32> to vector<1x16xf32>
      %41 = vector.shape_cast %38 : vector<1x16xf32> to vector<1x1x16xf32>
      tpu.vector_store %arg8[%c1_40, %c4_41, %c3_42], %41 {strides = array<i32>} : memref<2x24x128xf32, #tpu.memory_space<vmem>>, vector<1x1x16xf32>,
      %c0_43 = arith.constant 0 : index
      %c32 = arith.constant 32 : index
      %42 = vector.load %arg6[%c0_43, %c32] : memref<8x256xf32, #tpu.memory_space<vmem>>, vector<1x16xf32>
      %c0_44 = arith.constant 0 : index
      %c5 = arith.constant 5 : index
      %c3_45 = arith.constant 3 : index
      %43 = vector.load %arg8[%c0_44, %c5, %c3_45] : memref<2x24x128xf32, #tpu.memory_space<vmem>>, vector<1x1x16xf32>
      %44 = vector.shape_cast %43 : vector<1x1x16xf32> to vector<1x16xf32>
      %45 = vector.shape_cast %42 : vector<1x16xf32> to vector<1x1x16xf32>
      tpu.vector_store %arg8[%c0_44, %c5, %c3_45], %45 {strides = array<i32>} : memref<2x24x128xf32, #tpu.memory_space<vmem>>, vector<1x1x16xf32>,
      %c0_46 = arith.constant 0 : index
      %c32_47 = arith.constant 32 : index
      %46 = vector.load %arg7[%c0_46, %c32_47] : memref<8x256xf32, #tpu.memory_space<vmem>>, vector<1x16xf32>
      %c1_48 = arith.constant 1 : index
      %c5_49 = arith.constant 5 : index
      %c3_50 = arith.constant 3 : index
      %47 = vector.load %arg8[%c1_48, %c5_49, %c3_50] : memref<2x24x128xf32, #tpu.memory_space<vmem>>, vector<1x1x16xf32>
      %48 = vector.shape_cast %47 : vector<1x1x16xf32> to vector<1x16xf32>
      %49 = vector.shape_cast %46 : vector<1x16xf32> to vector<1x1x16xf32>
      tpu.vector_store %arg8[%c1_48, %c5_49, %c3_50], %49 {strides = array<i32>} : memref<2x24x128xf32, #tpu.memory_space<vmem>>, vector<1x1x16xf32>,
      %c0_51 = arith.constant 0 : index
      %c48 = arith.constant 48 : index
      %50 = vector.load %arg6[%c0_51, %c48] : memref<8x256xf32, #tpu.memory_space<vmem>>, vector<1x16xf32>
      %c0_52 = arith.constant 0 : index
      %c6 = arith.constant 6 : index
      %c3_53 = arith.constant 3 : index
      %51 = vector.load %arg8[%c0_52, %c6, %c3_53] : memref<2x24x128xf32, #tpu.memory_space<vmem>>, vector<1x1x16xf32>
      %52 = vector.shape_cast %51 : vector<1x1x16xf32> to vector<1x16xf32>
      %53 = vector.shape_cast %50 : vector<1x16xf32> to vector<1x1x16xf32>
      tpu.vector_store %arg8[%c0_52, %c6, %c3_53], %53 {strides = array<i32>} : memref<2x24x128xf32, #tpu.memory_space<vmem>>, vector<1x1x16xf32>,
      %c0_54 = arith.constant 0 : index
      %c48_55 = arith.constant 48 : index
      %54 = vector.load %arg7[%c0_54, %c48_55] : memref<8x256xf32, #tpu.memory_space<vmem>>, vector<1x16xf32>
      %c1_56 = arith.constant 1 : index
      %c6_57 = arith.constant 6 : index
      %c3_58 = arith.constant 3 : index
      %55 = vector.load %arg8[%c1_56, %c6_57, %c3_58] : memref<2x24x128xf32, #tpu.memory_space<vmem>>, vector<1x1x16xf32>
      %56 = vector.shape_cast %55 : vector<1x1x16xf32> to vector<1x16xf32>
      %57 = vector.shape_cast %54 : vector<1x16xf32> to vector<1x1x16xf32>
      tpu.vector_store %arg8[%c1_56, %c6_57, %c3_58], %57 {strides = array<i32>} : memref<2x24x128xf32, #tpu.memory_space<vmem>>, vector<1x1x16xf32>,
      %c0_59 = arith.constant 0 : index
      %c64 = arith.constant 64 : index
      %58 = vector.load %arg6[%c0_59, %c64] : memref<8x256xf32, #tpu.memory_space<vmem>>, vector<1x16xf32>
      %c0_60 = arith.constant 0 : index
      %c7 = arith.constant 7 : index
      %c3_61 = arith.constant 3 : index
      %59 = vector.load %arg8[%c0_60, %c7, %c3_61] : memref<2x24x128xf32, #tpu.memory_space<vmem>>, vector<1x1x16xf32>
      %60 = vector.shape_cast %59 : vector<1x1x16xf32> to vector<1x16xf32>
      %61 = vector.shape_cast %58 : vector<1x16xf32> to vector<1x1x16xf32>
      tpu.vector_store %arg8[%c0_60, %c7, %c3_61], %61 {strides = array<i32>} : memref<2x24x128xf32, #tpu.memory_space<vmem>>, vector<1x1x16xf32>,
      %c0_62 = arith.constant 0 : index
      %c64_63 = arith.constant 64 : index
      %62 = vector.load %arg7[%c0_62, %c64_63] : memref<8x256xf32, #tpu.memory_space<vmem>>, vector<1x16xf32>
      %c1_64 = arith.constant 1 : index
      %c7_65 = arith.constant 7 : index
      %c3_66 = arith.constant 3 : index
      %63 = vector.load %arg8[%c1_64, %c7_65, %c3_66] : memref<2x24x128xf32, #tpu.memory_space<vmem>>, vector<1x1x16xf32>
      %64 = vector.shape_cast %63 : vector<1x1x16xf32> to vector<1x16xf32>
      %65 = vector.shape_cast %62 : vector<1x16xf32> to vector<1x1x16xf32>
      tpu.vector_store %arg8[%c1_64, %c7_65, %c3_66], %65 {strides = array<i32>} : memref<2x24x128xf32, #tpu.memory_space<vmem>>, vector<1x1x16xf32>,
      %c0_67 = arith.constant 0 : index
      %c80 = arith.constant 80 : index
      %66 = vector.load %arg6[%c0_67, %c80] : memref<8x256xf32, #tpu.memory_space<vmem>>, vector<1x16xf32>
      %c0_68 = arith.constant 0 : index
      %c8 = arith.constant 8 : index
      %c3_69 = arith.constant 3 : index
      %67 = vector.load %arg8[%c0_68, %c8, %c3_69] : memref<2x24x128xf32, #tpu.memory_space<vmem>>, vector<1x1x16xf32>
      %68 = vector.shape_cast %67 : vector<1x1x16xf32> to vector<1x16xf32>
      %69 = vector.shape_cast %66 : vector<1x16xf32> to vector<1x1x16xf32>
      tpu.vector_store %arg8[%c0_68, %c8, %c3_69], %69 {strides = array<i32>} : memref<2x24x128xf32, #tpu.memory_space<vmem>>, vector<1x1x16xf32>,
      %c0_70 = arith.constant 0 : index
      %c80_71 = arith.constant 80 : index
      %70 = vector.load %arg7[%c0_70, %c80_71] : memref<8x256xf32, #tpu.memory_space<vmem>>, vector<1x16xf32>
      %c1_72 = arith.constant 1 : index
      %c8_73 = arith.constant 8 : index
      %c3_74 = arith.constant 3 : index
      %71 = vector.load %arg8[%c1_72, %c8_73, %c3_74] : memref<2x24x128xf32, #tpu.memory_space<vmem>>, vector<1x1x16xf32>
      %72 = vector.shape_cast %71 : vector<1x1x16xf32> to vector<1x16xf32>
      %73 = vector.shape_cast %70 : vector<1x16xf32> to vector<1x1x16xf32>
      tpu.vector_store %arg8[%c1_72, %c8_73, %c3_74], %73 {strides = array<i32>} : memref<2x24x128xf32, #tpu.memory_space<vmem>>, vector<1x1x16xf32>,
      %c0_75 = arith.constant 0 : index
      %c96 = arith.constant 96 : index
      %74 = vector.load %arg6[%c0_75, %c96] : memref<8x256xf32, #tpu.memory_space<vmem>>, vector<1x16xf32>
      %c0_76 = arith.constant 0 : index
      %c9 = arith.constant 9 : index
      %c3_77 = arith.constant 3 : index
      %75 = vector.load %arg8[%c0_76, %c9, %c3_77] : memref<2x24x128xf32, #tpu.memory_space<vmem>>, vector<1x1x16xf32>
      %76 = vector.shape_cast %75 : vector<1x1x16xf32> to vector<1x16xf32>
      %77 = vector.shape_cast %74 : vector<1x16xf32> to vector<1x1x16xf32>
      tpu.vector_store %arg8[%c0_76, %c9, %c3_77], %77 {strides = array<i32>} : memref<2x24x128xf32, #tpu.memory_space<vmem>>, vector<1x1x16xf32>,
      %c0_78 = arith.constant 0 : index
      %c96_79 = arith.constant 96 : index
      %78 = vector.load %arg7[%c0_78, %c96_79] : memref<8x256xf32, #tpu.memory_space<vmem>>, vector<1x16xf32>
      %c1_80 = arith.constant 1 : index
      %c9_81 = arith.constant 9 : index
      %c3_82 = arith.constant 3 : index
      %79 = vector.load %arg8[%c1_80, %c9_81, %c3_82] : memref<2x24x128xf32, #tpu.memory_space<vmem>>, vector<1x1x16xf32>
      %80 = vector.shape_cast %79 : vector<1x1x16xf32> to vector<1x16xf32>
      %81 = vector.shape_cast %78 : vector<1x16xf32> to vector<1x1x16xf32>
      tpu.vector_store %arg8[%c1_80, %c9_81, %c3_82], %81 {strides = array<i32>} : memref<2x24x128xf32, #tpu.memory_space<vmem>>, vector<1x1x16xf32>,
      %c0_83 = arith.constant 0 : index
      %c112 = arith.constant 112 : index
      %82 = vector.load %arg6[%c0_83, %c112] : memref<8x256xf32, #tpu.memory_space<vmem>>, vector<1x16xf32>
      %c0_84 = arith.constant 0 : index
      %c10 = arith.constant 10 : index
      %c3_85 = arith.constant 3 : index
      %83 = vector.load %arg8[%c0_84, %c10, %c3_85] : memref<2x24x128xf32, #tpu.memory_space<vmem>>, vector<1x1x16xf32>
      %84 = vector.shape_cast %83 : vector<1x1x16xf32> to vector<1x16xf32>
      %85 = vector.shape_cast %82 : vector<1x16xf32> to vector<1x1x16xf32>
      tpu.vector_store %arg8[%c0_84, %c10, %c3_85], %85 {strides = array<i32>} : memref<2x24x128xf32, #tpu.memory_space<vmem>>, vector<1x1x16xf32>,
      %c0_86 = arith.constant 0 : index
      %c112_87 = arith.constant 112 : index
      %86 = vector.load %arg7[%c0_86, %c112_87] : memref<8x256xf32, #tpu.memory_space<vmem>>, vector<1x16xf32>
      %c1_88 = arith.constant 1 : index
      %c10_89 = arith.constant 10 : index
      %c3_90 = arith.constant 3 : index
      %87 = vector.load %arg8[%c1_88, %c10_89, %c3_90] : memref<2x24x128xf32, #tpu.memory_space<vmem>>, vector<1x1x16xf32>
      %88 = vector.shape_cast %87 : vector<1x1x16xf32> to vector<1x16xf32>
      %89 = vector.shape_cast %86 : vector<1x16xf32> to vector<1x1x16xf32>
      tpu.vector_store %arg8[%c1_88, %c10_89, %c3_90], %89 {strides = array<i32>} : memref<2x24x128xf32, #tpu.memory_space<vmem>>, vector<1x1x16xf32>,
      %c0_91 = arith.constant 0 : index
      %c128 = arith.constant 128 : index
      %90 = vector.load %arg6[%c0_91, %c128] : memref<8x256xf32, #tpu.memory_space<vmem>>, vector<1x16xf32>
      %c0_92 = arith.constant 0 : index
      %c11 = arith.constant 11 : index
      %c3_93 = arith.constant 3 : index
      %91 = vector.load %arg8[%c0_92, %c11, %c3_93] : memref<2x24x128xf32, #tpu.memory_space<vmem>>, vector<1x1x16xf32>
      %92 = vector.shape_cast %91 : vector<1x1x16xf32> to vector<1x16xf32>
      %93 = vector.shape_cast %90 : vector<1x16xf32> to vector<1x1x16xf32>
      tpu.vector_store %arg8[%c0_92, %c11, %c3_93], %93 {strides = array<i32>} : memref<2x24x128xf32, #tpu.memory_space<vmem>>, vector<1x1x16xf32>,
      %c0_94 = arith.constant 0 : index
      %c128_95 = arith.constant 128 : index
      %94 = vector.load %arg7[%c0_94, %c128_95] : memref<8x256xf32, #tpu.memory_space<vmem>>, vector<1x16xf32>
      %c1_96 = arith.constant 1 : index
      %c11_97 = arith.constant 11 : index
      %c3_98 = arith.constant 3 : index
      %95 = vector.load %arg8[%c1_96, %c11_97, %c3_98] : memref<2x24x128xf32, #tpu.memory_space<vmem>>, vector<1x1x16xf32>
      %96 = vector.shape_cast %95 : vector<1x1x16xf32> to vector<1x16xf32>
      %97 = vector.shape_cast %94 : vector<1x16xf32> to vector<1x1x16xf32>
      tpu.vector_store %arg8[%c1_96, %c11_97, %c3_98], %97 {strides = array<i32>} : memref<2x24x128xf32, #tpu.memory_space<vmem>>, vector<1x1x16xf32>,
      %c0_99 = arith.constant 0 : index
      %c144 = arith.constant 144 : index
      %98 = vector.load %arg6[%c0_99, %c144] : memref<8x256xf32, #tpu.memory_space<vmem>>, vector<1x16xf32>
      %c0_100 = arith.constant 0 : index
      %c12 = arith.constant 12 : index
      %c3_101 = arith.constant 3 : index
      %99 = vector.load %arg8[%c0_100, %c12, %c3_101] : memref<2x24x128xf32, #tpu.memory_space<vmem>>, vector<1x1x16xf32>
      %100 = vector.shape_cast %99 : vector<1x1x16xf32> to vector<1x16xf32>
      %101 = vector.shape_cast %98 : vector<1x16xf32> to vector<1x1x16xf32>
      tpu.vector_store %arg8[%c0_100, %c12, %c3_101], %101 {strides = array<i32>} : memref<2x24x128xf32, #tpu.memory_space<vmem>>, vector<1x1x16xf32>,
      %c0_102 = arith.constant 0 : index
      %c144_103 = arith.constant 144 : index
      %102 = vector.load %arg7[%c0_102, %c144_103] : memref<8x256xf32, #tpu.memory_space<vmem>>, vector<1x16xf32>
      %c1_104 = arith.constant 1 : index
      %c12_105 = arith.constant 12 : index
      %c3_106 = arith.constant 3 : index
      %103 = vector.load %arg8[%c1_104, %c12_105, %c3_106] : memref<2x24x128xf32, #tpu.memory_space<vmem>>, vector<1x1x16xf32>
      %104 = vector.shape_cast %103 : vector<1x1x16xf32> to vector<1x16xf32>
      %105 = vector.shape_cast %102 : vector<1x16xf32> to vector<1x1x16xf32>
      tpu.vector_store %arg8[%c1_104, %c12_105, %c3_106], %105 {strides = array<i32>} : memref<2x24x128xf32, #tpu.memory_space<vmem>>, vector<1x1x16xf32>,
      %c0_107 = arith.constant 0 : index
      %c160 = arith.constant 160 : index
      %106 = vector.load %arg6[%c0_107, %c160] : memref<8x256xf32, #tpu.memory_space<vmem>>, vector<1x16xf32>
      %c0_108 = arith.constant 0 : index
      %c13 = arith.constant 13 : index
      %c3_109 = arith.constant 3 : index
      %107 = vector.load %arg8[%c0_108, %c13, %c3_109] : memref<2x24x128xf32, #tpu.memory_space<vmem>>, vector<1x1x16xf32>
      %108 = vector.shape_cast %107 : vector<1x1x16xf32> to vector<1x16xf32>
      %109 = vector.shape_cast %106 : vector<1x16xf32> to vector<1x1x16xf32>
      tpu.vector_store %arg8[%c0_108, %c13, %c3_109], %109 {strides = array<i32>} : memref<2x24x128xf32, #tpu.memory_space<vmem>>, vector<1x1x16xf32>,
      %c0_110 = arith.constant 0 : index
      %c160_111 = arith.constant 160 : index
      %110 = vector.load %arg7[%c0_110, %c160_111] : memref<8x256xf32, #tpu.memory_space<vmem>>, vector<1x16xf32>
      %c1_112 = arith.constant 1 : index
      %c13_113 = arith.constant 13 : index
      %c3_114 = arith.constant 3 : index
      %111 = vector.load %arg8[%c1_112, %c13_113, %c3_114] : memref<2x24x128xf32, #tpu.memory_space<vmem>>, vector<1x1x16xf32>
      %112 = vector.shape_cast %111 : vector<1x1x16xf32> to vector<1x16xf32>
      %113 = vector.shape_cast %110 : vector<1x16xf32> to vector<1x1x16xf32>
      tpu.vector_store %arg8[%c1_112, %c13_113, %c3_114], %113 {strides = array<i32>} : memref<2x24x128xf32, #tpu.memory_space<vmem>>, vector<1x1x16xf32>,
      %c0_115 = arith.constant 0 : index
      %c176 = arith.constant 176 : index
      %114 = vector.load %arg6[%c0_115, %c176] : memref<8x256xf32, #tpu.memory_space<vmem>>, vector<1x16xf32>
      %c0_116 = arith.constant 0 : index
      %c14 = arith.constant 14 : index
      %c3_117 = arith.constant 3 : index
      %115 = vector.load %arg8[%c0_116, %c14, %c3_117] : memref<2x24x128xf32, #tpu.memory_space<vmem>>, vector<1x1x16xf32>
      %116 = vector.shape_cast %115 : vector<1x1x16xf32> to vector<1x16xf32>
      %117 = vector.shape_cast %114 : vector<1x16xf32> to vector<1x1x16xf32>
      tpu.vector_store %arg8[%c0_116, %c14, %c3_117], %117 {strides = array<i32>} : memref<2x24x128xf32, #tpu.memory_space<vmem>>, vector<1x1x16xf32>,
      %c0_118 = arith.constant 0 : index
      %c176_119 = arith.constant 176 : index
      %118 = vector.load %arg7[%c0_118, %c176_119] : memref<8x256xf32, #tpu.memory_space<vmem>>, vector<1x16xf32>
      %c1_120 = arith.constant 1 : index
      %c14_121 = arith.constant 14 : index
      %c3_122 = arith.constant 3 : index
      %119 = vector.load %arg8[%c1_120, %c14_121, %c3_122] : memref<2x24x128xf32, #tpu.memory_space<vmem>>, vector<1x1x16xf32>
      %120 = vector.shape_cast %119 : vector<1x1x16xf32> to vector<1x16xf32>
      %121 = vector.shape_cast %118 : vector<1x16xf32> to vector<1x1x16xf32>
      tpu.vector_store %arg8[%c1_120, %c14_121, %c3_122], %121 {strides = array<i32>} : memref<2x24x128xf32, #tpu.memory_space<vmem>>, vector<1x1x16xf32>,
      %c0_123 = arith.constant 0 : index
      %c192 = arith.constant 192 : index
      %122 = vector.load %arg6[%c0_123, %c192] : memref<8x256xf32, #tpu.memory_space<vmem>>, vector<1x16xf32>
      %c0_124 = arith.constant 0 : index
      %c15 = arith.constant 15 : index
      %c3_125 = arith.constant 3 : index
      %123 = vector.load %arg8[%c0_124, %c15, %c3_125] : memref<2x24x128xf32, #tpu.memory_space<vmem>>, vector<1x1x16xf32>
      %124 = vector.shape_cast %123 : vector<1x1x16xf32> to vector<1x16xf32>
      %125 = vector.shape_cast %122 : vector<1x16xf32> to vector<1x1x16xf32>
      tpu.vector_store %arg8[%c0_124, %c15, %c3_125], %125 {strides = array<i32>} : memref<2x24x128xf32, #tpu.memory_space<vmem>>, vector<1x1x16xf32>,
      %c0_126 = arith.constant 0 : index
      %c192_127 = arith.constant 192 : index
      %126 = vector.load %arg7[%c0_126, %c192_127] : memref<8x256xf32, #tpu.memory_space<vmem>>, vector<1x16xf32>
      %c1_128 = arith.constant 1 : index
      %c15_129 = arith.constant 15 : index
      %c3_130 = arith.constant 3 : index
      %127 = vector.load %arg8[%c1_128, %c15_129, %c3_130] : memref<2x24x128xf32, #tpu.memory_space<vmem>>, vector<1x1x16xf32>
      %128 = vector.shape_cast %127 : vector<1x1x16xf32> to vector<1x16xf32>
      %129 = vector.shape_cast %126 : vector<1x16xf32> to vector<1x1x16xf32>
      tpu.vector_store %arg8[%c1_128, %c15_129, %c3_130], %129 {strides = array<i32>} : memref<2x24x128xf32, #tpu.memory_space<vmem>>, vector<1x1x16xf32>,
      %c0_131 = arith.constant 0 : index
      %c208 = arith.constant 208 : index
      %130 = vector.load %arg6[%c0_131, %c208] : memref<8x256xf32, #tpu.memory_space<vmem>>, vector<1x16xf32>
      %c0_132 = arith.constant 0 : index
      %c16_133 = arith.constant 16 : index
      %c3_134 = arith.constant 3 : index
      %131 = vector.load %arg8[%c0_132, %c16_133, %c3_134] : memref<2x24x128xf32, #tpu.memory_space<vmem>>, vector<1x1x16xf32>
      %132 = vector.shape_cast %131 : vector<1x1x16xf32> to vector<1x16xf32>
      %133 = vector.shape_cast %130 : vector<1x16xf32> to vector<1x1x16xf32>
      tpu.vector_store %arg8[%c0_132, %c16_133, %c3_134], %133 {strides = array<i32>} : memref<2x24x128xf32, #tpu.memory_space<vmem>>, vector<1x1x16xf32>,
      %c0_135 = arith.constant 0 : index
      %c208_136 = arith.constant 208 : index
      %134 = vector.load %arg7[%c0_135, %c208_136] : memref<8x256xf32, #tpu.memory_space<vmem>>, vector<1x16xf32>
      %c1_137 = arith.constant 1 : index
      %c16_138 = arith.constant 16 : index
      %c3_139 = arith.constant 3 : index
      %135 = vector.load %arg8[%c1_137, %c16_138, %c3_139] : memref<2x24x128xf32, #tpu.memory_space<vmem>>, vector<1x1x16xf32>
      %136 = vector.shape_cast %135 : vector<1x1x16xf32> to vector<1x16xf32>
      %137 = vector.shape_cast %134 : vector<1x16xf32> to vector<1x1x16xf32>
      tpu.vector_store %arg8[%c1_137, %c16_138, %c3_139], %137 {strides = array<i32>} : memref<2x24x128xf32, #tpu.memory_space<vmem>>, vector<1x1x16xf32>,
      %c0_140 = arith.constant 0 : index
      %c224 = arith.constant 224 : index
      %138 = vector.load %arg6[%c0_140, %c224] : memref<8x256xf32, #tpu.memory_space<vmem>>, vector<1x16xf32>
      %c0_141 = arith.constant 0 : index
      %c17 = arith.constant 17 : index
      %c3_142 = arith.constant 3 : index
      %139 = vector.load %arg8[%c0_141, %c17, %c3_142] : memref<2x24x128xf32, #tpu.memory_space<vmem>>, vector<1x1x16xf32>
      %140 = vector.shape_cast %139 : vector<1x1x16xf32> to vector<1x16xf32>
      %141 = vector.shape_cast %138 : vector<1x16xf32> to vector<1x1x16xf32>
      tpu.vector_store %arg8[%c0_141, %c17, %c3_142], %141 {strides = array<i32>} : memref<2x24x128xf32, #tpu.memory_space<vmem>>, vector<1x1x16xf32>,
      %c0_143 = arith.constant 0 : index
      %c224_144 = arith.constant 224 : index
      %142 = vector.load %arg7[%c0_143, %c224_144] : memref<8x256xf32, #tpu.memory_space<vmem>>, vector<1x16xf32>
      %c1_145 = arith.constant 1 : index
      %c17_146 = arith.constant 17 : index
      %c3_147 = arith.constant 3 : index
      %143 = vector.load %arg8[%c1_145, %c17_146, %c3_147] : memref<2x24x128xf32, #tpu.memory_space<vmem>>, vector<1x1x16xf32>
      %144 = vector.shape_cast %143 : vector<1x1x16xf32> to vector<1x16xf32>
      %145 = vector.shape_cast %142 : vector<1x16xf32> to vector<1x1x16xf32>
      tpu.vector_store %arg8[%c1_145, %c17_146, %c3_147], %145 {strides = array<i32>} : memref<2x24x128xf32, #tpu.memory_space<vmem>>, vector<1x1x16xf32>,
      %c0_148 = arith.constant 0 : index
      %c240 = arith.constant 240 : index
      %146 = vector.load %arg6[%c0_148, %c240] : memref<8x256xf32, #tpu.memory_space<vmem>>, vector<1x16xf32>
      %c0_149 = arith.constant 0 : index
      %c18 = arith.constant 18 : index
      %c3_150 = arith.constant 3 : index
      %147 = vector.load %arg8[%c0_149, %c18, %c3_150] : memref<2x24x128xf32, #tpu.memory_space<vmem>>, vector<1x1x16xf32>
      %148 = vector.shape_cast %147 : vector<1x1x16xf32> to vector<1x16xf32>
      %149 = vector.shape_cast %146 : vector<1x16xf32> to vector<1x1x16xf32>
      tpu.vector_store %arg8[%c0_149, %c18, %c3_150], %149 {strides = array<i32>} : memref<2x24x128xf32, #tpu.memory_space<vmem>>, vector<1x1x16xf32>,
      %c0_151 = arith.constant 0 : index
      %c240_152 = arith.constant 240 : index
      %150 = vector.load %arg7[%c0_151, %c240_152] : memref<8x256xf32, #tpu.memory_space<vmem>>, vector<1x16xf32>
      %c1_153 = arith.constant 1 : index
      %c18_154 = arith.constant 18 : index
      %c3_155 = arith.constant 3 : index
      %151 = vector.load %arg8[%c1_153, %c18_154, %c3_155] : memref<2x24x128xf32, #tpu.memory_space<vmem>>, vector<1x1x16xf32>
      %152 = vector.shape_cast %151 : vector<1x1x16xf32> to vector<1x16xf32>
      %153 = vector.shape_cast %150 : vector<1x16xf32> to vector<1x1x16xf32>
      tpu.vector_store %arg8[%c1_153, %c18_154, %c3_155], %153 {strides = array<i32>} : memref<2x24x128xf32, #tpu.memory_space<vmem>>, vector<1x1x16xf32>,
      %c0_156 = arith.constant 0 : index
      %154 = memref.load %arg2[%c0_156] : memref<98xf32, #tpu.memory_space<smem>>
      %c1_157 = arith.constant 1 : index
      %155 = memref.load %arg2[%c1_157] : memref<98xf32, #tpu.memory_space<smem>>
      %c2 = arith.constant 2 : index
      %156 = memref.load %arg2[%c2] : memref<98xf32, #tpu.memory_space<smem>>
      %c3_158 = arith.constant 3 : index
      %157 = memref.load %arg2[%c3_158] : memref<98xf32, #tpu.memory_space<smem>>
      %c4_159 = arith.constant 4 : index
      %158 = memref.load %arg2[%c4_159] : memref<98xf32, #tpu.memory_space<smem>>
      %c5_160 = arith.constant 5 : index
      %159 = memref.load %arg2[%c5_160] : memref<98xf32, #tpu.memory_space<smem>>
      %c6_161 = arith.constant 6 : index
      %160 = memref.load %arg2[%c6_161] : memref<98xf32, #tpu.memory_space<smem>>
      %c7_162 = arith.constant 7 : index
      %161 = memref.load %arg2[%c7_162] : memref<98xf32, #tpu.memory_space<smem>>
      %c8_163 = arith.constant 8 : index
      %162 = memref.load %arg2[%c8_163] : memref<98xf32, #tpu.memory_space<smem>>
      %c9_164 = arith.constant 9 : index
      %163 = memref.load %arg2[%c9_164] : memref<98xf32, #tpu.memory_space<smem>>
      %c10_165 = arith.constant 10 : index
      %164 = memref.load %arg2[%c10_165] : memref<98xf32, #tpu.memory_space<smem>>
      %c11_166 = arith.constant 11 : index
      %165 = memref.load %arg2[%c11_166] : memref<98xf32, #tpu.memory_space<smem>>
      %c12_167 = arith.constant 12 : index
      %166 = memref.load %arg2[%c12_167] : memref<98xf32, #tpu.memory_space<smem>>
      %c13_168 = arith.constant 13 : index
      %167 = memref.load %arg2[%c13_168] : memref<98xf32, #tpu.memory_space<smem>>
      %c14_169 = arith.constant 14 : index
      %168 = memref.load %arg2[%c14_169] : memref<98xf32, #tpu.memory_space<smem>>
      %c15_170 = arith.constant 15 : index
      %169 = memref.load %arg2[%c15_170] : memref<98xf32, #tpu.memory_space<smem>>
      %c16_171 = arith.constant 16 : index
      %170 = memref.load %arg2[%c16_171] : memref<98xf32, #tpu.memory_space<smem>>
      %c17_172 = arith.constant 17 : index
      %171 = memref.load %arg2[%c17_172] : memref<98xf32, #tpu.memory_space<smem>>
      %c18_173 = arith.constant 18 : index
      %172 = memref.load %arg2[%c18_173] : memref<98xf32, #tpu.memory_space<smem>>
      %c19 = arith.constant 19 : index
      %173 = memref.load %arg2[%c19] : memref<98xf32, #tpu.memory_space<smem>>
      %c20 = arith.constant 20 : index
      %174 = memref.load %arg2[%c20] : memref<98xf32, #tpu.memory_space<smem>>
      %c21 = arith.constant 21 : index
      %175 = memref.load %arg2[%c21] : memref<98xf32, #tpu.memory_space<smem>>
      %c22 = arith.constant 22 : index
      %176 = memref.load %arg2[%c22] : memref<98xf32, #tpu.memory_space<smem>>
      %c23 = arith.constant 23 : index
      %177 = memref.load %arg2[%c23] : memref<98xf32, #tpu.memory_space<smem>>
      %c24 = arith.constant 24 : index
      %178 = memref.load %arg2[%c24] : memref<98xf32, #tpu.memory_space<smem>>
      %c25 = arith.constant 25 : index
      %179 = memref.load %arg2[%c25] : memref<98xf32, #tpu.memory_space<smem>>
      %c26 = arith.constant 26 : index
      %180 = memref.load %arg2[%c26] : memref<98xf32, #tpu.memory_space<smem>>
      %c27 = arith.constant 27 : index
      %181 = memref.load %arg2[%c27] : memref<98xf32, #tpu.memory_space<smem>>
      %c28 = arith.constant 28 : index
      %182 = memref.load %arg2[%c28] : memref<98xf32, #tpu.memory_space<smem>>
      %c29 = arith.constant 29 : index
      %183 = memref.load %arg2[%c29] : memref<98xf32, #tpu.memory_space<smem>>
      %c30 = arith.constant 30 : index
      %184 = memref.load %arg2[%c30] : memref<98xf32, #tpu.memory_space<smem>>
      %c31 = arith.constant 31 : index
      %185 = memref.load %arg2[%c31] : memref<98xf32, #tpu.memory_space<smem>>
      %c32_174 = arith.constant 32 : index
      %186 = memref.load %arg2[%c32_174] : memref<98xf32, #tpu.memory_space<smem>>
      %c33 = arith.constant 33 : index
      %187 = memref.load %arg2[%c33] : memref<98xf32, #tpu.memory_space<smem>>
      %c34 = arith.constant 34 : index
      %188 = memref.load %arg2[%c34] : memref<98xf32, #tpu.memory_space<smem>>
      %c35 = arith.constant 35 : index
      %189 = memref.load %arg2[%c35] : memref<98xf32, #tpu.memory_space<smem>>
      %c36 = arith.constant 36 : index
      %190 = memref.load %arg2[%c36] : memref<98xf32, #tpu.memory_space<smem>>
      %c37 = arith.constant 37 : index
      %191 = memref.load %arg2[%c37] : memref<98xf32, #tpu.memory_space<smem>>
      %c38 = arith.constant 38 : index
      %192 = memref.load %arg2[%c38] : memref<98xf32, #tpu.memory_space<smem>>
      %c39 = arith.constant 39 : index
      %193 = memref.load %arg2[%c39] : memref<98xf32, #tpu.memory_space<smem>>
      %c40 = arith.constant 40 : index
      %194 = memref.load %arg2[%c40] : memref<98xf32, #tpu.memory_space<smem>>
      %c41 = arith.constant 41 : index
      %195 = memref.load %arg2[%c41] : memref<98xf32, #tpu.memory_space<smem>>
      %c42 = arith.constant 42 : index
      %196 = memref.load %arg2[%c42] : memref<98xf32, #tpu.memory_space<smem>>
      %c43 = arith.constant 43 : index
      %197 = memref.load %arg2[%c43] : memref<98xf32, #tpu.memory_space<smem>>
      %c44 = arith.constant 44 : index
      %198 = memref.load %arg2[%c44] : memref<98xf32, #tpu.memory_space<smem>>
      %c45 = arith.constant 45 : index
      %199 = memref.load %arg2[%c45] : memref<98xf32, #tpu.memory_space<smem>>
      %c46 = arith.constant 46 : index
      %200 = memref.load %arg2[%c46] : memref<98xf32, #tpu.memory_space<smem>>
      %c47 = arith.constant 47 : index
      %201 = memref.load %arg2[%c47] : memref<98xf32, #tpu.memory_space<smem>>
      %c48_175 = arith.constant 48 : index
      %202 = memref.load %arg2[%c48_175] : memref<98xf32, #tpu.memory_space<smem>>
      %c49 = arith.constant 49 : index
      %203 = memref.load %arg2[%c49] : memref<98xf32, #tpu.memory_space<smem>>
      %c50 = arith.constant 50 : index
      %204 = memref.load %arg2[%c50] : memref<98xf32, #tpu.memory_space<smem>>
      %c51 = arith.constant 51 : index
      %205 = memref.load %arg2[%c51] : memref<98xf32, #tpu.memory_space<smem>>
      %c52 = arith.constant 52 : index
      %206 = memref.load %arg2[%c52] : memref<98xf32, #tpu.memory_space<smem>>
      %c53 = arith.constant 53 : index
      %207 = memref.load %arg2[%c53] : memref<98xf32, #tpu.memory_space<smem>>
      %c54 = arith.constant 54 : index
      %208 = memref.load %arg2[%c54] : memref<98xf32, #tpu.memory_space<smem>>
      %c55 = arith.constant 55 : index
      %209 = memref.load %arg2[%c55] : memref<98xf32, #tpu.memory_space<smem>>
      %c56 = arith.constant 56 : index
      %210 = memref.load %arg2[%c56] : memref<98xf32, #tpu.memory_space<smem>>
      %c57 = arith.constant 57 : index
      %211 = memref.load %arg2[%c57] : memref<98xf32, #tpu.memory_space<smem>>
      %c58 = arith.constant 58 : index
      %212 = memref.load %arg2[%c58] : memref<98xf32, #tpu.memory_space<smem>>
      %c59 = arith.constant 59 : index
      %213 = memref.load %arg2[%c59] : memref<98xf32, #tpu.memory_space<smem>>
      %c60 = arith.constant 60 : index
      %214 = memref.load %arg2[%c60] : memref<98xf32, #tpu.memory_space<smem>>
      %c61 = arith.constant 61 : index
      %215 = memref.load %arg2[%c61] : memref<98xf32, #tpu.memory_space<smem>>
      %c62 = arith.constant 62 : index
      %216 = memref.load %arg2[%c62] : memref<98xf32, #tpu.memory_space<smem>>
      %c63 = arith.constant 63 : index
      %217 = memref.load %arg2[%c63] : memref<98xf32, #tpu.memory_space<smem>>
      %c64_176 = arith.constant 64 : index
      %218 = memref.load %arg2[%c64_176] : memref<98xf32, #tpu.memory_space<smem>>
      %c65 = arith.constant 65 : index
      %219 = memref.load %arg2[%c65] : memref<98xf32, #tpu.memory_space<smem>>
      %c66 = arith.constant 66 : index
      %220 = memref.load %arg2[%c66] : memref<98xf32, #tpu.memory_space<smem>>
      %c67 = arith.constant 67 : index
      %221 = memref.load %arg2[%c67] : memref<98xf32, #tpu.memory_space<smem>>
      %c68 = arith.constant 68 : index
      %222 = memref.load %arg2[%c68] : memref<98xf32, #tpu.memory_space<smem>>
      %c69 = arith.constant 69 : index
      %223 = memref.load %arg2[%c69] : memref<98xf32, #tpu.memory_space<smem>>
      %c70 = arith.constant 70 : index
      %224 = memref.load %arg2[%c70] : memref<98xf32, #tpu.memory_space<smem>>
      %c71 = arith.constant 71 : index
      %225 = memref.load %arg2[%c71] : memref<98xf32, #tpu.memory_space<smem>>
      %c72 = arith.constant 72 : index
      %226 = memref.load %arg2[%c72] : memref<98xf32, #tpu.memory_space<smem>>
      %c73 = arith.constant 73 : index
      %227 = memref.load %arg2[%c73] : memref<98xf32, #tpu.memory_space<smem>>
      %c74 = arith.constant 74 : index
      %228 = memref.load %arg2[%c74] : memref<98xf32, #tpu.memory_space<smem>>
      %c75 = arith.constant 75 : index
      %229 = memref.load %arg2[%c75] : memref<98xf32, #tpu.memory_space<smem>>
      %c76 = arith.constant 76 : index
      %230 = memref.load %arg2[%c76] : memref<98xf32, #tpu.memory_space<smem>>
      %c77 = arith.constant 77 : index
      %231 = memref.load %arg2[%c77] : memref<98xf32, #tpu.memory_space<smem>>
      %c78 = arith.constant 78 : index
      %232 = memref.load %arg2[%c78] : memref<98xf32, #tpu.memory_space<smem>>
      %c79 = arith.constant 79 : index
      %233 = memref.load %arg2[%c79] : memref<98xf32, #tpu.memory_space<smem>>
      %c80_177 = arith.constant 80 : index
      %234 = memref.load %arg2[%c80_177] : memref<98xf32, #tpu.memory_space<smem>>
      %c81 = arith.constant 81 : index
      %235 = memref.load %arg2[%c81] : memref<98xf32, #tpu.memory_space<smem>>
      %c82 = arith.constant 82 : index
      %236 = memref.load %arg2[%c82] : memref<98xf32, #tpu.memory_space<smem>>
      %c83 = arith.constant 83 : index
      %237 = memref.load %arg2[%c83] : memref<98xf32, #tpu.memory_space<smem>>
      %c84 = arith.constant 84 : index
      %238 = memref.load %arg2[%c84] : memref<98xf32, #tpu.memory_space<smem>>
      %c85 = arith.constant 85 : index
      %239 = memref.load %arg2[%c85] : memref<98xf32, #tpu.memory_space<smem>>
      %c86 = arith.constant 86 : index
      %240 = memref.load %arg2[%c86] : memref<98xf32, #tpu.memory_space<smem>>
      %c87 = arith.constant 87 : index
      %241 = memref.load %arg2[%c87] : memref<98xf32, #tpu.memory_space<smem>>
      %c88 = arith.constant 88 : index
      %242 = memref.load %arg2[%c88] : memref<98xf32, #tpu.memory_space<smem>>
      %c89 = arith.constant 89 : index
      %243 = memref.load %arg2[%c89] : memref<98xf32, #tpu.memory_space<smem>>
      %c90 = arith.constant 90 : index
      %244 = memref.load %arg2[%c90] : memref<98xf32, #tpu.memory_space<smem>>
      %c91 = arith.constant 91 : index
      %245 = memref.load %arg2[%c91] : memref<98xf32, #tpu.memory_space<smem>>
      %c92 = arith.constant 92 : index
      %246 = memref.load %arg2[%c92] : memref<98xf32, #tpu.memory_space<smem>>
      %c93 = arith.constant 93 : index
      %247 = memref.load %arg2[%c93] : memref<98xf32, #tpu.memory_space<smem>>
      %c94 = arith.constant 94 : index
      %248 = memref.load %arg2[%c94] : memref<98xf32, #tpu.memory_space<smem>>
      %c95 = arith.constant 95 : index
      %249 = memref.load %arg2[%c95] : memref<98xf32, #tpu.memory_space<smem>>
      %c96_178 = arith.constant 96 : index
      %250 = memref.load %arg2[%c96_178] : memref<98xf32, #tpu.memory_space<smem>>
      %c97 = arith.constant 97 : index
      %251 = memref.load %arg2[%c97] : memref<98xf32, #tpu.memory_space<smem>>
      %c0_179 = arith.constant 0 : index
      %252 = memref.load %arg3[%c0_179] : memref<1xf32, #tpu.memory_space<smem>>
      %c0_180 = arith.constant 0 : index
      %c0_181 = arith.constant 0 : index
      %c0_182 = arith.constant 0 : index
      %253 = vector.load %arg8[%c0_180, %c0_181, %c0_182] : memref<2x24x128xf32, #tpu.memory_space<vmem>>, vector<1x8x128xf32>
      %254 = vector.shape_cast %253 : vector<1x8x128xf32> to vector<8x128xf32>
      %c0_183 = arith.constant 0 : index
      %c1_184 = arith.constant 1 : index
      %c0_185 = arith.constant 0 : index
      %255 = vector.load %arg8[%c0_183, %c1_184, %c0_185] : memref<2x24x128xf32, #tpu.memory_space<vmem>>, vector<1x8x128xf32>
      %256 = vector.shape_cast %255 : vector<1x8x128xf32> to vector<8x128xf32>
      %c0_186 = arith.constant 0 : index
      %c2_187 = arith.constant 2 : index
      %c0_188 = arith.constant 0 : index
      %257 = vector.load %arg8[%c0_186, %c2_187, %c0_188] : memref<2x24x128xf32, #tpu.memory_space<vmem>>, vector<1x8x128xf32>
      %258 = vector.shape_cast %257 : vector<1x8x128xf32> to vector<8x128xf32>
      %c0_189 = arith.constant 0 : index
      %c3_190 = arith.constant 3 : index
      %c0_191 = arith.constant 0 : index
      %259 = vector.load %arg8[%c0_189, %c3_190, %c0_191] : memref<2x24x128xf32, #tpu.memory_space<vmem>>, vector<1x8x128xf32>
      %260 = vector.shape_cast %259 : vector<1x8x128xf32> to vector<8x128xf32>
      %c0_192 = arith.constant 0 : index
      %c4_193 = arith.constant 4 : index
      %c0_194 = arith.constant 0 : index
      %261 = vector.load %arg8[%c0_192, %c4_193, %c0_194] : memref<2x24x128xf32, #tpu.memory_space<vmem>>, vector<1x8x128xf32>
      %262 = vector.shape_cast %261 : vector<1x8x128xf32> to vector<8x128xf32>
      %c0_195 = arith.constant 0 : index
      %c5_196 = arith.constant 5 : index
      %c0_197 = arith.constant 0 : index
      %263 = vector.load %arg8[%c0_195, %c5_196, %c0_197] : memref<2x24x128xf32, #tpu.memory_space<vmem>>, vector<1x8x128xf32>
      %264 = vector.shape_cast %263 : vector<1x8x128xf32> to vector<8x128xf32>
      %c0_198 = arith.constant 0 : index
      %c6_199 = arith.constant 6 : index
      %c0_200 = arith.constant 0 : index
      %265 = vector.load %arg8[%c0_198, %c6_199, %c0_200] : memref<2x24x128xf32, #tpu.memory_space<vmem>>, vector<1x8x128xf32>
      %266 = vector.shape_cast %265 : vector<1x8x128xf32> to vector<8x128xf32>
      %c1_201 = arith.constant 1 : index
      %c0_202 = arith.constant 0 : index
      %c0_203 = arith.constant 0 : index
      %267 = vector.load %arg8[%c1_201, %c0_202, %c0_203] : memref<2x24x128xf32, #tpu.memory_space<vmem>>, vector<1x8x128xf32>
      %268 = vector.shape_cast %267 : vector<1x8x128xf32> to vector<8x128xf32>
      %c1_204 = arith.constant 1 : index
      %c1_205 = arith.constant 1 : index
      %c0_206 = arith.constant 0 : index
      %269 = vector.load %arg8[%c1_204, %c1_205, %c0_206] : memref<2x24x128xf32, #tpu.memory_space<vmem>>, vector<1x8x128xf32>
      %270 = vector.shape_cast %269 : vector<1x8x128xf32> to vector<8x128xf32>
      %c1_207 = arith.constant 1 : index
      %c2_208 = arith.constant 2 : index
      %c0_209 = arith.constant 0 : index
      %271 = vector.load %arg8[%c1_207, %c2_208, %c0_209] : memref<2x24x128xf32, #tpu.memory_space<vmem>>, vector<1x8x128xf32>
      %272 = vector.shape_cast %271 : vector<1x8x128xf32> to vector<8x128xf32>
      %c1_210 = arith.constant 1 : index
      %c3_211 = arith.constant 3 : index
      %c0_212 = arith.constant 0 : index
      %273 = vector.load %arg8[%c1_210, %c3_211, %c0_212] : memref<2x24x128xf32, #tpu.memory_space<vmem>>, vector<1x8x128xf32>
      %274 = vector.shape_cast %273 : vector<1x8x128xf32> to vector<8x128xf32>
      %c1_213 = arith.constant 1 : index
      %c4_214 = arith.constant 4 : index
      %c0_215 = arith.constant 0 : index
      %275 = vector.load %arg8[%c1_213, %c4_214, %c0_215] : memref<2x24x128xf32, #tpu.memory_space<vmem>>, vector<1x8x128xf32>
      %276 = vector.shape_cast %275 : vector<1x8x128xf32> to vector<8x128xf32>
      %c1_216 = arith.constant 1 : index
      %c5_217 = arith.constant 5 : index
      %c0_218 = arith.constant 0 : index
      %277 = vector.load %arg8[%c1_216, %c5_217, %c0_218] : memref<2x24x128xf32, #tpu.memory_space<vmem>>, vector<1x8x128xf32>
      %278 = vector.shape_cast %277 : vector<1x8x128xf32> to vector<8x128xf32>
      %c1_219 = arith.constant 1 : index
      %c6_220 = arith.constant 6 : index
      %c0_221 = arith.constant 0 : index
      %279 = vector.load %arg8[%c1_219, %c6_220, %c0_221] : memref<2x24x128xf32, #tpu.memory_space<vmem>>, vector<1x8x128xf32>
      %280 = vector.shape_cast %279 : vector<1x8x128xf32> to vector<8x128xf32>
      %281 = vector.broadcast %154 : f32 to vector<8x128xf32>
      %282 = arith.mulf %254, %281 : vector<8x128xf32>
      %283 = vector.broadcast %203 : f32 to vector<8x128xf32>
      %284 = arith.mulf %268, %283 : vector<8x128xf32>
      %285 = arith.addf %282, %284 : vector<8x128xf32>
      %286 = vector.broadcast %161 : f32 to vector<8x128xf32>
      %287 = arith.mulf %256, %286 : vector<8x128xf32>
      %288 = arith.addf %285, %287 : vector<8x128xf32>
      %289 = vector.broadcast %210 : f32 to vector<8x128xf32>
      %290 = arith.mulf %270, %289 : vector<8x128xf32>
      %291 = arith.addf %288, %290 : vector<8x128xf32>
      %292 = vector.broadcast %168 : f32 to vector<8x128xf32>
      %293 = arith.mulf %258, %292 : vector<8x128xf32>
      %294 = arith.addf %291, %293 : vector<8x128xf32>
      %295 = vector.broadcast %217 : f32 to vector<8x128xf32>
      %296 = arith.mulf %272, %295 : vector<8x128xf32>
      %297 = arith.addf %294, %296 : vector<8x128xf32>
      %298 = vector.broadcast %175 : f32 to vector<8x128xf32>
      %299 = arith.mulf %260, %298 : vector<8x128xf32>
      %300 = arith.addf %297, %299 : vector<8x128xf32>
      %301 = vector.broadcast %224 : f32 to vector<8x128xf32>
      %302 = arith.mulf %274, %301 : vector<8x128xf32>
      %303 = arith.addf %300, %302 : vector<8x128xf32>
      %304 = vector.broadcast %182 : f32 to vector<8x128xf32>
      %305 = arith.mulf %262, %304 : vector<8x128xf32>
      %306 = arith.addf %303, %305 : vector<8x128xf32>
      %307 = vector.broadcast %231 : f32 to vector<8x128xf32>
      %308 = arith.mulf %276, %307 : vector<8x128xf32>
      %309 = arith.addf %306, %308 : vector<8x128xf32>
      %310 = vector.broadcast %189 : f32 to vector<8x128xf32>
      %311 = arith.mulf %264, %310 : vector<8x128xf32>
      %312 = arith.addf %309, %311 : vector<8x128xf32>
      %313 = vector.broadcast %238 : f32 to vector<8x128xf32>
      %314 = arith.mulf %278, %313 : vector<8x128xf32>
      %315 = arith.addf %312, %314 : vector<8x128xf32>
      %316 = vector.broadcast %196 : f32 to vector<8x128xf32>
      %317 = arith.mulf %266, %316 : vector<8x128xf32>
      %318 = arith.addf %315, %317 : vector<8x128xf32>
      %319 = vector.broadcast %245 : f32 to vector<8x128xf32>
      %320 = arith.mulf %280, %319 : vector<8x128xf32>
      %321 = arith.addf %318, %320 : vector<8x128xf32>
      %322 = vector.extract_strided_slice %321 {offsets = [0, 0], sizes = [8, 16], strides = [1, 1]} : vector<8x128xf32> to vector<8x16xf32>
      %323 = vector.broadcast %155 : f32 to vector<8x128xf32>
      %324 = arith.mulf %254, %323 : vector<8x128xf32>
      %325 = vector.broadcast %204 : f32 to vector<8x128xf32>
      %326 = arith.mulf %268, %325 : vector<8x128xf32>
      %327 = arith.addf %324, %326 : vector<8x128xf32>
      %328 = vector.broadcast %162 : f32 to vector<8x128xf32>
      %329 = arith.mulf %256, %328 : vector<8x128xf32>
      %330 = arith.addf %327, %329 : vector<8x128xf32>
      %331 = vector.broadcast %211 : f32 to vector<8x128xf32>
      %332 = arith.mulf %270, %331 : vector<8x128xf32>
      %333 = arith.addf %330, %332 : vector<8x128xf32>
      %334 = vector.broadcast %169 : f32 to vector<8x128xf32>
      %335 = arith.mulf %258, %334 : vector<8x128xf32>
      %336 = arith.addf %333, %335 : vector<8x128xf32>
      %337 = vector.broadcast %218 : f32 to vector<8x128xf32>
      %338 = arith.mulf %272, %337 : vector<8x128xf32>
      %339 = arith.addf %336, %338 : vector<8x128xf32>
      %340 = vector.broadcast %176 : f32 to vector<8x128xf32>
      %341 = arith.mulf %260, %340 : vector<8x128xf32>
      %342 = arith.addf %339, %341 : vector<8x128xf32>
      %343 = vector.broadcast %225 : f32 to vector<8x128xf32>
      %344 = arith.mulf %274, %343 : vector<8x128xf32>
      %345 = arith.addf %342, %344 : vector<8x128xf32>
      %346 = vector.broadcast %183 : f32 to vector<8x128xf32>
      %347 = arith.mulf %262, %346 : vector<8x128xf32>
      %348 = arith.addf %345, %347 : vector<8x128xf32>
      %349 = vector.broadcast %232 : f32 to vector<8x128xf32>
      %350 = arith.mulf %276, %349 : vector<8x128xf32>
      %351 = arith.addf %348, %350 : vector<8x128xf32>
      %352 = vector.broadcast %190 : f32 to vector<8x128xf32>
      %353 = arith.mulf %264, %352 : vector<8x128xf32>
      %354 = arith.addf %351, %353 : vector<8x128xf32>
      %355 = vector.broadcast %239 : f32 to vector<8x128xf32>
      %356 = arith.mulf %278, %355 : vector<8x128xf32>
      %357 = arith.addf %354, %356 : vector<8x128xf32>
      %358 = vector.broadcast %197 : f32 to vector<8x128xf32>
      %359 = arith.mulf %266, %358 : vector<8x128xf32>
      %360 = arith.addf %357, %359 : vector<8x128xf32>
      %361 = vector.broadcast %246 : f32 to vector<8x128xf32>
      %362 = arith.mulf %280, %361 : vector<8x128xf32>
      %363 = arith.addf %360, %362 : vector<8x128xf32>
      %364 = vector.extract_strided_slice %363 {offsets = [0, 1], sizes = [8, 16], strides = [1, 1]} : vector<8x128xf32> to vector<8x16xf32>
      %365 = arith.addf %322, %364 : vector<8x16xf32>
      %366 = vector.broadcast %156 : f32 to vector<8x128xf32>
      %367 = arith.mulf %254, %366 : vector<8x128xf32>
      %368 = vector.broadcast %205 : f32 to vector<8x128xf32>
      %369 = arith.mulf %268, %368 : vector<8x128xf32>
      %370 = arith.addf %367, %369 : vector<8x128xf32>
      %371 = vector.broadcast %163 : f32 to vector<8x128xf32>
      %372 = arith.mulf %256, %371 : vector<8x128xf32>
      %373 = arith.addf %370, %372 : vector<8x128xf32>
      %374 = vector.broadcast %212 : f32 to vector<8x128xf32>
      %375 = arith.mulf %270, %374 : vector<8x128xf32>
      %376 = arith.addf %373, %375 : vector<8x128xf32>
      %377 = vector.broadcast %170 : f32 to vector<8x128xf32>
      %378 = arith.mulf %258, %377 : vector<8x128xf32>
      %379 = arith.addf %376, %378 : vector<8x128xf32>
      %380 = vector.broadcast %219 : f32 to vector<8x128xf32>
      %381 = arith.mulf %272, %380 : vector<8x128xf32>
      %382 = arith.addf %379, %381 : vector<8x128xf32>
      %383 = vector.broadcast %177 : f32 to vector<8x128xf32>
      %384 = arith.mulf %260, %383 : vector<8x128xf32>
      %385 = arith.addf %382, %384 : vector<8x128xf32>
      %386 = vector.broadcast %226 : f32 to vector<8x128xf32>
      %387 = arith.mulf %274, %386 : vector<8x128xf32>
      %388 = arith.addf %385, %387 : vector<8x128xf32>
      %389 = vector.broadcast %184 : f32 to vector<8x128xf32>
      %390 = arith.mulf %262, %389 : vector<8x128xf32>
      %391 = arith.addf %388, %390 : vector<8x128xf32>
      %392 = vector.broadcast %233 : f32 to vector<8x128xf32>
      %393 = arith.mulf %276, %392 : vector<8x128xf32>
      %394 = arith.addf %391, %393 : vector<8x128xf32>
      %395 = vector.broadcast %191 : f32 to vector<8x128xf32>
      %396 = arith.mulf %264, %395 : vector<8x128xf32>
      %397 = arith.addf %394, %396 : vector<8x128xf32>
      %398 = vector.broadcast %240 : f32 to vector<8x128xf32>
      %399 = arith.mulf %278, %398 : vector<8x128xf32>
      %400 = arith.addf %397, %399 : vector<8x128xf32>
      %401 = vector.broadcast %198 : f32 to vector<8x128xf32>
      %402 = arith.mulf %266, %401 : vector<8x128xf32>
      %403 = arith.addf %400, %402 : vector<8x128xf32>
      %404 = vector.broadcast %247 : f32 to vector<8x128xf32>
      %405 = arith.mulf %280, %404 : vector<8x128xf32>
      %406 = arith.addf %403, %405 : vector<8x128xf32>
      %407 = vector.extract_strided_slice %406 {offsets = [0, 2], sizes = [8, 16], strides = [1, 1]} : vector<8x128xf32> to vector<8x16xf32>
      %408 = arith.addf %365, %407 : vector<8x16xf32>
      %409 = vector.broadcast %157 : f32 to vector<8x128xf32>
      %410 = arith.mulf %254, %409 : vector<8x128xf32>
      %411 = vector.broadcast %206 : f32 to vector<8x128xf32>
      %412 = arith.mulf %268, %411 : vector<8x128xf32>
      %413 = arith.addf %410, %412 : vector<8x128xf32>
      %414 = vector.broadcast %164 : f32 to vector<8x128xf32>
      %415 = arith.mulf %256, %414 : vector<8x128xf32>
      %416 = arith.addf %413, %415 : vector<8x128xf32>
      %417 = vector.broadcast %213 : f32 to vector<8x128xf32>
      %418 = arith.mulf %270, %417 : vector<8x128xf32>
      %419 = arith.addf %416, %418 : vector<8x128xf32>
      %420 = vector.broadcast %171 : f32 to vector<8x128xf32>
      %421 = arith.mulf %258, %420 : vector<8x128xf32>
      %422 = arith.addf %419, %421 : vector<8x128xf32>
      %423 = vector.broadcast %220 : f32 to vector<8x128xf32>
      %424 = arith.mulf %272, %423 : vector<8x128xf32>
      %425 = arith.addf %422, %424 : vector<8x128xf32>
      %426 = vector.broadcast %178 : f32 to vector<8x128xf32>
      %427 = arith.mulf %260, %426 : vector<8x128xf32>
      %428 = arith.addf %425, %427 : vector<8x128xf32>
      %429 = vector.broadcast %227 : f32 to vector<8x128xf32>
      %430 = arith.mulf %274, %429 : vector<8x128xf32>
      %431 = arith.addf %428, %430 : vector<8x128xf32>
      %432 = vector.broadcast %185 : f32 to vector<8x128xf32>
      %433 = arith.mulf %262, %432 : vector<8x128xf32>
      %434 = arith.addf %431, %433 : vector<8x128xf32>
      %435 = vector.broadcast %234 : f32 to vector<8x128xf32>
      %436 = arith.mulf %276, %435 : vector<8x128xf32>
      %437 = arith.addf %434, %436 : vector<8x128xf32>
      %438 = vector.broadcast %192 : f32 to vector<8x128xf32>
      %439 = arith.mulf %264, %438 : vector<8x128xf32>
      %440 = arith.addf %437, %439 : vector<8x128xf32>
      %441 = vector.broadcast %241 : f32 to vector<8x128xf32>
      %442 = arith.mulf %278, %441 : vector<8x128xf32>
      %443 = arith.addf %440, %442 : vector<8x128xf32>
      %444 = vector.broadcast %199 : f32 to vector<8x128xf32>
      %445 = arith.mulf %266, %444 : vector<8x128xf32>
      %446 = arith.addf %443, %445 : vector<8x128xf32>
      %447 = vector.broadcast %248 : f32 to vector<8x128xf32>
      %448 = arith.mulf %280, %447 : vector<8x128xf32>
      %449 = arith.addf %446, %448 : vector<8x128xf32>
      %450 = vector.extract_strided_slice %449 {offsets = [0, 3], sizes = [8, 16], strides = [1, 1]} : vector<8x128xf32> to vector<8x16xf32>
      %451 = arith.addf %408, %450 : vector<8x16xf32>
      %452 = vector.broadcast %158 : f32 to vector<8x128xf32>
      %453 = arith.mulf %254, %452 : vector<8x128xf32>
      %454 = vector.broadcast %207 : f32 to vector<8x128xf32>
      %455 = arith.mulf %268, %454 : vector<8x128xf32>
      %456 = arith.addf %453, %455 : vector<8x128xf32>
      %457 = vector.broadcast %165 : f32 to vector<8x128xf32>
      %458 = arith.mulf %256, %457 : vector<8x128xf32>
      %459 = arith.addf %456, %458 : vector<8x128xf32>
      %460 = vector.broadcast %214 : f32 to vector<8x128xf32>
      %461 = arith.mulf %270, %460 : vector<8x128xf32>
      %462 = arith.addf %459, %461 : vector<8x128xf32>
      %463 = vector.broadcast %172 : f32 to vector<8x128xf32>
      %464 = arith.mulf %258, %463 : vector<8x128xf32>
      %465 = arith.addf %462, %464 : vector<8x128xf32>
      %466 = vector.broadcast %221 : f32 to vector<8x128xf32>
      %467 = arith.mulf %272, %466 : vector<8x128xf32>
      %468 = arith.addf %465, %467 : vector<8x128xf32>
      %469 = vector.broadcast %179 : f32 to vector<8x128xf32>
      %470 = arith.mulf %260, %469 : vector<8x128xf32>
      %471 = arith.addf %468, %470 : vector<8x128xf32>
      %472 = vector.broadcast %228 : f32 to vector<8x128xf32>
      %473 = arith.mulf %274, %472 : vector<8x128xf32>
      %474 = arith.addf %471, %473 : vector<8x128xf32>
      %475 = vector.broadcast %186 : f32 to vector<8x128xf32>
      %476 = arith.mulf %262, %475 : vector<8x128xf32>
      %477 = arith.addf %474, %476 : vector<8x128xf32>
      %478 = vector.broadcast %235 : f32 to vector<8x128xf32>
      %479 = arith.mulf %276, %478 : vector<8x128xf32>
      %480 = arith.addf %477, %479 : vector<8x128xf32>
      %481 = vector.broadcast %193 : f32 to vector<8x128xf32>
      %482 = arith.mulf %264, %481 : vector<8x128xf32>
      %483 = arith.addf %480, %482 : vector<8x128xf32>
      %484 = vector.broadcast %242 : f32 to vector<8x128xf32>
      %485 = arith.mulf %278, %484 : vector<8x128xf32>
      %486 = arith.addf %483, %485 : vector<8x128xf32>
      %487 = vector.broadcast %200 : f32 to vector<8x128xf32>
      %488 = arith.mulf %266, %487 : vector<8x128xf32>
      %489 = arith.addf %486, %488 : vector<8x128xf32>
      %490 = vector.broadcast %249 : f32 to vector<8x128xf32>
      %491 = arith.mulf %280, %490 : vector<8x128xf32>
      %492 = arith.addf %489, %491 : vector<8x128xf32>
      %493 = vector.extract_strided_slice %492 {offsets = [0, 4], sizes = [8, 16], strides = [1, 1]} : vector<8x128xf32> to vector<8x16xf32>
      %494 = arith.addf %451, %493 : vector<8x16xf32>
      %495 = vector.broadcast %159 : f32 to vector<8x128xf32>
      %496 = arith.mulf %254, %495 : vector<8x128xf32>
      %497 = vector.broadcast %208 : f32 to vector<8x128xf32>
      %498 = arith.mulf %268, %497 : vector<8x128xf32>
      %499 = arith.addf %496, %498 : vector<8x128xf32>
      %500 = vector.broadcast %166 : f32 to vector<8x128xf32>
      %501 = arith.mulf %256, %500 : vector<8x128xf32>
      %502 = arith.addf %499, %501 : vector<8x128xf32>
      %503 = vector.broadcast %215 : f32 to vector<8x128xf32>
      %504 = arith.mulf %270, %503 : vector<8x128xf32>
      %505 = arith.addf %502, %504 : vector<8x128xf32>
      %506 = vector.broadcast %173 : f32 to vector<8x128xf32>
      %507 = arith.mulf %258, %506 : vector<8x128xf32>
      %508 = arith.addf %505, %507 : vector<8x128xf32>
      %509 = vector.broadcast %222 : f32 to vector<8x128xf32>
      %510 = arith.mulf %272, %509 : vector<8x128xf32>
      %511 = arith.addf %508, %510 : vector<8x128xf32>
      %512 = vector.broadcast %180 : f32 to vector<8x128xf32>
      %513 = arith.mulf %260, %512 : vector<8x128xf32>
      %514 = arith.addf %511, %513 : vector<8x128xf32>
      %515 = vector.broadcast %229 : f32 to vector<8x128xf32>
      %516 = arith.mulf %274, %515 : vector<8x128xf32>
      %517 = arith.addf %514, %516 : vector<8x128xf32>
      %518 = vector.broadcast %187 : f32 to vector<8x128xf32>
      %519 = arith.mulf %262, %518 : vector<8x128xf32>
      %520 = arith.addf %517, %519 : vector<8x128xf32>
      %521 = vector.broadcast %236 : f32 to vector<8x128xf32>
      %522 = arith.mulf %276, %521 : vector<8x128xf32>
      %523 = arith.addf %520, %522 : vector<8x128xf32>
      %524 = vector.broadcast %194 : f32 to vector<8x128xf32>
      %525 = arith.mulf %264, %524 : vector<8x128xf32>
      %526 = arith.addf %523, %525 : vector<8x128xf32>
      %527 = vector.broadcast %243 : f32 to vector<8x128xf32>
      %528 = arith.mulf %278, %527 : vector<8x128xf32>
      %529 = arith.addf %526, %528 : vector<8x128xf32>
      %530 = vector.broadcast %201 : f32 to vector<8x128xf32>
      %531 = arith.mulf %266, %530 : vector<8x128xf32>
      %532 = arith.addf %529, %531 : vector<8x128xf32>
      %533 = vector.broadcast %250 : f32 to vector<8x128xf32>
      %534 = arith.mulf %280, %533 : vector<8x128xf32>
      %535 = arith.addf %532, %534 : vector<8x128xf32>
      %536 = vector.extract_strided_slice %535 {offsets = [0, 5], sizes = [8, 16], strides = [1, 1]} : vector<8x128xf32> to vector<8x16xf32>
      %537 = arith.addf %494, %536 : vector<8x16xf32>
      %538 = vector.broadcast %160 : f32 to vector<8x128xf32>
      %539 = arith.mulf %254, %538 : vector<8x128xf32>
      %540 = vector.broadcast %209 : f32 to vector<8x128xf32>
      %541 = arith.mulf %268, %540 : vector<8x128xf32>
      %542 = arith.addf %539, %541 : vector<8x128xf32>
      %543 = vector.broadcast %167 : f32 to vector<8x128xf32>
      %544 = arith.mulf %256, %543 : vector<8x128xf32>
      %545 = arith.addf %542, %544 : vector<8x128xf32>
      %546 = vector.broadcast %216 : f32 to vector<8x128xf32>
      %547 = arith.mulf %270, %546 : vector<8x128xf32>
      %548 = arith.addf %545, %547 : vector<8x128xf32>
      %549 = vector.broadcast %174 : f32 to vector<8x128xf32>
      %550 = arith.mulf %258, %549 : vector<8x128xf32>
      %551 = arith.addf %548, %550 : vector<8x128xf32>
      %552 = vector.broadcast %223 : f32 to vector<8x128xf32>
      %553 = arith.mulf %272, %552 : vector<8x128xf32>
      %554 = arith.addf %551, %553 : vector<8x128xf32>
      %555 = vector.broadcast %181 : f32 to vector<8x128xf32>
      %556 = arith.mulf %260, %555 : vector<8x128xf32>
      %557 = arith.addf %554, %556 : vector<8x128xf32>
      %558 = vector.broadcast %230 : f32 to vector<8x128xf32>
      %559 = arith.mulf %274, %558 : vector<8x128xf32>
      %560 = arith.addf %557, %559 : vector<8x128xf32>
      %561 = vector.broadcast %188 : f32 to vector<8x128xf32>
      %562 = arith.mulf %262, %561 : vector<8x128xf32>
      %563 = arith.addf %560, %562 : vector<8x128xf32>
      %564 = vector.broadcast %237 : f32 to vector<8x128xf32>
      %565 = arith.mulf %276, %564 : vector<8x128xf32>
      %566 = arith.addf %563, %565 : vector<8x128xf32>
      %567 = vector.broadcast %195 : f32 to vector<8x128xf32>
      %568 = arith.mulf %264, %567 : vector<8x128xf32>
      %569 = arith.addf %566, %568 : vector<8x128xf32>
      %570 = vector.broadcast %244 : f32 to vector<8x128xf32>
      %571 = arith.mulf %278, %570 : vector<8x128xf32>
      %572 = arith.addf %569, %571 : vector<8x128xf32>
      %573 = vector.broadcast %202 : f32 to vector<8x128xf32>
      %574 = arith.mulf %266, %573 : vector<8x128xf32>
      %575 = arith.addf %572, %574 : vector<8x128xf32>
      %576 = vector.broadcast %251 : f32 to vector<8x128xf32>
      %577 = arith.mulf %280, %576 : vector<8x128xf32>
      %578 = arith.addf %575, %577 : vector<8x128xf32>
      %579 = vector.extract_strided_slice %578 {offsets = [0, 6], sizes = [8, 16], strides = [1, 1]} : vector<8x128xf32> to vector<8x16xf32>
      %580 = arith.addf %537, %579 : vector<8x16xf32>
      %581 = vector.broadcast %252 : f32 to vector<8x16xf32>
      %582 = arith.addf %580, %581 : vector<8x16xf32>
      %583 = arith.negf %582 : vector<8x16xf32>
      %584 = math.exp %583 : vector<8x16xf32>
      %cst_222 = arith.constant 1.000000e+00 : f32
      %585 = vector.broadcast %cst_222 : f32 to vector<8x16xf32>
      %586 = arith.addf %585, %584 : vector<8x16xf32>
      %587 = arith.divf %585, %586 : vector<8x16xf32>
      %c0_223 = arith.constant 0 : index
      %c0_224 = arith.constant 0 : index
      %c0_225 = arith.constant 0 : index
      %c0_226 = arith.constant 0 : index
      %588 = vector.load %arg5[%c0_223, %c0_224, %c0_225, %c0_226] : memref<1x1x16x16xf32, #tpu.memory_space<vmem>>, vector<1x1x8x16xf32>
      %589 = vector.shape_cast %588 : vector<1x1x8x16xf32> to vector<8x16xf32>
      %590 = vector.shape_cast %587 : vector<8x16xf32> to vector<1x1x8x16xf32>
      tpu.vector_store %arg5[%c0_223, %c0_224, %c0_225, %c0_226], %590 {strides = array<i32>} : memref<1x1x16x16xf32, #tpu.memory_space<vmem>>, vector<1x1x8x16xf32>,
      %c0_227 = arith.constant 0 : index
      %c8_228 = arith.constant 8 : index
      %c0_229 = arith.constant 0 : index
      %591 = vector.load %arg8[%c0_227, %c8_228, %c0_229] : memref<2x24x128xf32, #tpu.memory_space<vmem>>, vector<1x8x128xf32>
      %592 = vector.shape_cast %591 : vector<1x8x128xf32> to vector<8x128xf32>
      %c0_230 = arith.constant 0 : index
      %c9_231 = arith.constant 9 : index
      %c0_232 = arith.constant 0 : index
      %593 = vector.load %arg8[%c0_230, %c9_231, %c0_232] : memref<2x24x128xf32, #tpu.memory_space<vmem>>, vector<1x8x128xf32>
      %594 = vector.shape_cast %593 : vector<1x8x128xf32> to vector<8x128xf32>
      %c0_233 = arith.constant 0 : index
      %c10_234 = arith.constant 10 : index
      %c0_235 = arith.constant 0 : index
      %595 = vector.load %arg8[%c0_233, %c10_234, %c0_235] : memref<2x24x128xf32, #tpu.memory_space<vmem>>, vector<1x8x128xf32>
      %596 = vector.shape_cast %595 : vector<1x8x128xf32> to vector<8x128xf32>
      %c0_236 = arith.constant 0 : index
      %c11_237 = arith.constant 11 : index
      %c0_238 = arith.constant 0 : index
      %597 = vector.load %arg8[%c0_236, %c11_237, %c0_238] : memref<2x24x128xf32, #tpu.memory_space<vmem>>, vector<1x8x128xf32>
      %598 = vector.shape_cast %597 : vector<1x8x128xf32> to vector<8x128xf32>
      %c0_239 = arith.constant 0 : index
      %c12_240 = arith.constant 12 : index
      %c0_241 = arith.constant 0 : index
      %599 = vector.load %arg8[%c0_239, %c12_240, %c0_241] : memref<2x24x128xf32, #tpu.memory_space<vmem>>, vector<1x8x128xf32>
      %600 = vector.shape_cast %599 : vector<1x8x128xf32> to vector<8x128xf32>
      %c0_242 = arith.constant 0 : index
      %c13_243 = arith.constant 13 : index
      %c0_244 = arith.constant 0 : index
      %601 = vector.load %arg8[%c0_242, %c13_243, %c0_244] : memref<2x24x128xf32, #tpu.memory_space<vmem>>, vector<1x8x128xf32>
      %602 = vector.shape_cast %601 : vector<1x8x128xf32> to vector<8x128xf32>
      %c0_245 = arith.constant 0 : index
      %c14_246 = arith.constant 14 : index
      %c0_247 = arith.constant 0 : index
      %603 = vector.load %arg8[%c0_245, %c14_246, %c0_247] : memref<2x24x128xf32, #tpu.memory_space<vmem>>, vector<1x8x128xf32>
      %604 = vector.shape_cast %603 : vector<1x8x128xf32> to vector<8x128xf32>
      %c1_248 = arith.constant 1 : index
      %c8_249 = arith.constant 8 : index
      %c0_250 = arith.constant 0 : index
      %605 = vector.load %arg8[%c1_248, %c8_249, %c0_250] : memref<2x24x128xf32, #tpu.memory_space<vmem>>, vector<1x8x128xf32>
      %606 = vector.shape_cast %605 : vector<1x8x128xf32> to vector<8x128xf32>
      %c1_251 = arith.constant 1 : index
      %c9_252 = arith.constant 9 : index
      %c0_253 = arith.constant 0 : index
      %607 = vector.load %arg8[%c1_251, %c9_252, %c0_253] : memref<2x24x128xf32, #tpu.memory_space<vmem>>, vector<1x8x128xf32>
      %608 = vector.shape_cast %607 : vector<1x8x128xf32> to vector<8x128xf32>
      %c1_254 = arith.constant 1 : index
      %c10_255 = arith.constant 10 : index
      %c0_256 = arith.constant 0 : index
      %609 = vector.load %arg8[%c1_254, %c10_255, %c0_256] : memref<2x24x128xf32, #tpu.memory_space<vmem>>, vector<1x8x128xf32>
      %610 = vector.shape_cast %609 : vector<1x8x128xf32> to vector<8x128xf32>
      %c1_257 = arith.constant 1 : index
      %c11_258 = arith.constant 11 : index
      %c0_259 = arith.constant 0 : index
      %611 = vector.load %arg8[%c1_257, %c11_258, %c0_259] : memref<2x24x128xf32, #tpu.memory_space<vmem>>, vector<1x8x128xf32>
      %612 = vector.shape_cast %611 : vector<1x8x128xf32> to vector<8x128xf32>
      %c1_260 = arith.constant 1 : index
      %c12_261 = arith.constant 12 : index
      %c0_262 = arith.constant 0 : index
      %613 = vector.load %arg8[%c1_260, %c12_261, %c0_262] : memref<2x24x128xf32, #tpu.memory_space<vmem>>, vector<1x8x128xf32>
      %614 = vector.shape_cast %613 : vector<1x8x128xf32> to vector<8x128xf32>
      %c1_263 = arith.constant 1 : index
      %c13_264 = arith.constant 13 : index
      %c0_265 = arith.constant 0 : index
      %615 = vector.load %arg8[%c1_263, %c13_264, %c0_265] : memref<2x24x128xf32, #tpu.memory_space<vmem>>, vector<1x8x128xf32>
      %616 = vector.shape_cast %615 : vector<1x8x128xf32> to vector<8x128xf32>
      %c1_266 = arith.constant 1 : index
      %c14_267 = arith.constant 14 : index
      %c0_268 = arith.constant 0 : index
      %617 = vector.load %arg8[%c1_266, %c14_267, %c0_268] : memref<2x24x128xf32, #tpu.memory_space<vmem>>, vector<1x8x128xf32>
      %618 = vector.shape_cast %617 : vector<1x8x128xf32> to vector<8x128xf32>
      %619 = vector.broadcast %154 : f32 to vector<8x128xf32>
      %620 = arith.mulf %592, %619 : vector<8x128xf32>
      %621 = vector.broadcast %203 : f32 to vector<8x128xf32>
      %622 = arith.mulf %606, %621 : vector<8x128xf32>
      %623 = arith.addf %620, %622 : vector<8x128xf32>
      %624 = vector.broadcast %161 : f32 to vector<8x128xf32>
      %625 = arith.mulf %594, %624 : vector<8x128xf32>
      %626 = arith.addf %623, %625 : vector<8x128xf32>
      %627 = vector.broadcast %210 : f32 to vector<8x128xf32>
      %628 = arith.mulf %608, %627 : vector<8x128xf32>
      %629 = arith.addf %626, %628 : vector<8x128xf32>
      %630 = vector.broadcast %168 : f32 to vector<8x128xf32>
      %631 = arith.mulf %596, %630 : vector<8x128xf32>
      %632 = arith.addf %629, %631 : vector<8x128xf32>
      %633 = vector.broadcast %217 : f32 to vector<8x128xf32>
      %634 = arith.mulf %610, %633 : vector<8x128xf32>
      %635 = arith.addf %632, %634 : vector<8x128xf32>
      %636 = vector.broadcast %175 : f32 to vector<8x128xf32>
      %637 = arith.mulf %598, %636 : vector<8x128xf32>
      %638 = arith.addf %635, %637 : vector<8x128xf32>
      %639 = vector.broadcast %224 : f32 to vector<8x128xf32>
      %640 = arith.mulf %612, %639 : vector<8x128xf32>
      %641 = arith.addf %638, %640 : vector<8x128xf32>
      %642 = vector.broadcast %182 : f32 to vector<8x128xf32>
      %643 = arith.mulf %600, %642 : vector<8x128xf32>
      %644 = arith.addf %641, %643 : vector<8x128xf32>
      %645 = vector.broadcast %231 : f32 to vector<8x128xf32>
      %646 = arith.mulf %614, %645 : vector<8x128xf32>
      %647 = arith.addf %644, %646 : vector<8x128xf32>
      %648 = vector.broadcast %189 : f32 to vector<8x128xf32>
      %649 = arith.mulf %602, %648 : vector<8x128xf32>
      %650 = arith.addf %647, %649 : vector<8x128xf32>
      %651 = vector.broadcast %238 : f32 to vector<8x128xf32>
      %652 = arith.mulf %616, %651 : vector<8x128xf32>
      %653 = arith.addf %650, %652 : vector<8x128xf32>
      %654 = vector.broadcast %196 : f32 to vector<8x128xf32>
      %655 = arith.mulf %604, %654 : vector<8x128xf32>
      %656 = arith.addf %653, %655 : vector<8x128xf32>
      %657 = vector.broadcast %245 : f32 to vector<8x128xf32>
      %658 = arith.mulf %618, %657 : vector<8x128xf32>
      %659 = arith.addf %656, %658 : vector<8x128xf32>
      %660 = vector.extract_strided_slice %659 {offsets = [0, 0], sizes = [8, 16], strides = [1, 1]} : vector<8x128xf32> to vector<8x16xf32>
      %661 = vector.broadcast %155 : f32 to vector<8x128xf32>
      %662 = arith.mulf %592, %661 : vector<8x128xf32>
      %663 = vector.broadcast %204 : f32 to vector<8x128xf32>
      %664 = arith.mulf %606, %663 : vector<8x128xf32>
      %665 = arith.addf %662, %664 : vector<8x128xf32>
      %666 = vector.broadcast %162 : f32 to vector<8x128xf32>
      %667 = arith.mulf %594, %666 : vector<8x128xf32>
      %668 = arith.addf %665, %667 : vector<8x128xf32>
      %669 = vector.broadcast %211 : f32 to vector<8x128xf32>
      %670 = arith.mulf %608, %669 : vector<8x128xf32>
      %671 = arith.addf %668, %670 : vector<8x128xf32>
      %672 = vector.broadcast %169 : f32 to vector<8x128xf32>
      %673 = arith.mulf %596, %672 : vector<8x128xf32>
      %674 = arith.addf %671, %673 : vector<8x128xf32>
      %675 = vector.broadcast %218 : f32 to vector<8x128xf32>
      %676 = arith.mulf %610, %675 : vector<8x128xf32>
      %677 = arith.addf %674, %676 : vector<8x128xf32>
      %678 = vector.broadcast %176 : f32 to vector<8x128xf32>
      %679 = arith.mulf %598, %678 : vector<8x128xf32>
      %680 = arith.addf %677, %679 : vector<8x128xf32>
      %681 = vector.broadcast %225 : f32 to vector<8x128xf32>
      %682 = arith.mulf %612, %681 : vector<8x128xf32>
      %683 = arith.addf %680, %682 : vector<8x128xf32>
      %684 = vector.broadcast %183 : f32 to vector<8x128xf32>
      %685 = arith.mulf %600, %684 : vector<8x128xf32>
      %686 = arith.addf %683, %685 : vector<8x128xf32>
      %687 = vector.broadcast %232 : f32 to vector<8x128xf32>
      %688 = arith.mulf %614, %687 : vector<8x128xf32>
      %689 = arith.addf %686, %688 : vector<8x128xf32>
      %690 = vector.broadcast %190 : f32 to vector<8x128xf32>
      %691 = arith.mulf %602, %690 : vector<8x128xf32>
      %692 = arith.addf %689, %691 : vector<8x128xf32>
      %693 = vector.broadcast %239 : f32 to vector<8x128xf32>
      %694 = arith.mulf %616, %693 : vector<8x128xf32>
      %695 = arith.addf %692, %694 : vector<8x128xf32>
      %696 = vector.broadcast %197 : f32 to vector<8x128xf32>
      %697 = arith.mulf %604, %696 : vector<8x128xf32>
      %698 = arith.addf %695, %697 : vector<8x128xf32>
      %699 = vector.broadcast %246 : f32 to vector<8x128xf32>
      %700 = arith.mulf %618, %699 : vector<8x128xf32>
      %701 = arith.addf %698, %700 : vector<8x128xf32>
      %702 = vector.extract_strided_slice %701 {offsets = [0, 1], sizes = [8, 16], strides = [1, 1]} : vector<8x128xf32> to vector<8x16xf32>
      %703 = arith.addf %660, %702 : vector<8x16xf32>
      %704 = vector.broadcast %156 : f32 to vector<8x128xf32>
      %705 = arith.mulf %592, %704 : vector<8x128xf32>
      %706 = vector.broadcast %205 : f32 to vector<8x128xf32>
      %707 = arith.mulf %606, %706 : vector<8x128xf32>
      %708 = arith.addf %705, %707 : vector<8x128xf32>
      %709 = vector.broadcast %163 : f32 to vector<8x128xf32>
      %710 = arith.mulf %594, %709 : vector<8x128xf32>
      %711 = arith.addf %708, %710 : vector<8x128xf32>
      %712 = vector.broadcast %212 : f32 to vector<8x128xf32>
      %713 = arith.mulf %608, %712 : vector<8x128xf32>
      %714 = arith.addf %711, %713 : vector<8x128xf32>
      %715 = vector.broadcast %170 : f32 to vector<8x128xf32>
      %716 = arith.mulf %596, %715 : vector<8x128xf32>
      %717 = arith.addf %714, %716 : vector<8x128xf32>
      %718 = vector.broadcast %219 : f32 to vector<8x128xf32>
      %719 = arith.mulf %610, %718 : vector<8x128xf32>
      %720 = arith.addf %717, %719 : vector<8x128xf32>
      %721 = vector.broadcast %177 : f32 to vector<8x128xf32>
      %722 = arith.mulf %598, %721 : vector<8x128xf32>
      %723 = arith.addf %720, %722 : vector<8x128xf32>
      %724 = vector.broadcast %226 : f32 to vector<8x128xf32>
      %725 = arith.mulf %612, %724 : vector<8x128xf32>
      %726 = arith.addf %723, %725 : vector<8x128xf32>
      %727 = vector.broadcast %184 : f32 to vector<8x128xf32>
      %728 = arith.mulf %600, %727 : vector<8x128xf32>
      %729 = arith.addf %726, %728 : vector<8x128xf32>
      %730 = vector.broadcast %233 : f32 to vector<8x128xf32>
      %731 = arith.mulf %614, %730 : vector<8x128xf32>
      %732 = arith.addf %729, %731 : vector<8x128xf32>
      %733 = vector.broadcast %191 : f32 to vector<8x128xf32>
      %734 = arith.mulf %602, %733 : vector<8x128xf32>
      %735 = arith.addf %732, %734 : vector<8x128xf32>
      %736 = vector.broadcast %240 : f32 to vector<8x128xf32>
      %737 = arith.mulf %616, %736 : vector<8x128xf32>
      %738 = arith.addf %735, %737 : vector<8x128xf32>
      %739 = vector.broadcast %198 : f32 to vector<8x128xf32>
      %740 = arith.mulf %604, %739 : vector<8x128xf32>
      %741 = arith.addf %738, %740 : vector<8x128xf32>
      %742 = vector.broadcast %247 : f32 to vector<8x128xf32>
      %743 = arith.mulf %618, %742 : vector<8x128xf32>
      %744 = arith.addf %741, %743 : vector<8x128xf32>
      %745 = vector.extract_strided_slice %744 {offsets = [0, 2], sizes = [8, 16], strides = [1, 1]} : vector<8x128xf32> to vector<8x16xf32>
      %746 = arith.addf %703, %745 : vector<8x16xf32>
      %747 = vector.broadcast %157 : f32 to vector<8x128xf32>
      %748 = arith.mulf %592, %747 : vector<8x128xf32>
      %749 = vector.broadcast %206 : f32 to vector<8x128xf32>
      %750 = arith.mulf %606, %749 : vector<8x128xf32>
      %751 = arith.addf %748, %750 : vector<8x128xf32>
      %752 = vector.broadcast %164 : f32 to vector<8x128xf32>
      %753 = arith.mulf %594, %752 : vector<8x128xf32>
      %754 = arith.addf %751, %753 : vector<8x128xf32>
      %755 = vector.broadcast %213 : f32 to vector<8x128xf32>
      %756 = arith.mulf %608, %755 : vector<8x128xf32>
      %757 = arith.addf %754, %756 : vector<8x128xf32>
      %758 = vector.broadcast %171 : f32 to vector<8x128xf32>
      %759 = arith.mulf %596, %758 : vector<8x128xf32>
      %760 = arith.addf %757, %759 : vector<8x128xf32>
      %761 = vector.broadcast %220 : f32 to vector<8x128xf32>
      %762 = arith.mulf %610, %761 : vector<8x128xf32>
      %763 = arith.addf %760, %762 : vector<8x128xf32>
      %764 = vector.broadcast %178 : f32 to vector<8x128xf32>
      %765 = arith.mulf %598, %764 : vector<8x128xf32>
      %766 = arith.addf %763, %765 : vector<8x128xf32>
      %767 = vector.broadcast %227 : f32 to vector<8x128xf32>
      %768 = arith.mulf %612, %767 : vector<8x128xf32>
      %769 = arith.addf %766, %768 : vector<8x128xf32>
      %770 = vector.broadcast %185 : f32 to vector<8x128xf32>
      %771 = arith.mulf %600, %770 : vector<8x128xf32>
      %772 = arith.addf %769, %771 : vector<8x128xf32>
      %773 = vector.broadcast %234 : f32 to vector<8x128xf32>
      %774 = arith.mulf %614, %773 : vector<8x128xf32>
      %775 = arith.addf %772, %774 : vector<8x128xf32>
      %776 = vector.broadcast %192 : f32 to vector<8x128xf32>
      %777 = arith.mulf %602, %776 : vector<8x128xf32>
      %778 = arith.addf %775, %777 : vector<8x128xf32>
      %779 = vector.broadcast %241 : f32 to vector<8x128xf32>
      %780 = arith.mulf %616, %779 : vector<8x128xf32>
      %781 = arith.addf %778, %780 : vector<8x128xf32>
      %782 = vector.broadcast %199 : f32 to vector<8x128xf32>
      %783 = arith.mulf %604, %782 : vector<8x128xf32>
      %784 = arith.addf %781, %783 : vector<8x128xf32>
      %785 = vector.broadcast %248 : f32 to vector<8x128xf32>
      %786 = arith.mulf %618, %785 : vector<8x128xf32>
      %787 = arith.addf %784, %786 : vector<8x128xf32>
      %788 = vector.extract_strided_slice %787 {offsets = [0, 3], sizes = [8, 16], strides = [1, 1]} : vector<8x128xf32> to vector<8x16xf32>
      %789 = arith.addf %746, %788 : vector<8x16xf32>
      %790 = vector.broadcast %158 : f32 to vector<8x128xf32>
      %791 = arith.mulf %592, %790 : vector<8x128xf32>
      %792 = vector.broadcast %207 : f32 to vector<8x128xf32>
      %793 = arith.mulf %606, %792 : vector<8x128xf32>
      %794 = arith.addf %791, %793 : vector<8x128xf32>
      %795 = vector.broadcast %165 : f32 to vector<8x128xf32>
      %796 = arith.mulf %594, %795 : vector<8x128xf32>
      %797 = arith.addf %794, %796 : vector<8x128xf32>
      %798 = vector.broadcast %214 : f32 to vector<8x128xf32>
      %799 = arith.mulf %608, %798 : vector<8x128xf32>
      %800 = arith.addf %797, %799 : vector<8x128xf32>
      %801 = vector.broadcast %172 : f32 to vector<8x128xf32>
      %802 = arith.mulf %596, %801 : vector<8x128xf32>
      %803 = arith.addf %800, %802 : vector<8x128xf32>
      %804 = vector.broadcast %221 : f32 to vector<8x128xf32>
      %805 = arith.mulf %610, %804 : vector<8x128xf32>
      %806 = arith.addf %803, %805 : vector<8x128xf32>
      %807 = vector.broadcast %179 : f32 to vector<8x128xf32>
      %808 = arith.mulf %598, %807 : vector<8x128xf32>
      %809 = arith.addf %806, %808 : vector<8x128xf32>
      %810 = vector.broadcast %228 : f32 to vector<8x128xf32>
      %811 = arith.mulf %612, %810 : vector<8x128xf32>
      %812 = arith.addf %809, %811 : vector<8x128xf32>
      %813 = vector.broadcast %186 : f32 to vector<8x128xf32>
      %814 = arith.mulf %600, %813 : vector<8x128xf32>
      %815 = arith.addf %812, %814 : vector<8x128xf32>
      %816 = vector.broadcast %235 : f32 to vector<8x128xf32>
      %817 = arith.mulf %614, %816 : vector<8x128xf32>
      %818 = arith.addf %815, %817 : vector<8x128xf32>
      %819 = vector.broadcast %193 : f32 to vector<8x128xf32>
      %820 = arith.mulf %602, %819 : vector<8x128xf32>
      %821 = arith.addf %818, %820 : vector<8x128xf32>
      %822 = vector.broadcast %242 : f32 to vector<8x128xf32>
      %823 = arith.mulf %616, %822 : vector<8x128xf32>
      %824 = arith.addf %821, %823 : vector<8x128xf32>
      %825 = vector.broadcast %200 : f32 to vector<8x128xf32>
      %826 = arith.mulf %604, %825 : vector<8x128xf32>
      %827 = arith.addf %824, %826 : vector<8x128xf32>
      %828 = vector.broadcast %249 : f32 to vector<8x128xf32>
      %829 = arith.mulf %618, %828 : vector<8x128xf32>
      %830 = arith.addf %827, %829 : vector<8x128xf32>
      %831 = vector.extract_strided_slice %830 {offsets = [0, 4], sizes = [8, 16], strides = [1, 1]} : vector<8x128xf32> to vector<8x16xf32>
      %832 = arith.addf %789, %831 : vector<8x16xf32>
      %833 = vector.broadcast %159 : f32 to vector<8x128xf32>
      %834 = arith.mulf %592, %833 : vector<8x128xf32>
      %835 = vector.broadcast %208 : f32 to vector<8x128xf32>
      %836 = arith.mulf %606, %835 : vector<8x128xf32>
      %837 = arith.addf %834, %836 : vector<8x128xf32>
      %838 = vector.broadcast %166 : f32 to vector<8x128xf32>
      %839 = arith.mulf %594, %838 : vector<8x128xf32>
      %840 = arith.addf %837, %839 : vector<8x128xf32>
      %841 = vector.broadcast %215 : f32 to vector<8x128xf32>
      %842 = arith.mulf %608, %841 : vector<8x128xf32>
      %843 = arith.addf %840, %842 : vector<8x128xf32>
      %844 = vector.broadcast %173 : f32 to vector<8x128xf32>
      %845 = arith.mulf %596, %844 : vector<8x128xf32>
      %846 = arith.addf %843, %845 : vector<8x128xf32>
      %847 = vector.broadcast %222 : f32 to vector<8x128xf32>
      %848 = arith.mulf %610, %847 : vector<8x128xf32>
      %849 = arith.addf %846, %848 : vector<8x128xf32>
      %850 = vector.broadcast %180 : f32 to vector<8x128xf32>
      %851 = arith.mulf %598, %850 : vector<8x128xf32>
      %852 = arith.addf %849, %851 : vector<8x128xf32>
      %853 = vector.broadcast %229 : f32 to vector<8x128xf32>
      %854 = arith.mulf %612, %853 : vector<8x128xf32>
      %855 = arith.addf %852, %854 : vector<8x128xf32>
      %856 = vector.broadcast %187 : f32 to vector<8x128xf32>
      %857 = arith.mulf %600, %856 : vector<8x128xf32>
      %858 = arith.addf %855, %857 : vector<8x128xf32>
      %859 = vector.broadcast %236 : f32 to vector<8x128xf32>
      %860 = arith.mulf %614, %859 : vector<8x128xf32>
      %861 = arith.addf %858, %860 : vector<8x128xf32>
      %862 = vector.broadcast %194 : f32 to vector<8x128xf32>
      %863 = arith.mulf %602, %862 : vector<8x128xf32>
      %864 = arith.addf %861, %863 : vector<8x128xf32>
      %865 = vector.broadcast %243 : f32 to vector<8x128xf32>
      %866 = arith.mulf %616, %865 : vector<8x128xf32>
      %867 = arith.addf %864, %866 : vector<8x128xf32>
      %868 = vector.broadcast %201 : f32 to vector<8x128xf32>
      %869 = arith.mulf %604, %868 : vector<8x128xf32>
      %870 = arith.addf %867, %869 : vector<8x128xf32>
      %871 = vector.broadcast %250 : f32 to vector<8x128xf32>
      %872 = arith.mulf %618, %871 : vector<8x128xf32>
      %873 = arith.addf %870, %872 : vector<8x128xf32>
      %874 = vector.extract_strided_slice %873 {offsets = [0, 5], sizes = [8, 16], strides = [1, 1]} : vector<8x128xf32> to vector<8x16xf32>
      %875 = arith.addf %832, %874 : vector<8x16xf32>
      %876 = vector.broadcast %160 : f32 to vector<8x128xf32>
      %877 = arith.mulf %592, %876 : vector<8x128xf32>
      %878 = vector.broadcast %209 : f32 to vector<8x128xf32>
      %879 = arith.mulf %606, %878 : vector<8x128xf32>
      %880 = arith.addf %877, %879 : vector<8x128xf32>
      %881 = vector.broadcast %167 : f32 to vector<8x128xf32>
      %882 = arith.mulf %594, %881 : vector<8x128xf32>
      %883 = arith.addf %880, %882 : vector<8x128xf32>
      %884 = vector.broadcast %216 : f32 to vector<8x128xf32>
      %885 = arith.mulf %608, %884 : vector<8x128xf32>
      %886 = arith.addf %883, %885 : vector<8x128xf32>
      %887 = vector.broadcast %174 : f32 to vector<8x128xf32>
      %888 = arith.mulf %596, %887 : vector<8x128xf32>
      %889 = arith.addf %886, %888 : vector<8x128xf32>
      %890 = vector.broadcast %223 : f32 to vector<8x128xf32>
      %891 = arith.mulf %610, %890 : vector<8x128xf32>
      %892 = arith.addf %889, %891 : vector<8x128xf32>
      %893 = vector.broadcast %181 : f32 to vector<8x128xf32>
      %894 = arith.mulf %598, %893 : vector<8x128xf32>
      %895 = arith.addf %892, %894 : vector<8x128xf32>
      %896 = vector.broadcast %230 : f32 to vector<8x128xf32>
      %897 = arith.mulf %612, %896 : vector<8x128xf32>
      %898 = arith.addf %895, %897 : vector<8x128xf32>
      %899 = vector.broadcast %188 : f32 to vector<8x128xf32>
      %900 = arith.mulf %600, %899 : vector<8x128xf32>
      %901 = arith.addf %898, %900 : vector<8x128xf32>
      %902 = vector.broadcast %237 : f32 to vector<8x128xf32>
      %903 = arith.mulf %614, %902 : vector<8x128xf32>
      %904 = arith.addf %901, %903 : vector<8x128xf32>
      %905 = vector.broadcast %195 : f32 to vector<8x128xf32>
      %906 = arith.mulf %602, %905 : vector<8x128xf32>
      %907 = arith.addf %904, %906 : vector<8x128xf32>
      %908 = vector.broadcast %244 : f32 to vector<8x128xf32>
      %909 = arith.mulf %616, %908 : vector<8x128xf32>
      %910 = arith.addf %907, %909 : vector<8x128xf32>
      %911 = vector.broadcast %202 : f32 to vector<8x128xf32>
      %912 = arith.mulf %604, %911 : vector<8x128xf32>
      %913 = arith.addf %910, %912 : vector<8x128xf32>
      %914 = vector.broadcast %251 : f32 to vector<8x128xf32>
      %915 = arith.mulf %618, %914 : vector<8x128xf32>
      %916 = arith.addf %913, %915 : vector<8x128xf32>
      %917 = vector.extract_strided_slice %916 {offsets = [0, 6], sizes = [8, 16], strides = [1, 1]} : vector<8x128xf32> to vector<8x16xf32>
      %918 = arith.addf %875, %917 : vector<8x16xf32>
      %919 = vector.broadcast %252 : f32 to vector<8x16xf32>
      %920 = arith.addf %918, %919 : vector<8x16xf32>
      %921 = arith.negf %920 : vector<8x16xf32>
      %922 = math.exp %921 : vector<8x16xf32>
      %cst_269 = arith.constant 1.000000e+00 : f32
      %923 = vector.broadcast %cst_269 : f32 to vector<8x16xf32>
      %924 = arith.addf %923, %922 : vector<8x16xf32>
      %925 = arith.divf %923, %924 : vector<8x16xf32>
      %c0_270 = arith.constant 0 : index
      %c0_271 = arith.constant 0 : index
      %c8_272 = arith.constant 8 : index
      %c0_273 = arith.constant 0 : index
      %926 = vector.load %arg5[%c0_270, %c0_271, %c8_272, %c0_273] : memref<1x1x16x16xf32, #tpu.memory_space<vmem>>, vector<1x1x8x16xf32>
      %927 = vector.shape_cast %926 : vector<1x1x8x16xf32> to vector<8x16xf32>
      %928 = vector.shape_cast %925 : vector<8x16xf32> to vector<1x1x8x16xf32>
      tpu.vector_store %arg5[%c0_270, %c0_271, %c8_272, %c0_273], %928 {strides = array<i32>} : memref<1x1x16x16xf32, #tpu.memory_space<vmem>>, vector<1x1x8x16xf32>,
    } else {
    }
    return
  }
  func.func @transform_0(%arg0: i32, %arg1: i32) -> i32 {
    %c0_i32 = arith.constant 0 : i32
    %c0_i32_0 = arith.constant 0 : i32
    return %c0_i32 : i32
  }
  func.func @transform_1(%arg0: i32, %arg1: i32) -> i32 {
    %c0_i32 = arith.constant 0 : i32
    %c0_i32_0 = arith.constant 0 : i32
    return %c0_i32 : i32
  }
  func.func @transform_2(%arg0: i32, %arg1: i32) -> (i32, i32, i32) {
    %c0_i32 = arith.constant 0 : i32
    %c0_i32_0 = arith.constant 0 : i32
    return %arg0, %arg1, %c0_i32 : i32, i32, i32
  }
  func.func @transform_3(%arg0: i32, %arg1: i32) -> (i32, i32, i32, i32) {
    %c0_i32 = arith.constant 0 : i32
    %c0_i32_0 = arith.constant 0 : i32
    %c0_i32_1 = arith.constant 0 : i32
    %c0_i32_2 = arith.constant 0 : i32
    return %arg0, %c0_i32, %c0_i32_0, %c0_i32_1 : i32, i32, i32, i32
  }
}

</mosaic_0001>

<bundles_post_ra>
// kernel: tpu_custom_call.1
= control target key start
LH: loop header
LB: loop body
LE: loop exit
PB: predicated region body
PF: predicated region fallthrough
CT: control target
= control target key end

     0   :  { %s3004_s0 = inlined_call_operand.vmem [shape: f32[98], index: 0, kind: input, shape index: {}]   ;;  %s3005_s1 = inlined_call_operand.<no memory space> [shape: f32[1], index: 1, kind: input, shape index: {}]   ;;  %s3006_s2 = inlined_call_operand.hbm [shape: f32[2,4,256], index: 2, kind: input, shape index: {}]   ;;  %s3007_s3 = inlined_call_operand.hbm [shape: f32[2,1,16,16], index: 3, kind: output, shape index: {}]  }
   0x1   :  { %3211 = sst [smem:[#allocation143_spill]] %s3004_s0 }
   0x2   :  { %3212 = sst [smem:[#allocation144_spill]] %s3006_s2 }
   0x3   :  { %3213 = sst [smem:[#allocation145_spill]] %s3007_s3 }
   0x4   :  { %8 = sst [smem:[#allocation5]] %s3005_s1 }
   0x5   :  { %9 = vsyncpa [#allocation9], 0 }
   0x6   :  { %10 = vsyncpa [#allocation7], 0 }
   0x7   :  { %12 = vsyncpa [#allocation7 + $0x1], 0 }
   0x8   :  { %13 = vsyncpa [#allocation8], 0 }
   0x9   :  { %15 = vsyncpa [#allocation8 + $0x1], 0  ;;  %s1707_s14 = smov 0   ;;  %s1709_s15 = smov 0  }
   0xa   :  { %s1711_s16 = smov 0   ;;  %s1713_s17 = smov 0  }
   0xb   :  { %s1715_s18 = smov 0   ;;  %s1717_s19 = smov 0  }
   0xc LB: > { %3214 = sst [smem:[#allocation15_spill]] %s1640_s14  ;;  %s1310_s1 = sadd.s32 4294967295, %s1660_s19   ;;  %s1660_s19 = sphi %s1717_s19, %s21_s19   ;;  %s1656_s18 = sphi %s1715_s18, %s3685_s18   ;;  %s1652_s17 = sphi %s1713_s17, %s3684_s17   ;;  %s1648_s16 = sphi %s1711_s16, %s3683_s16   ;;  %s1644_s15 = sphi %s1709_s15, %s3682_s15   ;;  %s1640_s14 = sphi %s1707_s14, %s3681_s14  }
   0xd   : > { %3215 = sst [smem:[#allocation16_spill]] %s1644_s15  ;;  %s1311_s20 = sadd.s32 4294967294, %s1660_s19  }
   0xe   : > { %3216 = sst [smem:[#allocation17_spill]] %s1648_s16  ;;  %p97_p0 = scmp.ne.s32.totalorder %s1644_s15, %s1640_s14 }
   0xf   : > { %3217 = sst [smem:[#allocation18_spill]] %s1652_s17  ;;  %p1741_p1 = scmp.eq.s32.totalorder %s1310_s1, 0 }
  0x10   : > { %3218 = sst [smem:[#allocation19_spill]] %s1656_s18  ;;  %p1745_p2 = scmp.eq.s32.totalorder %s1310_s1, 1 }
  0x11   : > { %3219 = sst [smem:[#allocation20_spill]] %s1660_s19  ;;  %p127_p3 = scmp.eq.s32.totalorder %s1311_s20, 1 }
  0x12   : > { %s3220_s21 = scalar_select %p1741_p1, 1, 0 }
  0x13   : > { %p1751_p4 = por %p1741_p1, %p97_p0  ;;  %p1312_p5 = scmp.ge.s32.totalorder %s1660_s19, 1 }
  0x14   : > { %p1756_p6 = por %p127_p3, %p97_p0  ;;  %p134_p7 = scmp.lt.s32.totalorder %s1660_s19, 3 }
  0x15   : > { %s3222_s23 = scalar_select %p1751_p4, 1, 0 }
  0x16   : > { %s3223_s24 = scalar_select %p1756_p6, 1, 0 }
  0x17   : > { %s3225_s0 = sld [smem:[#allocation143_spill]]  ;;  %p1764_p8 = pnand %p1312_p5, %p134_p7 }
  0x18   : > { %3224 = sst [smem:[#allocation21_spill]] %s3223_s24  ;;  %s33_s30 = sadd.s32 1, %s1656_s18 }
  0x19   : > { %p1436_p10 = pneg %p1764_p8  ;;  %s84_s4 = sadd.s32 1, %s1648_s16 }
  0x1a   : > { %p35_p12 = scmp.ge.s32.totalorder %s33_s30, 2 }
  0x1b   : > { %p1773_p11 = pnand %p1436_p10, %p1741_p1 }
  0x1d   : > { %s147_s27 = sshll.u32 %s3225_s0, 4  ;;  %p1531_p0 = pneg %p1773_p11  ;;  %s148_s27 = int_to_ptr.vmem [resolvable:$true] %s147_s27 }
  0x1e   : > { %s1529_s5 = scalar_lea.vmem %s148_s27, 16  ;;  %p1537_p7 = scmp.lt.s32.totalorder %s148_s27, %s148_s27 }
  0x1f   : > { %p1530_p13 = scmp.ne.s32.totalorder %s148_s27, %s1529_s5  ;;  %p1538_p6 = scmp.lt.s32.totalorder %s1529_s5, %s1529_s5 }
  0x21   : > { %p1532_p3 = pnand %p1531_p0, %p1530_p13  ;;  %p1539_p9 = por %p1538_p6, %p1537_p7 }
  0x23   : > { %p1533_p5 = pneg %p1532_p3 }
  0x25   : > { %p1540_p4 = pnand %p1539_p9, %p1533_p5 }
  0x27   : > { %1543 = shalt.err (!%p1540_p4)
}
  0x28   : > { %s1662_s6 = smov [#allocation6]   ;;  %s3687_s30 = smov (%p35_p12, %s33_s30), 0 }
  0x29   : > { %1439 = dma.vmem_to_smem (!%p1773_p11), %s148_s27, 16, %s1662_s6, [#allocation9]  }
  0x2a   : > { %3228 = sst [smem:[#allocation22_spill]] %s3687_s30  ;;  %p91_p10 = scmp.ne.s32.totalorder %s1648_s16, %s1644_s15 }
  0x2b   : > { %p92_p6 = scmp.eq.s32.totalorder %s1660_s19, 0  ;;  %s79_s7 = ssub.s32 %s1656_s18, %s3687_s30 }
  0x2c   : > { %p1449_p4 = scmp.lt.s32.totalorder %s1660_s19, 2  ;;  %p82_p9 = scmp.eq.s32.totalorder %s79_s7, 0 }
  0x2d   : > { %p93_p13 = por %p92_p6, %p91_p10  ;;  %p1793_p0 = por %p1745_p2, %p91_p10 }
  0x2e   : > { %s161_s9 = sand.u32 1, %s1648_s16   ;;  %s1426_s12 = sshll.u32 %s1656_s18, 7 }
  0x2f   : > { %s3229_s8 = scalar_select %p1793_p0, 1, 0 }
  0x30   : > { %s1799_s10 = scalar_select %p82_p9, %s1648_s16, %s84_s4  }
  0x31   : > { %3230 = sst [smem:[#allocation23_spill]] %s3229_s8  ;;  %s1315_s11 = sshll.u32 %s161_s9, 3 }
  0x32   : > { %3231 = sst [smem:[#allocation24_spill]] %s1799_s10  ;;  %s3232_s2 = sld [smem:[#allocation144_spill]] }
  0x33   : > { %s165_s25 = scalar_lea.vmem [#allocation10], %s1315_s11  ;;  %p1809_p2 = pnand %p1449_p4, %p93_p13 }
  0x34   : > { %s175_s22 = sshll.u32 %s165_s25, 4  ;;  %s162_s27 = scalar_lea.sflag [#allocation7], %s161_s9  ;;  %s1807_s22 = int_to_ptr.vmem [resolvable:$true] %s175_s22 }
  0x35   : > { %p1546_p12 = pneg %p1809_p2 }
  0x38   : > { %s1805_s20 = scalar_lea.hbm %s3232_s2, %s1426_s12  ;;  %s1549_s6 = scalar_lea.hbm %s3232_s2, 256 }
  0x39   : > { %s1544_s29 = scalar_lea.hbm %s1805_s20, 128  ;;  %p1550_p7 = scmp.lt.u32.totalorder %s1805_s20, %s3232_s2 }
  0x3a   : > { %p1545_p11 = scmp.ne.s32.totalorder %s1805_s20, %s1544_s29  ;;  %p1551_p10 = scmp.lt.u32.totalorder %s1549_s6, %s1544_s29 }
  0x3b   : > { %p1553_p4 = scmp.lt.u32.totalorder %s1544_s29, %s1805_s20 }
  0x3c   : > { %p1547_p3 = pnand %p1546_p12, %p1545_p11  ;;  %p1552_p6 = por %p1551_p10, %p1550_p7 }
  0x3e   : > { %p1548_p5 = pneg %p1547_p3  ;;  %p1554_p9 = por %p1553_p4, %p1552_p6 }
  0x40   : > { %p1555_p13 = pnand %p1554_p9, %p1548_p5 }
  0x42   : > { %1558 = shalt.err (!%p1555_p13)
}
  0x43   : > { %s1559_s9 = scalar_lea.vmem %s1807_s22, 128  ;;  %s1663_s12 = smov [#allocation10]  }
  0x44   : > { %p1560_p11 = scmp.ne.s32.totalorder %s1807_s22, %s1559_s9  ;;  %s1564_s13 = sshll.u32 %s1663_s12, 4  ;;  %s1565_s13 = int_to_ptr.vmem [resolvable:$false] %s1564_s13 }
  0x45   : > { %s1566_s1 = scalar_lea.vmem %s1565_s13, 256  ;;  %p1567_p1 = scmp.lt.s32.totalorder %s1807_s22, %s1565_s13 }
  0x46   : > { %p1562_p3 = pnand %p1560_p11, %p1546_p12  ;;  %p1568_p7 = scmp.lt.s32.totalorder %s1566_s1, %s1559_s9 }
  0x48   : > { %p1563_p0 = pneg %p1562_p3  ;;  %p1569_p10 = por %p1568_p7, %p1567_p1 }
  0x4a   : > { %p1570_p6 = pnand %p1569_p10, %p1563_p0 }
  0x4c   : > { %1573 = shalt.err (!%p1570_p6)
}
  0x4d   : > { %1443 = dma.hbm_to_vmem [thread:$0]  (!%p1809_p2), %s1805_s20, 128, %s1807_s22, %s162_s27  }
  0x4e   : > { %184 = sbr.rel (%p1764_p8) target bundleno = 578 (0x242), region = 32 }
  0x55   : > { %p3234_p12 = scmp.ne.s32.totalorder %s3220_s21, 0 }
  0x57   : > { %1627 = dma.done.wait (%p3234_p12), [#allocation9], 16  }
  0x58   : > { %1629 = vsyncadd (%p3234_p12), [#allocation9], 4294967280  ;;  %s1845_s25 = sand.u32 1, %s1644_s15   ;;  %p3236_p1 = scmp.ne.s32.totalorder %s3222_s23, 0 }
  0x59   : > { %3235 = sst [smem:[#allocation25_spill]] %s1845_s25  ;;  %s1320_s29 = sshll.u32 %s1845_s25, 3 }
  0x5a   : > { %s191_s26 = scalar_lea.sflag [#allocation7], %s1845_s25  ;;  %s194_s4 = scalar_lea.vmem [#allocation10], %s1320_s29 }
  0x5b   : > { %1631 = dma.done.wait (%p3236_p1), %s191_s26, 128  }
  0x5c   : > { %1633 = vsyncadd (%p3236_p1), %s191_s26, 4294967168 }
  0x5d   : > { %199 = sfence }
  0x5e   : > { %v1664_v0 = vmov -inf   ;;  %v226_v1 = vld [vmem:[%s194_s4] sm:$0xff]  ;;  %v1665_v2 = vmov 0.0   ;;  %v1666_v20 = vmov 1966171168   ;;  %v267_v22 = vlaneseq  ;;  %s1667_s21 = smov 115  }
  0x5f   : > { %224 = vst [vmem:[#allocation3] sm:$0xff] %v1664_v0  ;;  %225 = vst [vmem:[#allocation3 + $0x8] sm:$0xff] %v1664_v0  ;;  %v230_v3 = vcombine.high %v226_v1, %v226_v1  ;;  %v265_v21 = vunpack.c.l.s4 %v1666_v20  ;;  %s1668_s23 = smov 3   ;;  %s1669_s28 = smov 99   ;;  %vm330_vm1 = vcmask 147480   ;;  %vm957_vm2 = vcmask 130048  }
  0x60   : > { %222 = vst [vmem:[#allocation2] sm:$0xff] %v1665_v2  ;;  %223 = vst [vmem:[#allocation2 + $0x8] sm:$0xff] %v1665_v2  ;;  %v268_v32 = vshrl.u32 %v267_v22, 7  ;;  %vm281_vm0 = vcmp.lt.s32.totalorder %v267_v22, 256  ;;  %s1670_s20 = smov 83   ;;  %s1671_s22 = smov 67  }
  0x61   : > { %319 = vst [vmem:[#allocation4] sm:$0xff] %v1665_v2  ;;  %320 = vst [vmem:[#allocation4 + $0x8] sm:$0xff] %v1665_v2  ;;  %v266_v31 = vunpack.c.0.s8 %v265_v21  ;;  %s1672_s27 = smov 51   ;;  %s1673_s5 = smov 35  }
  0x62   : > { %321 = vst [vmem:[#allocation4 + $0x10] sm:$0xff] %v1665_v2  ;;  %322 = vst [vmem:[#allocation4 + $0x18] sm:$0xff] %v1665_v2  ;;  %s1674_s6 = smov 19   ;;  %s1857_s7 = sld [smem:[#allocation6 + $0x32]] }
  0x63   : > { %323 = vst [vmem:[#allocation4 + $0x20] sm:$0xff] %v1665_v2  ;;  %324 = vst [vmem:[#allocation4 + $0x28] sm:$0xff] %v1665_v2  ;;  %v269_v41 = vsub.s32 %v266_v31, %v268_v32  ;;  %s1859_s11 = sld [smem:[#allocation6 + $0x33]]  ;;  %s1861_s9 = sld [smem:[#allocation6 + $0x39]] }
  0x64   : > { %s1863_s12 = sld [smem:[#allocation6 + $0x34]]  ;;  %s1865_s13 = sld [smem:[#allocation6 + $0x3a]] }
  0x65   : > { %s1867_s1 = sld [smem:[#allocation6 + $0x3b]]  ;;  %s1869_s29 = sld [smem:[#allocation6 + $0x40]] }
  0x66   : > { %v236_v4 = vld [vmem:[#allocation3] sm:$0xf]  ;;  %v237_v5 = vld [vmem:[#allocation3 + $0x8] sm:$0xf]  ;;  %s1871_s26 = sld [smem:[#allocation6 + $0x41]]  ;;  %s1873_s4 = sld [smem:[#allocation6 + $0x42]] }
  0x67   : > { %v238_v6 = vmax.f32 %v236_v4, %v226_v1  ;;  %v239_v7 = vmax.f32 %v237_v5, %v230_v3  ;;  %v227_v8 = vld [vmem:[#allocation2] sm:$0xf]  ;;  %v228_v9 = vld [vmem:[#allocation2 + $0x8] sm:$0xf]  ;;  %s1891_s0 = sld [smem:[#allocation6 + $0x43]]  ;;  %s1893_s2 = sld [smem:[#allocation6 + $0x55]] }
  0x68   : > { %v232_v10 = vadd.f32 %v227_v8, %v226_v1  ;;  %v233_v11 = vadd.f32 %v230_v3, %v228_v9  ;;  %3237 = sst [smem:[#allocation26_spill]] %s1857_s7  ;;  %s1895_s30 = sld [smem:[#allocation6 + $0x56]]  ;;  %v3196_v4 = vstv %s1857_s7 }
  0x69   : > { %240 = vst [vmem:[#allocation3] sm:$0xf] %v238_v6  ;;  %241 = vst [vmem:[#allocation3 + $0x8] sm:$0xf] %v239_v7  ;;  %3238 = sst [smem:[#allocation27_spill]] %s1859_s11  ;;  %s1897_s18 = sld [smem:[#allocation6 + $0x4a]]  ;;  %v3178_v5 = vstv %s1859_s11  ;;  %v3151_v6 = vstv %s1861_s9 }
  0x6a   : > { %234 = vst [vmem:[#allocation2] sm:$0xf] %v232_v10  ;;  %235 = vst [vmem:[#allocation2 + $0x8] sm:$0xf] %v233_v11  ;;  %3239 = sst [smem:[#allocation28_spill]] %s1861_s9  ;;  %s1899_s10 = sld [smem:[#allocation6 + $0x36]]  ;;  %v3155_v7 = vstv %s1865_s13  ;;  %v3141_v8 = vstv %s1863_s12 }
  0x6b   : > { %3240 = sst [smem:[#allocation29_spill]] %s1863_s12  ;;  %s1901_s16 = sld [smem:[#allocation6 + $0x24]]  ;;  %v3153_v9 = vstv %s1867_s1 }
  0x6c   : > { %3241 = sst [smem:[#allocation30_spill]] %s1865_s13  ;;  %s1905_s19 = sld [smem:[#allocation6 + $0x5c]] }
  0x6d   : > { %3242 = sst [smem:[#allocation31_spill]] %s1867_s1  ;;  %s1903_s15 = sld [smem:[#allocation6 + $0x57]]  ;;  %v3188_v21 = vstv %s1893_s2 }
  0x6e   : > { %3243 = sst [smem:[#allocation32_spill]] %s1869_s29  ;;  %s1907_s24 = sld [smem:[#allocation6 + $0x25]] }
  0x6f   : > { %3244 = sst [smem:[#allocation33_spill]] %s1871_s26  ;;  %s1911_s14 = sld [smem:[#allocation6 + $0x5d]] }
  0x70   : > { %v285_v12 = vld [vmem:[#allocation3] sm:$0xff]  ;;  %v286_v13 = vld [vmem:[#allocation3 + $0x8] sm:$0xff]  ;;  %3245 = sst [smem:[#allocation34_spill]] %s1873_s4  ;;  %s1913_s3 = sld [smem:[#allocation6 + $0x51]] }
  0x71   : > { %v287_v14 = vrot.slane %v285_v12, 4  ;;  %v293_v15 = vrot.slane %v286_v13, 4  ;;  %v245_v16 = vld [vmem:[#allocation2] sm:$0xff]  ;;  %v246_v17 = vld [vmem:[#allocation2 + $0x8] sm:$0xff]  ;;  %3254 = sst [smem:[#allocation43_spill]] %s1891_s0  ;;  %s1915_s8 = sld [smem:[#allocation6 + $0x26]] }
  0x72   : > { %v247_v18 = vrot.slane %v245_v16, 4  ;;  %v253_v19 = vrot.slane %v246_v17, 4  ;;  %3255 = sst [smem:[#allocation44_spill]] %s1893_s2  ;;  %s1919_s25 = sld [smem:[#allocation6 + $0x2b]] }
  0x73   : > { %v288_v23 = vmax.f32 %v285_v12, %v287_v14  ;;  %v294_v24 = vmax.f32 %v286_v13, %v293_v15  ;;  %3256 = sst [smem:[#allocation45_spill]] %s1895_s30  ;;  %s1917_s17 = sld [smem:[#allocation6 + $0x3d]]  ;;  %v3156_v12 = vstv %s1869_s29  ;;  %v3172_v13 = vstv %s1871_s26 }
  0x74   : > { %v248_v25 = vadd.f32 %v247_v18, %v245_v16  ;;  %v254_v26 = vadd.f32 %v253_v19, %v246_v17  ;;  %3257 = sst [smem:[#allocation46_spill]] %s1897_s18  ;;  %s1923_s18 = sld [smem:[#allocation6 + $0x2c]]  ;;  %v3162_v14 = vstv %s1873_s4 }
  0x75   : > { %v289_v27 = vrot.slane %v288_v23, 2  ;;  %v295_v28 = vrot.slane %v294_v24, 2  ;;  %3258 = sst [smem:[#allocation47_spill]] %s1899_s10  ;;  %s1921_s10 = sld [smem:[#allocation6 + $0x5e]] }
  0x76   : > { %v249_v29 = vrot.slane %v248_v25, 2  ;;  %v255_v30 = vrot.slane %v254_v26, 2  ;;  %3259 = sst [smem:[#allocation48_spill]] %s1901_s16  ;;  %s1925_s0 = sld [smem:[#allocation6 + $0x58]] }
  0x77   : > { %v290_v33 = vmax.f32 %v288_v23, %v289_v27  ;;  %v296_v34 = vmax.f32 %v294_v24, %v295_v28  ;;  %3260 = sst [smem:[#allocation49_spill]] %s1903_s15  ;;  %s2005_s13 = sld [smem:[#allocation6 + $0x37]]  ;;  %v3195_v24 = vstv %s1901_s16  ;;  %v3187_v27 = vstv %s1903_s15 }
  0x78   : > { %v250_v35 = vadd.f32 %v249_v29, %v248_v25  ;;  %v256_v36 = vadd.f32 %v255_v30, %v254_v26  ;;  %3261 = sst [smem:[#allocation50_spill]] %s1905_s19  ;;  %s2007_s9 = sld [smem:[#allocation6 + $0x3e]]  ;;  %v3197_v25 = vstv %s1905_s19  ;;  %v3185_v26 = vstv %s1895_s30 }
  0x79   : > { %v291_v37 = vrot.slane %v290_v33, 1  ;;  %v297_v38 = vrot.slane %v296_v34, 1  ;;  %3262 = sst [smem:[#allocation51_spill]] %s1907_s24  ;;  %s1937_s24 = sld [smem:[#allocation6 + $0xf]] }
  0x7a   : > { %v251_v39 = vrot.slane %v250_v35, 1  ;;  %v257_v40 = vrot.slane %v256_v36, 1  ;;  %3263 = sst [smem:[#allocation52_spill]] %s1911_s14  ;;  %s2017_s4 = sld [smem:[#allocation6 + $0x4c]] }
  0x7b   : > { %v292_v42 = vmax.f32 %v290_v33, %v291_v37  ;;  %v298_v43 = vmax.f32 %v296_v34, %v297_v38  ;;  %3264 = sst [smem:[#allocation53_spill]] %s1913_s3  ;;  %s1929_s14 = sld [smem:[#allocation6 + $0x2d]] }
  0x7c   : > { %v252_v44 = vadd.f32 %v251_v39, %v250_v35  ;;  %v258_v45 = vadd.f32 %v257_v40, %v256_v36  ;;  %3265 = sst [smem:[#allocation54_spill]] %s1915_s8  ;;  %s1931_s3 = sld [smem:[#allocation6 + $0x44]] }
  0x7d   : > { %v301_v46 = vcombine.low %v292_v42, %v298_v43  ;;  %3266 = sst [smem:[#allocation55_spill]] %s1917_s17  ;;  %s1933_s8 = sld [smem:[#allocation6 + $0x1]] }
  0x7e   : > { %v259_v47 = vmul.f32 0.25, %v252_v44  ;;  %v260_v48 = vmul.f32 0.25, %v258_v45  ;;  %3267 = sst [smem:[#allocation56_spill]] %s1919_s25  ;;  %s1935_s17 = sld [smem:[#allocation6 + $0x8]] }
  0x7f   : > { %v308_v49 = vrot.slane %v301_v46, %v269_v41  ;;  %3268 = sst [smem:[#allocation57_spill]] %s1921_s10  ;;  %s1939_s10 = sld [smem:[#allocation6 + $0x16]] }
  0x80   : > { %v263_v50 = vcombine.low %v259_v47, %v260_v48  ;;  %3269 = sst [smem:[#allocation58_spill]] %s1923_s18  ;;  %s1941_s18 = sld [smem:[#allocation6 + $0x1d]] }
  0x81   : > { %v315_v51 = vrot.slane %v308_v49, %v269_v41  ;;  %3270 = sst [smem:[#allocation59_spill]] %s1925_s0  ;;  %s1943_s0 = sld [smem:[#allocation6 + $0x2]] }
  0x82   : > { %v270_v52 = vrot.slane %v263_v50, %v269_v41  ;;  %3271 = sst [smem:[#allocation60_spill]] %s1929_s14  ;;  %s1947_s14 = sld [smem:[#allocation6 + $0x9]] }
  0x83   : > { %317 = vst.msk [vmem:[#allocation3] ss:$8 sm:$0x3] %vm281_vm0, %v315_v51  ;;  %3272 = sst [smem:[#allocation61_spill]] %s1931_s3  ;;  %s1949_s3 = sld [smem:[#allocation6 + $0x10]] }
  0x84   : > { %v277_v53 = vrot.slane %v270_v52, %v269_v41  ;;  %3273 = sst [smem:[#allocation62_spill]] %s1933_s8  ;;  %s2015_s26 = sld [smem:[#allocation6 + $0x45]] }
  0x85   : > { %3274 = sst [smem:[#allocation63_spill]] %s1935_s17  ;;  %s1951_s8 = sld [smem:[#allocation6 + $0x17]] }
  0x86   : > { %283 = vst.msk [vmem:[#allocation2] ss:$8 sm:$0x3] %vm281_vm0, %v277_v53  ;;  %3275 = sst [smem:[#allocation64_spill]] %s1937_s24  ;;  %s1953_s17 = sld [smem:[#allocation6 + $0x1e]] }
  0x87   : > { %3276 = sst [smem:[#allocation65_spill]] %s1939_s10  ;;  %s1955_s24 = sld [smem:[#allocation6 + $0x3]] }
  0x88   : > { %3277 = sst [smem:[#allocation66_spill]] %s1941_s18  ;;  %s1957_s10 = sld [smem:[#allocation6 + $0xa]] }
  0x89   : > { %3278 = sst [smem:[#allocation67_spill]] %s1943_s0  ;;  %s1959_s18 = sld [smem:[#allocation6 + $0x11]] }
  0x8a   : > { %v345_v54 = vld [vmem:[#allocation3] ss:$0 sm:$0xff]  ;;  %v429_v56 = vld [vmem:[#allocation3 + $0x8] ss:$0 sm:$0xff]  ;;  %3279 = sst [smem:[#allocation68_spill]] %s1947_s14  ;;  %s1961_s0 = sld [smem:[#allocation6 + $0x18]] }
  0x8b   : > { %347 = vrot.lane.b32.xlu1 %v345_v54, %s1667_s21  ;;  %334 = vrot.lane.b32.xlu0 %v345_v54, %s1668_s23  ;;  %3280 = sst [smem:[#allocation69_spill]] %s1949_s3  ;;  %s1965_s3 = sld [smem:[#allocation6 + $0x1f]] }
  0x8c   : > { %3281 = sst [smem:[#allocation70_spill]] %s1951_s8  ;;  %s1979_s14 = sld [smem:[#allocation6 + $0x19]] }
  0x8d   : > { %v325_v55 = vld [vmem:[#allocation2] ss:$0 sm:$0xff]  ;;  %v423_v57 = vld [vmem:[#allocation2 + $0x8] ss:$0 sm:$0xff]  ;;  %3282 = sst [smem:[#allocation71_spill]] %s1953_s17  ;;  %s1967_s8 = sld [smem:[#allocation6 + $0x27]] }
  0x8e   : > { %3283 = sst [smem:[#allocation72_spill]] %s1955_s24  ;;  %s1969_s17 = sld [smem:[#allocation6 + $0x2e]] }
  0x8f   : > { %359 = vrot.lane.b32.xlu1 %v345_v54, %s1669_s28  ;;  %327 = vrot.lane.b32.xlu0 %v325_v55, %s1668_s23  ;;  %3284 = sst [smem:[#allocation73_spill]] %s1957_s10  ;;  %s1971_s10 = sld [smem:[#allocation6 + $0x5f]] }
  0x90   : > { %3285 = sst [smem:[#allocation74_spill]] %s1959_s18  ;;  %s1973_s24 = sld [smem:[#allocation6 + $0x4]] }
  0x91   : > { %3286 = sst [smem:[#allocation75_spill]] %s1961_s0  ;;  %s1975_s0 = sld [smem:[#allocation6 + $0xb]] }
  0x92   : > { %3287 = sst [smem:[#allocation76_spill]] %s1965_s3  ;;  %s1977_s18 = sld [smem:[#allocation6 + $0x12]] }
  0x93   : > { %371 = vrot.lane.b32.xlu1 %v345_v54, %s1670_s20  ;;  %353 = vrot.lane.b32.xlu0 %v325_v55, %s1669_s28  ;;  %3288 = sst [smem:[#allocation77_spill]] %s1967_s8  ;;  %s1989_s8 = sld [smem:[#allocation6 + $0x52]] }
  0x94   : > { %3289 = sst [smem:[#allocation78_spill]] %s1969_s17  ;;  %s1983_s17 = sld [smem:[#allocation6 + $0x20]] }
  0x95   : > { %3290 = sst [smem:[#allocation79_spill]] %s1971_s10  ;;  %s1985_s10 = sld [smem:[#allocation6 + $0x4b]] }
  0x96   : > { %3291 = sst [smem:[#allocation80_spill]] %s1973_s24  ;;  %s3305_s29 = sld [smem:[#allocation51_spill]] }
  0x97   : > { %383 = vrot.lane.b32.xlu1 %v345_v54, %s1671_s22  ;;  %365 = vrot.lane.b32.xlu0 %v325_v55, %s1670_s20  ;;  %3292 = sst [smem:[#allocation81_spill]] %s1975_s0  ;;  %s1991_s0 = sld [smem:[#allocation6 + $0x59]] }
  0x98   : > { %3293 = sst [smem:[#allocation82_spill]] %s1977_s18  ;;  %s3306_s1 = sld [smem:[#allocation52_spill]] }
  0x99   : > { %3294 = sst [smem:[#allocation83_spill]] %s1979_s14  ;;  %s1997_s14 = sld [smem:[#allocation6 + $0x28]] }
  0x9a   : > { %3295 = sst [smem:[#allocation84_spill]] %s1983_s17  ;;  %s1999_s17 = sld [smem:[#allocation6 + $0x60]] }
  0x9b   : > { %395 = vrot.lane.b32.xlu1 %v345_v54, %s1672_s27  ;;  %377 = vrot.lane.b32.xlu0 %v325_v55, %s1671_s22  ;;  %3296 = sst [smem:[#allocation85_spill]] %s1985_s10  ;;  %s2023_s12 = sld [smem:[#allocation6 + $0x2f]] }
  0x9c   : > { %3297 = sst [smem:[#allocation86_spill]] %s1989_s8  ;;  %s2025_s11 = sld [smem:[#allocation6 + $0x31]]  ;;  %v3198_v31 = vstv %s3305_s29 }
  0x9d   : > { %3298 = sst [smem:[#allocation87_spill]] %s1991_s0  ;;  %s2031_s7 = sld [smem:[#allocation6 + $0x5]]  ;;  %v3193_v50 = vstv %s1991_s0 }
  0x9e   : > { %3301 = sst [smem:[#allocation90_spill]] %s2005_s13  ;;  %s3316_s2 = sld [smem:[#allocation62_spill]]  ;;  %v3199_v32 = vstv %s3306_s1 }
  0x9f   : > { %407 = vrot.lane.b32.xlu1 %v345_v54, %s1673_s5  ;;  %389 = vrot.lane.b32.xlu0 %v325_v55, %s1672_s27  ;;  %3299 = sst [smem:[#allocation88_spill]] %s1997_s14  ;;  %s2039_s19 = sld [smem:[#allocation6 + $0xc]] }
  0xa0   : > { %3300 = sst [smem:[#allocation89_spill]] %s1999_s17  ;;  %s2041_s30 = sld [smem:[#allocation6 + $0x13]] }
  0xa1   : > { %3302 = sst [smem:[#allocation91_spill]] %s2007_s9  ;;  %s2049_s25 = sld [smem:[#allocation6 + $0x1a]] }
  0xa2   : > { %3303 = sst [smem:[#allocation92_spill]] %s2015_s26  ;;  %s2051_s29 = sld [smem:[#allocation6 + $0x21]] }
  0xa3   : > { %419 = vrot.lane.b32.xlu1 %v345_v54, %s1674_s6  ;;  %401 = vrot.lane.b32.xlu0 %v325_v55, %s1673_s5  ;;  %3304 = sst [smem:[#allocation93_spill]] %s2017_s4  ;;  %s2057_s4 = sld [smem:[#allocation6 + $0x5a]] }
  0xa4   : > { %3308 = sst [smem:[#allocation94_spill]] %s2023_s12  ;;  %v3207_v38 = vstv %s3316_s2  ;;  %s2059_s17 = sld [smem:[#allocation6 + $0x38]] }
  0xa5   : > { %3309 = sst [smem:[#allocation95_spill]] %s2025_s11  ;;  %s2067_s2 = sld [smem:[#allocation6 + $0x3f]] }
  0xa6   : > { %3314 = sst [smem:[#allocation96_spill]] %s2031_s7  ;;  %s2073_s16 = sld [smem:[#allocation6 + $0x30]] }
  0xa7   : > { %431 = vrot.lane.b32.xlu1 %v429_v56, %s1668_s23  ;;  %413 = vrot.lane.b32.xlu0 %v325_v55, %s1674_s6  ;;  %3320 = sst [smem:[#allocation98_spill]] %s2039_s19  ;;  %s2075_s12 = sld [smem:[#allocation6 + $0x61]] }
  0xa8   : > { %3322 = sst [smem:[#allocation99_spill]] %s2041_s30  ;;  %s3331_s30 = sld [smem:[#allocation53_spill]] }
  0xa9   : > { %3326 = sst [smem:[#allocation100_spill]] %s2049_s25  ;;  %s3346_s15 = sld [smem:[#allocation77_spill]]  ;;  %v3192_v49 = vstv %s2057_s4 }
  0xaa   : > { %3328 = sst [smem:[#allocation101_spill]] %s2051_s29  ;;  %s2065_s29 = sld [smem:[#allocation6 + $0x29]]  ;;  %v3161_v45 = vstv %s2059_s17 }
  0xab   : > { %443 = vrot.lane.b32.xlu1 %v429_v56, %s1667_s21  ;;  %425 = vrot.lane.b32.xlu0 %v423_v57, %s1668_s23  ;;  %s1877_s23 = sld [smem:[#allocation6 + $0x47]]  ;;  %3333 = sst [smem:[#allocation103_spill]] %s2059_s17 }
  0xac   : > { %3332 = sst [smem:[#allocation102_spill]] %s2057_s4  ;;  %s2085_s19 = sld [smem:[#allocation6 + $0xd]] }
  0xad   : > { %3339 = sst [smem:[#allocation105_spill]] %s2067_s2  ;;  %s3347_s2 = sld [smem:[#allocation79_spill]] }
  0xae   : > { %v3182_v51 = vstv %s3331_s30  ;;  %3343 = sst [smem:[#allocation106_spill]] %s2073_s16  ;;  %s3351_s30 = sld [smem:[#allocation61_spill]] }
  0xaf   : > { %455 = vrot.lane.b32.xlu1 %v429_v56, %s1669_s28  ;;  %437 = vrot.lane.b32.xlu0 %v423_v57, %s1667_s21  ;;  %3344 = sst [smem:[#allocation107_spill]] %s2075_s12  ;;  %s2093_s12 = sld [smem:[#allocation6 + $0x1b]] }
  0xb0   : > { %3338 = sst [smem:[#allocation104_spill]] %s2065_s29  ;;  %s2091_s16 = sld [smem:[#allocation6 + $0x14]] }
  0xb1   : > { %3247 = sst [smem:[#allocation36_spill]] %s1877_s23  ;;  %v3165_v16 = vstv %s1877_s23  ;;  %s3312_s23 = sld [smem:[#allocation57_spill]] }
  0xb2   : > { %3349 = sst [smem:[#allocation109_spill]] %s2085_s19  ;;  %s2107_s11 = sld [smem:[#allocation6 + $0x7]] }
  0xb3   : > { %467 = vrot.lane.b32.xlu1 %v429_v56, %s1670_s20  ;;  %449 = vrot.lane.b32.xlu0 %v423_v57, %s1669_s28  ;;  %s1879_s28 = sld [smem:[#allocation6 + $0x48]]  ;;  %s2117_s18 = sld [smem:[#allocation6 + $0x15]] }
  0xb4   : > { %s3365_s1 = sld [smem:[#allocation95_spill]]  ;;  %s3374_s3 = sld [smem:[#allocation29_spill]] }
  0xb5   : > { %3353 = sst [smem:[#allocation111_spill]] %s2093_s12  ;;  %s3378_s25 = sld [smem:[#allocation30_spill]] }
  0xb6   : > { %3352 = sst [smem:[#allocation110_spill]] %s2091_s16  ;;  %s3381_s12 = sld [smem:[#allocation32_spill]] }
  0xb7   : > { %341 = vrot.lane.b32.xlu1 %v325_v55, %s1667_s21  ;;  %461 = vrot.lane.b32.xlu0 %v423_v57, %s1670_s20  ;;  %s1875_s21 = sld [smem:[#allocation6 + $0x35]]  ;;  %s1881_s20 = sld [smem:[#allocation6 + $0x49]]  ;;  %v3201_v36 = vstv %s3312_s23 }
  0xb8   : > { %3360 = sst [smem:[#allocation114_spill]] %s2107_s11  ;;  %s3370_s23 = sld [smem:[#allocation105_spill]] }
  0xb9   : > { %3248 = sst [smem:[#allocation37_spill]] %s1879_s28  ;;  %v3166_v17 = vstv %s1879_s28  ;;  %s3429_s4 = sld [smem:[#allocation67_spill]] }
  0xba   : > { %3366 = sst [smem:[#allocation116_spill]] %s2117_s18  ;;  %s3430_s0 = sld [smem:[#allocation89_spill]] }
  0xbb   : > { %479 = vrot.lane.b32.xlu1 %v429_v56, %s1671_s22  ;;  %473 = vrot.lane.b32.xlu0 %v423_v57, %s1671_s22  ;;  %s1883_s22 = sld [smem:[#allocation6 + $0x3c]]  ;;  %s3406_s18 = sld [smem:[#allocation44_spill]] }
  0xbc   : > { %s3434_s7 = sld [smem:[#allocation64_spill]]  ;;  %s3437_s11 = sld [smem:[#allocation68_spill]] }
  0xbd   : > { %3246 = sst [smem:[#allocation35_spill]] %s1875_s21  ;;  %v3150_v15 = vstv %s1875_s21  ;;  %v3171_v18 = vstv %s1881_s20  ;;  %s3444_s16 = sld [smem:[#allocation69_spill]] }
  0xbe   : > { %3249 = sst [smem:[#allocation38_spill]] %s1881_s20  ;;  %s3307_s21 = sld [smem:[#allocation43_spill]]  ;;  %v3169_v44 = vstv %s3370_s23 }
  0xbf   : > { %491 = vrot.lane.b32.xlu1 %v429_v56, %s1672_s27  ;;  %485 = vrot.lane.b32.xlu0 %v423_v57, %s1672_s27  ;;  %s1885_s27 = sld [smem:[#allocation6 + $0x4e]]  ;;  %s3311_s20 = sld [smem:[#allocation54_spill]] }
  0xc0   : > { %s3432_s23 = sld [smem:[#allocation56_spill]]  ;;  %s3464_s28 = sld [smem:[#allocation74_spill]] }
  0xc1   : > { %3250 = sst [smem:[#allocation39_spill]] %s1883_s22  ;;  %v3154_v19 = vstv %s1883_s22  ;;  %s3313_s22 = sld [smem:[#allocation46_spill]] }
  0xc2   : > { %s3447_s19 = sld [smem:[#allocation72_spill]] }
  0xc3   : > { %503 = vrot.lane.b32.xlu1 %v429_v56, %s1673_s5  ;;  %497 = vrot.lane.b32.xlu0 %v423_v57, %s1673_s5  ;;  %s1887_s5 = sld [smem:[#allocation6 + $0x4f]] }
  0xc4   : > { %v3163_v33 = vstv %s3307_s21  ;;  %s2083_s21 = sld [smem:[#allocation6 + $0x6]] }
  0xc5   : > { %3251 = sst [smem:[#allocation40_spill]] %s1885_s27  ;;  %v3179_v20 = vstv %s1885_s27  ;;  %s2033_s27 = sld [smem:[#allocation6 + $0x53]]  ;;  %v3200_v35 = vstv %s3311_s20 }
  0xc6   : > { %s3336_s20 = sld [smem:[#allocation59_spill]] }
  0xc7   : > { %515 = vrot.lane.b32.xlu1 %v429_v56, %s1674_s6  ;;  %509 = vrot.lane.b32.xlu0 %v423_v57, %s1674_s6  ;;  %s1889_s6 = sld [smem:[#allocation6 + $0x50]]  ;;  %v3174_v37 = vstv %s3313_s22 }
  0xc8   : > { %s3337_s22 = sld [smem:[#allocation47_spill]] }
  0xc9   : > { %3252 = sst [smem:[#allocation41_spill]] %s1887_s5  ;;  %v3180_v22 = vstv %s1887_s5  ;;  %s3342_s5 = sld [smem:[#allocation55_spill]] }
  0xca   : > { %3348 = sst [smem:[#allocation108_spill]] %s2083_s21  ;;  %s3400_s17 = sld [smem:[#allocation41_spill]] }
  0xcb   : > { %3315 = sst [smem:[#allocation97_spill]] %s2033_s27  ;;  %s3359_s27 = sld [smem:[#allocation93_spill]] }
  0xcc   : > { %v3190_v54 = vstv %s3336_s20  ;;  %s2099_s20 = sld [smem:[#allocation6 + $0x22]]  ;;  %s3377_s21 = sld [smem:[#allocation28_spill]] }
  0xcd   : > { %3253 = sst [smem:[#allocation42_spill]] %s1889_s6  ;;  %v3181_v23 = vstv %s1889_s6  ;;  %s2101_s6 = sld [smem:[#allocation6]] }
  0xce   : > { %v3144_v55 = vstv %s3337_s22  ;;  %s3361_s24 = sld [smem:[#allocation97_spill]]  ;;  %s3416_s22 = sld [smem:[#allocation51_spill]] }
  0xd2   : > { %3356 = sst [smem:[#allocation112_spill]] %s2099_s20  ;;  %s3391_s20 = sld [smem:[#allocation36_spill]] }
  0xd3   : > { %3357 = sst [smem:[#allocation113_spill]] %s2101_s6  ;;  %s3465_s6 = sld [smem:[#allocation75_spill]] }
  0xfd   : > { %v348_v58 = vpop.permute.xlu1 %347  ;;  %v335_v59 = vpop.permute.xlu0 %334 }
  0xfe   : > { %350 = vst.msk [vmem:[#allocation4 + $0x1c] sm:$0x1] %vm330_vm1, %v348_v58  ;;  %338 = vst.msk [vmem:[#allocation4 + $0x1b] sm:$0x1] %vm330_vm1, %v335_v59  ;;  %v3157_v59 = vstv %s3342_s5  ;;  %v3170_v58 = vstv %s2015_s26  ;;  %s3373_s5 = sld [smem:[#allocation27_spill]]  ;;  %s3431_s26 = sld [smem:[#allocation63_spill]] }
 0x101   : > { %v360_v60 = vpop.permute.xlu1 %359  ;;  %v328_v61 = vpop.permute.xlu0 %327 }
 0x102   : > { %362 = vst.msk [vmem:[#allocation4 + $0x1d] sm:$0x1] %vm330_vm1, %v360_v60  ;;  %331 = vst.msk [vmem:[#allocation4 + $0x3] sm:$0x1] %vm330_vm1, %v328_v61  ;;  %v3149_v60 = vstv %s3365_s1  ;;  %s3392_s1 = sld [smem:[#allocation37_spill]] }
 0x105   : > { %v372_v62 = vpop.permute.xlu1 %371  ;;  %v354_v63 = vpop.permute.xlu0 %353 }
 0x106   : > { %374 = vst.msk [vmem:[#allocation4 + $0x1e] sm:$0x1] %vm330_vm1, %v372_v62  ;;  %356 = vst.msk [vmem:[#allocation4 + $0x5] sm:$0x1] %vm330_vm1, %v354_v63  ;;  %v3203_v62 = vstv %s3346_s15  ;;  %v3205_v63 = vstv %s3347_s2  ;;  %s2109_s2 = sld [smem:[#allocation6 + $0xe]]  ;;  %s3372_s15 = sld [smem:[#allocation26_spill]] }
 0x109   : > { %v384_v0 = vpop.permute.xlu1 %383  ;;  %v366_v1 = vpop.permute.xlu0 %365 }
 0x10a   : > { %386 = vst.msk [vmem:[#allocation4 + $0x1f] sm:$0x1] %vm330_vm1, %v384_v0  ;;  %368 = vst.msk [vmem:[#allocation4 + $0x6] sm:$0x1] %vm330_vm1, %v366_v1 }
 0x10c   : > { %3362 = sst [smem:[#allocation115_spill]] %s2109_s2  ;;  %s3385_s2 = sld [smem:[#allocation33_spill]] }
 0x10d   : > { %v396_v2 = vpop.permute.xlu1 %395  ;;  %v378_v3 = vpop.permute.xlu0 %377 }
 0x10e   : > { %398 = vst.msk [vmem:[#allocation4 + $0x20] sm:$0x1] %vm330_vm1, %v396_v2  ;;  %380 = vst.msk [vmem:[#allocation4 + $0x7] sm:$0x1] %vm330_vm1, %v378_v3  ;;  %v3184_v2 = vstv %s1989_s8  ;;  %s3441_s8 = sld [smem:[#allocation66_spill]] }
 0x111   : > { %v408_v10 = vpop.permute.xlu1 %407  ;;  %v390_v11 = vpop.permute.xlu0 %389  ;;  %v625_v42 = vld [vmem:[#allocation4 + $0x18] sm:$0xff] }
 0x112   : > { %410 = vst.msk [vmem:[#allocation4 + $0x21] sm:$0x1] %vm330_vm1, %v408_v10  ;;  %392 = vst.msk [vmem:[#allocation4 + $0x8] sm:$0x1] %vm330_vm1, %v390_v11  ;;  %v3164_v10 = vstv %s3351_s30  ;;  %v3147_v11 = vstv %s2005_s13  ;;  %v2161_v56 = vmul.f32 %v3141_v8, %v625_v42  ;;  %v2166_v3 = vmul.f32 %v3150_v15, %v625_v42  ;;  %s3433_s13 = sld [smem:[#allocation58_spill]]  ;;  %s3439_s30 = sld [smem:[#allocation65_spill]] }
 0x113   : > { %v2178_v30 = vmul.f32 %v3149_v60, %v625_v42 }
 0x115   : > { %v420_v28 = vpop.permute.xlu1 %419  ;;  %v402_v29 = vpop.permute.xlu0 %401  ;;  %v626_v53 = vld [vmem:[#allocation4 + $0x19] sm:$0xff]  ;;  %3386 = vst [vmem:[#allocation119_spill] sm:$0xff] %v2178_v30 }
 0x116   : > { %422 = vst.msk [vmem:[#allocation4 + $0x22] sm:$0x1] %vm330_vm1, %v420_v28  ;;  %404 = vst.msk [vmem:[#allocation4 + $0x9] sm:$0x1] %vm330_vm1, %v402_v29  ;;  %v3177_v28 = vstv %s3359_s27  ;;  %v3186_v29 = vstv %s3361_s24  ;;  %v2184_v8 = vmul.f32 %v3151_v6, %v626_v53  ;;  %v2188_v41 = vmul.f32 %v3155_v7, %v626_v53  ;;  %s3415_s27 = sld [smem:[#allocation50_spill]]  ;;  %s3428_s24 = sld [smem:[#allocation62_spill]] }
 0x117   : > { %v2204_v6 = vmul.f32 %v3157_v59, %v626_v53 }
 0x119   : > { %v432_v46 = vpop.permute.xlu1 %431  ;;  %v414_v47 = vpop.permute.xlu0 %413  ;;  %v627_v40 = vld [vmem:[#allocation4 + $0x1a] sm:$0xff]  ;;  %3394 = vst [vmem:[#allocation121_spill] sm:$0xff] %v2204_v6 }
 0x11a   : > { %434 = vst.msk [vmem:[#allocation4 + $0x23] sm:$0x1] %vm330_vm1, %v432_v46  ;;  %416 = vst.msk [vmem:[#allocation4 + $0xa] sm:$0x1] %vm330_vm1, %v414_v47  ;;  %v3176_v46 = vstv %s1985_s10  ;;  %v3159_v47 = vstv %s2007_s9  ;;  %v2200_v15 = vmul.f32 %v3156_v12, %v627_v40  ;;  %v2220_v12 = vmul.f32 %v3172_v13, %v627_v40  ;;  %s3399_s9 = sld [smem:[#allocation40_spill]] }
 0x11b   : > { %v2224_v59 = vmul.f32 %v3162_v14, %v627_v40  ;;  %v2248_v14 = vmul.f32 %v3170_v58, %v627_v40  ;;  %s3414_s10 = sld [smem:[#allocation48_spill]] }
 0x11d   : > { %v444_v0 = vpop.permute.xlu1 %443  ;;  %v426_v1 = vpop.permute.xlu0 %425  ;;  %v2180_v48 = vld [vmem:[#allocation4 + $0x1b] sm:$0xff]  ;;  %3405 = vst [vmem:[#allocation127_spill] sm:$0xff] %v2248_v14 }
 0x11e   : > { %446 = vst.msk [vmem:[#allocation4 + $0x24] sm:$0x1] %vm330_vm1, %v444_v0  ;;  %428 = vst.msk [vmem:[#allocation4 + $0xb] sm:$0x1] %vm330_vm1, %v426_v1 }
 0x11f   : > { %3388 = vst [vmem:[#allocation120_spill] sm:$0xff] %v2180_v48 }
 0x121   : > { %v456_v61 = vpop.permute.xlu1 %455  ;;  %v438_v57 = vpop.permute.xlu0 %437  ;;  %v2216_v7 = vld [vmem:[#allocation4 + $0x1c] sm:$0xff] }
 0x122   : > { %458 = vst.msk [vmem:[#allocation4 + $0x25] sm:$0x1] %vm330_vm1, %v456_v61  ;;  %440 = vst.msk [vmem:[#allocation4 + $0xc] sm:$0x1] %vm330_vm1, %v438_v57  ;;  %v2153_v57 = vmul.f32 %v3196_v4, %v625_v42  ;;  %v2157_v61 = vmul.f32 %v3178_v5, %v625_v42  ;;  %v2296_v5 = vmul.f32 %v3182_v51, %v2216_v7 }
 0x123   : > { %3398 = vst [vmem:[#allocation124_spill] sm:$0xff] %v2216_v7  ;;  %v2318_v51 = vmul.f32 %v3186_v29, %v2216_v7 }
 0x124   : > { %3418 = vst [vmem:[#allocation132_spill] sm:$0xff] %v2296_v5  ;;  %v3476_v5 = vstv %s3437_s11 }
 0x125   : > { %v468_v52 = vpop.permute.xlu1 %467  ;;  %v450_v34 = vpop.permute.xlu0 %449  ;;  %3421 = vst [vmem:[#allocation134_spill] sm:$0xff] %v2318_v51 }
 0x126   : > { %470 = vst.msk [vmem:[#allocation4 + $0x26] sm:$0x1] %vm330_vm1, %v468_v52  ;;  %452 = vst.msk [vmem:[#allocation4 + $0xd] sm:$0x1] %vm330_vm1, %v450_v34  ;;  %v2170_v52 = vmul.f32 %v3144_v55, %v625_v42  ;;  %v2174_v34 = vmul.f32 %v3147_v11, %v625_v42  ;;  %v2192_v55 = vmul.f32 %v3153_v9, %v626_v53 }
 0x127   : > { %v2196_v11 = vmul.f32 %v3154_v19, %v626_v53  ;;  %v2208_v9 = vmul.f32 %v3159_v47, %v626_v53  ;;  %v2212_v19 = vmul.f32 %v3161_v45, %v626_v53  ;;  %v2228_v47 = vmul.f32 %v3163_v33, %v627_v40 }
 0x128   : > { %3383 = vst [vmem:[#allocation117_spill] sm:$0xff] %v2170_v52  ;;  %3384 = vst [vmem:[#allocation118_spill] sm:$0xff] %v2174_v34  ;;  %v2232_v53 = vmul.f32 %v3164_v10, %v627_v40  ;;  %v2244_v45 = vmul.f32 %v3166_v17, %v2180_v48  ;;  %v2252_v33 = vmul.f32 %v3169_v44, %v627_v40  ;;  %v3475_v52 = vstv %s3431_s26 }
 0x129   : > { %v342_v42 = vpop.permute.xlu1 %341  ;;  %v462_v60 = vpop.permute.xlu0 %461  ;;  %3396 = vst [vmem:[#allocation122_spill] sm:$0xff] %v2208_v9  ;;  %3397 = vst [vmem:[#allocation123_spill] sm:$0xff] %v2212_v19  ;;  %v2257_v10 = vmul.f32 %v3171_v18, %v2180_v48  ;;  %v2267_v17 = vmul.f32 %v3176_v46, %v2180_v48  ;;  %v2272_v40 = vmul.f32 %v3177_v28, %v2180_v48  ;;  %v2274_v18 = vld [vmem:[#allocation4 + $0x5] sm:$0xff]  ;;  %v3462_v9 = vstv %s3428_s24  ;;  %s3480_s24 = sld [smem:[#allocation76_spill]] }
 0x12a   : > { %344 = vst.msk [vmem:[#allocation4 + $0x4] sm:$0x1] %vm330_vm1, %v342_v42  ;;  %464 = vst.msk [vmem:[#allocation4 + $0xe] sm:$0x1] %vm330_vm1, %v462_v60  ;;  %v2234_v42 = vld [vmem:[#allocation4 + $0x1d] sm:$0xff]  ;;  %v2239_v60 = vmul.f32 %v3165_v16, %v2180_v48  ;;  %v2262_v16 = vmul.f32 %v3174_v37, %v2180_v48  ;;  %v2281_v37 = vmul.f32 %v3179_v20, %v2216_v7  ;;  %v3446_v48 = vstv %s3431_s26  ;;  %s3533_s26 = sld [smem:[#allocation42_spill]] }
 0x12b   : > { %3401 = vst [vmem:[#allocation125_spill] sm:$0xff] %v2232_v53  ;;  %3403 = vst [vmem:[#allocation126_spill] sm:$0xff] %v2234_v42  ;;  %v2276_v13 = vld [vmem:[#allocation4 + $0x1e] sm:$0xff]  ;;  %v2286_v46 = vmul.f32 %v3180_v22, %v2216_v7  ;;  %v2291_v28 = vmul.f32 %v3181_v23, %v2216_v7  ;;  %v2303_v20 = vmul.f32 %v3188_v21, %v2234_v42  ;;  %v3467_v53 = vstv %s3429_s4 }
 0x12c   : > { %3407 = vst [vmem:[#allocation128_spill] sm:$0xff] %v2252_v33  ;;  %3409 = vst [vmem:[#allocation129_spill] sm:$0xff] %v2267_v17  ;;  %v2308_v22 = vmul.f32 %v3185_v26, %v2234_v42  ;;  %v2313_v23 = vmul.f32 %v3184_v2, %v2216_v7  ;;  %v2333_v2 = vmul.f32 %v3193_v50, %v2234_v42  ;;  %v3440_v7 = vstv %s1997_s14  ;;  %s3459_s14 = sld [smem:[#allocation80_spill]] }
 0x12d   : > { %3411 = vst [vmem:[#allocation130_spill] sm:$0xff] %v2272_v40  ;;  %v480_v44 = vpop.permute.xlu1 %479  ;;  %v474_v58 = vpop.permute.xlu0 %473  ;;  %3413 = vst [vmem:[#allocation131_spill] sm:$0xff] %v2274_v18  ;;  %v2338_v26 = vmul.f32 %v3192_v49, %v2234_v42  ;;  %v2340_v29 = vld [vmem:[#allocation4 + $0x6] sm:$0xff]  ;;  %v2350_v21 = vmul.f32 %v3197_v25, %v2276_v13  ;;  %v2360_v49 = vmul.f32 %v3199_v32, %v2276_v13  ;;  %v3463_v17 = vstv %s3372_s15  ;;  %s3474_s15 = sld [smem:[#allocation81_spill]] }
 0x12e   : > { %482 = vst.msk [vmem:[#allocation4 + $0x27] sm:$0x1] %vm330_vm1, %v480_v44  ;;  %476 = vst.msk [vmem:[#allocation4 + $0xf] sm:$0x1] %vm330_vm1, %v474_v58  ;;  %v2323_v44 = vmul.f32 %v3187_v27, %v2234_v42  ;;  %v2328_v58 = vmul.f32 %v3190_v54, %v2234_v42  ;;  %v2345_v27 = vmul.f32 %v3195_v24, %v2274_v18  ;;  %v3438_v42 = vstv %s3429_s4  ;;  %s3536_s4 = sld [smem:[#allocation106_spill]] }
 0x12f   : > { %3419 = vst [vmem:[#allocation133_spill] sm:$0xff] %v2313_v23  ;;  %3426 = vst [vmem:[#allocation136_spill] sm:$0xff] %v2333_v2  ;;  %v2355_v54 = vmul.f32 %v3198_v31, %v2274_v18  ;;  %v2371_v31 = vmul.f32 %v3200_v35, %v2274_v18  ;;  %v2376_v32 = vmul.f32 %v3201_v36, %v2276_v13 }
 0x130   : > { %3424 = vst [vmem:[#allocation135_spill] sm:$0xff] %v2328_v58  ;;  %3427 = vst [vmem:[#allocation137_spill] sm:$0xff] %v2338_v26  ;;  %v2381_v1 = vmul.f32 %v3203_v62, %v2274_v18  ;;  %v2386_v0 = vmul.f32 %v3205_v63, %v2276_v13  ;;  %v2403_v63 = vmul.f32 %v3440_v7, %v2274_v18  ;;  %v3450_v7 = vstv %s2065_s29  ;;  %s3457_s29 = sld [smem:[#allocation70_spill]] }
 0x131   : > { %v2362_v50 = vld [vmem:[#allocation4] sm:$0xff]  ;;  %v492_v25 = vpop.permute.xlu1 %491  ;;  %v486_v39 = vpop.permute.xlu0 %485  ;;  %v2426_v30 = vmul.f32 %v3450_v7, %v2274_v18 }
 0x132   : > { %v2364_v24 = vld [vmem:[#allocation4 + $0x1] sm:$0xff]  ;;  %3435 = vst [vmem:[#allocation138_spill] sm:$0xff] %v2381_v1  ;;  %3436 = vst [vmem:[#allocation139_spill] sm:$0xff] %v2386_v0  ;;  %v674_v36 = vmul.f32 %v3207_v38, %v2362_v50  ;;  %v720_v62 = vmul.f32 %v3438_v42, %v2362_v50  ;;  %v3448_v38 = vstv %s3432_s23  ;;  %v3449_v42 = vstv %s3433_s13  ;;  %s3461_s13 = sld [smem:[#allocation71_spill]] }
 0x133   : > { %v2366_v4 = vld [vmem:[#allocation4 + $0x2] sm:$0xff]  ;;  %494 = vst.msk [vmem:[#allocation4 + $0x28] sm:$0x1] %vm330_vm1, %v492_v25  ;;  %488 = vst.msk [vmem:[#allocation4 + $0x10] sm:$0x1] %vm330_vm1, %v486_v39  ;;  %v3443_v25 = vstv %s3430_s0  ;;  %v679_v33 = vmul.f32 %v3446_v48, %v2364_v24  ;;  %v2416_v19 = vmul.f32 %v3448_v38, %v2340_v29  ;;  %v2421_v26 = vmul.f32 %v3449_v42, %v2340_v29  ;;  %s3454_s0 = sld [smem:[#allocation73_spill]] }
 0x134   : > { %v2390_v35 = vld [vmem:[#allocation4 + $0x3] sm:$0xff]  ;;  %3442 = vst [vmem:[#allocation140_spill] sm:$0xff] %v2403_v63  ;;  %v2408_v39 = vmul.f32 %v3443_v25, %v2276_v13  ;;  %3451 = vst [vmem:[#allocation142_spill] sm:$0xff] %v2426_v30  ;;  %v677_v51 = vadd.f32 %v2153_v57, %v674_v36  ;;  %v3452_v25 = vstv %s3434_s7  ;;  %v723_v48 = vadd.f32 %v2157_v61, %v720_v62 }
 0x135   : > { %v2392_v43 = vld [vmem:[#allocation4 + $0x4] sm:$0xff]  ;;  %v3453_v38 = vstv %s3437_s11  ;;  %v504_v7 = vpop.permute.xlu1 %503  ;;  %v498_v18 = vpop.permute.xlu0 %497  ;;  %v3455_v36 = vstv %s3439_s30  ;;  %v3458_v62 = vstv %s3444_s16  ;;  %s3481_s11 = sld [smem:[#allocation60_spill]] }
 0x136   : > { %3445 = vst [vmem:[#allocation141_spill] sm:$0xff] %v2408_v39  ;;  %v685_v39 = vmul.f32 %v3452_v25, %v2366_v4  ;;  %v725_v40 = vmul.f32 %v3453_v38, %v2364_v24  ;;  %v2436_v2 = vld [vmem:[#allocation4 + $0x20] sm:$0xff]  ;;  %v2438_v42 = vld [vmem:[#allocation4 + $0x8] sm:$0xff]  ;;  %v691_v57 = vmul.f32 %v3455_v36, %v2390_v35  ;;  %v3456_v25 = vstv %s3441_s8  ;;  %506 = vst.msk [vmem:[#allocation4 + $0x29] sm:$0x1] %vm330_vm1, %v504_v7 }
 0x137   : > { %v697_v30 = vmul.f32 %v3456_v25, %v2392_v43  ;;  %v731_v61 = vmul.f32 %v3458_v62, %v2366_v4  ;;  %v3460_v38 = vstv %s3447_s19  ;;  %500 = vst.msk [vmem:[#allocation4 + $0x11] sm:$0x1] %vm330_vm1, %v498_v18  ;;  %v680_v14 = vadd.f32 %v679_v33, %v677_v51 }
 0x138   : > { %v766_v63 = vmul.f32 %v3460_v38, %v2362_v50  ;;  %v726_v23 = vadd.f32 %v725_v40, %v723_v48  ;;  %v1000_v36 = vmul.f32 %v2438_v42, %v3462_v9  ;;  %v1001_v25 = vmul.f32 %v2436_v2, %v3463_v17 }
 0x139   : > { %v3466_v34 = vstv %s3454_s0  ;;  %v1032_v7 = vmul.f32 %v2438_v42, %v3467_v53  ;;  %v3468_v18 = vstv %s3373_s5  ;;  %v683_v51 = vadd.f32 %v2184_v8, %v680_v14  ;;  %v516_v53 = vpop.permute.xlu1 %515  ;;  %v510_v0 = vpop.permute.xlu0 %509  ;;  %s3555_s5 = sld [smem:[#allocation108_spill]] }
 0x13a   : > { %v769_v62 = vadd.f32 %v2161_v56, %v766_v63  ;;  %v771_v38 = vmul.f32 %v3466_v34, %v2364_v24  ;;  %v1033_v33 = vmul.f32 %v2436_v2, %v3468_v18  ;;  %v729_v9 = vadd.f32 %v2188_v41, %v726_v23  ;;  %v2478_v63 = vld [vmem:[#allocation4 + $0x21] sm:$0xff]  ;;  %v2480_v34 = vld [vmem:[#allocation4 + $0x9] sm:$0xff]  ;;  %518 = vst.msk [vmem:[#allocation4 + $0x2a] sm:$0x1] %vm330_vm1, %v516_v53 }
 0x13b   : > { %v3469_v40 = vstv %s3457_s29  ;;  %v3470_v48 = vstv %s3459_s14  ;;  %v3471_v18 = vstv %s3461_s13  ;;  %v3472_v14 = vstv %s3464_s28  ;;  %512 = vst.msk [vmem:[#allocation4 + $0x12] sm:$0x1] %vm330_vm1, %v510_v0 }
 0x13c   : > { %v737_v17 = vmul.f32 %v3469_v40, %v2390_v35  ;;  %v812_v56 = vmul.f32 %v3470_v48, %v2362_v50  ;;  %v743_v6 = vmul.f32 %v3471_v18, %v2392_v43  ;;  %v772_v8 = vadd.f32 %v771_v38, %v769_v62 }
 0x13d   : > { %v777_v23 = vmul.f32 %v3472_v14, %v2366_v4  ;;  %v3473_v41 = vstv %s3465_s6  ;;  %v686_v48 = vadd.f32 %v685_v39, %v683_v51  ;;  %v732_v58 = vadd.f32 %v731_v61, %v729_v9 }
 0x13e   : > { %v783_v40 = vmul.f32 %v3473_v41, %v2390_v35  ;;  %v1002_v1 = vadd.f32 %v1001_v25, %v1000_v36  ;;  %v1003_v18 = vmul.f32 %v2480_v34, %v3475_v52  ;;  %v775_v62 = vadd.f32 %v2192_v55, %v772_v8  ;;  %v2506_v25 = vld [vmem:[#allocation4 + $0x22] sm:$0xff]  ;;  %v2508_v52 = vld [vmem:[#allocation4 + $0xa] sm:$0xff] }
 0x13f   : > { %v1034_v38 = vadd.f32 %v1033_v33, %v1032_v7  ;;  %v1035_v14 = vmul.f32 %v2480_v34, %v3476_v5  ;;  %v815_v41 = vadd.f32 %v2166_v3, %v812_v56  ;;  %v689_v53 = vadd.f32 %v2200_v15, %v686_v48 }
 0x140   : > { %v735_v0 = vadd.f32 %v2220_v12, %v732_v58  ;;  %v1004_v39 = vadd.f32 %v1003_v18, %v1002_v1  ;;  %v3477_v61 = vstv %s3377_s21  ;;  %v778_v55 = vadd.f32 %v777_v23, %v775_v62  ;;  %s1677_s21 = smov 125  }
 0x141   : > { %v1005_v36 = vmul.f32 %v2478_v63, %v3477_v61  ;;  %v1036_v7 = vadd.f32 %v1035_v14, %v1034_v38  ;;  %v3478_v33 = vstv %s3378_s25  ;;  %v3479_v3 = vstv %s3474_s15  ;;  %s3484_s25 = sld [smem:[#allocation82_spill]] }
 0x142   : > { %v1037_v5 = vmul.f32 %v2478_v63, %v3478_v33  ;;  %v817_v15 = vmul.f32 %v3479_v3, %v2364_v24  ;;  %v692_v12 = vadd.f32 %v691_v57, %v689_v53  ;;  %v738_v1 = vadd.f32 %v737_v17, %v735_v0  ;;  %v2528_v53 = vld [vmem:[#allocation4 + $0xb] sm:$0xff] }
 0x143   : > { %v1006_v58 = vadd.f32 %v1005_v36, %v1004_v39  ;;  %v3482_v51 = vstv %s3434_s7  ;;  %v781_v56 = vadd.f32 %v2224_v59, %v778_v55  ;;  %v3483_v48 = vstv %s3444_s16  ;;  %s3486_s7 = sld [smem:[#allocation83_spill]]  ;;  %v2538_v55 = vld [vmem:[#allocation4 + $0xc] sm:$0xff]  ;;  %s3507_s16 = sld [smem:[#allocation31_spill]] }
 0x144   : > { %v1007_v9 = vmul.f32 %v2508_v52, %v3482_v51  ;;  %v1038_v8 = vadd.f32 %v1037_v5, %v1036_v7  ;;  %v1039_v23 = vmul.f32 %v2508_v52, %v3483_v48  ;;  %v818_v18 = vadd.f32 %v817_v15, %v815_v41  ;;  %v2540_v7 = vld [vmem:[#allocation4 + $0x23] sm:$0xff] }
 0x145   : > { %v695_v62 = vadd.f32 %v2239_v60, %v692_v12  ;;  %v741_v38 = vadd.f32 %v2244_v45, %v738_v1  ;;  %v3485_v17 = vstv %s3381_s12  ;;  %v784_v59 = vadd.f32 %v783_v40, %v781_v56  ;;  %v2557_v56 = vld [vmem:[#allocation4 + $0xd] sm:$0xff]  ;;  %s3522_s12 = sld [smem:[#allocation38_spill]] }
 0x146   : > { %v1008_v57 = vadd.f32 %v1007_v9, %v1006_v58  ;;  %v1009_v14 = vmul.f32 %v2506_v25, %v3485_v17  ;;  %v3487_v0 = vstv %s3480_s24  ;;  %v3488_v61 = vstv %s3481_s11 }
 0x147   : > { %v789_v39 = vmul.f32 %v3487_v0, %v2392_v43  ;;  %v2536_v41 = vmul.f32 %v3488_v61, %v2340_v29  ;;  %v1040_v36 = vadd.f32 %v1039_v23, %v1038_v8  ;;  %v698_v60 = vadd.f32 %v697_v30, %v695_v62  ;;  %v2559_v8 = vld [vmem:[#allocation4 + $0x24] sm:$0xff]  ;;  %v2573_v0 = vld [vmem:[#allocation4 + $0xe] sm:$0xff] }
 0x148   : > { %v744_v45 = vadd.f32 %v743_v6, %v741_v38  ;;  %v1010_v33 = vadd.f32 %v1009_v14, %v1008_v57  ;;  %v3489_v5 = vstv %s3439_s30  ;;  %v3490_v3 = vstv %s3385_s2  ;;  %v2575_v61 = vld [vmem:[#allocation4 + $0x25] sm:$0xff]  ;;  %s3505_s2 = sld [smem:[#allocation45_spill]]  ;;  %s3517_s30 = sld [smem:[#allocation34_spill]] }
 0x149   : > { %v1011_v40 = vmul.f32 %v2528_v53, %v3489_v5  ;;  %v1041_v15 = vmul.f32 %v2506_v25, %v3490_v3  ;;  %v821_v12 = vadd.f32 %v2196_v11, %v818_v18  ;;  %v3491_v1 = vstv %s3484_s25 }
 0x14a   : > { %v823_v58 = vmul.f32 %v3491_v1, %v2366_v4  ;;  %v3492_v30 = vstv %s3486_s7  ;;  %v701_v51 = vadd.f32 %v2281_v37, %v698_v60  ;;  %v747_v9 = vadd.f32 %v2286_v46, %v744_v45  ;;  %v2577_v60 = vld [vmem:[#allocation4 + $0x26] sm:$0xff] }
 0x14b   : > { %v829_v6 = vmul.f32 %v3492_v30, %v2390_v35  ;;  %v1012_v48 = vadd.f32 %v1011_v40, %v1010_v33  ;;  %v3493_v23 = vstv %s3391_s20  ;;  %v3494_v18 = vstv %s3441_s8  ;;  %s3519_s8 = sld [smem:[#allocation52_spill]]  ;;  %s3543_s20 = sld [smem:[#allocation99_spill]] }
 0x14c   : > { %v1013_v11 = vmul.f32 %v2540_v7, %v3493_v23  ;;  %v1015_v62 = vmul.f32 %v2538_v55, %v3494_v18  ;;  %v787_v38 = vadd.f32 %v2257_v10, %v784_v59  ;;  %v1042_v37 = vadd.f32 %v1041_v15, %v1040_v36 }
 0x14d   : > { %v3495_v57 = vstv %s3447_s19  ;;  %v704_v17 = vadd.f32 %v2345_v27, %v701_v51  ;;  %v750_v14 = vadd.f32 %v2355_v54, %v747_v9  ;;  %v3496_v33 = vstv %s3457_s29  ;;  %s3513_s19 = sld [smem:[#allocation58_spill]]  ;;  %s3529_s29 = sld [smem:[#allocation35_spill]] }
 0x14e   : > { %v1064_v46 = vmul.f32 %v2438_v42, %v3495_v57  ;;  %v1014_v45 = vadd.f32 %v1013_v11, %v1012_v48  ;;  %v1043_v10 = vmul.f32 %v2528_v53, %v3496_v33  ;;  %v3497_v59 = vstv %s3399_s9  ;;  %s1676_s9 = smov 126  }
 0x14f   : > { %v1017_v36 = vmul.f32 %v2559_v8, %v3497_v59  ;;  %v3498_v5 = vstv %s3414_s10  ;;  %v790_v54 = vadd.f32 %v789_v39, %v787_v38  ;;  %v3499_v40 = vstv %s3392_s1  ;;  %s3521_s10 = sld [smem:[#allocation96_spill]]  ;;  %s3527_s1 = sld [smem:[#allocation98_spill]] }
 0x150   : > { %v1019_v27 = vmul.f32 %v2557_v56, %v3498_v5  ;;  %v1045_v3 = vmul.f32 %v2540_v7, %v3499_v40  ;;  %v707_v15 = vadd.f32 %v2303_v20, %v704_v17  ;;  %v753_v1 = vadd.f32 %v2308_v22, %v750_v14 }
 0x151   : > { %v1016_v30 = vadd.f32 %v1015_v62, %v1014_v45  ;;  %v1044_v51 = vadd.f32 %v1043_v10, %v1042_v37  ;;  %v3500_v9 = vstv %s3406_s18  ;;  %v3501_v23 = vstv %s3432_s23  ;;  %s3510_s18 = sld [smem:[#allocation107_spill]]  ;;  %s3537_s23 = sld [smem:[#allocation54_spill]] }
 0x152   : > { %v1021_v48 = vmul.f32 %v2575_v61, %v3500_v9  ;;  %v1023_v11 = vmul.f32 %v2573_v0, %v3501_v23  ;;  %v3502_v18 = vstv %s3415_s27  ;;  %v793_v39 = vadd.f32 %v2291_v28, %v790_v54  ;;  %s3552_s27 = sld [smem:[#allocation100_spill]] }
 0x153   : > { %v1025_v57 = vmul.f32 %v2577_v60, %v3502_v18  ;;  %v710_v38 = vadd.f32 %v2416_v19, %v707_v15  ;;  %v1018_v33 = vadd.f32 %v1017_v36, %v1016_v30  ;;  %v1046_v20 = vadd.f32 %v1045_v3, %v1044_v51 }
 0x154   : > { %v3503_v17 = vstv %s3461_s13  ;;  %v796_v62 = vadd.f32 %v2371_v31, %v793_v39  ;;  %v3504_v37 = vstv %s3400_s17  ;;  %v824_v45 = vadd.f32 %v823_v58, %v821_v12  ;;  %s3509_s17 = sld [smem:[#allocation84_spill]]  ;;  %s3523_s13 = sld [smem:[#allocation94_spill]] }
 0x155   : > { %v1047_v22 = vmul.f32 %v2538_v55, %v3503_v17  ;;  %v1049_v14 = vmul.f32 %v2559_v8, %v3504_v37  ;;  %v3506_v10 = vstv %s3374_s3  ;;  %v713_v28 = vadd.f32 %v2350_v21, %v710_v38  ;;  %s1675_s3 = smov 127  }
 0x156   : > { %v1065_v59 = vmul.f32 %v2436_v2, %v3506_v10  ;;  %v756_v19 = vadd.f32 %v2421_v26, %v753_v1  ;;  %v1020_v36 = vadd.f32 %v1019_v27, %v1018_v33  ;;  %v799_v54 = vadd.f32 %v2323_v44, %v796_v62 }
 0x157   : > { %v1048_v5 = vadd.f32 %v1047_v22, %v1046_v20  ;;  %v827_v31 = vadd.f32 %v2228_v47, %v824_v45  ;;  %v3508_v3 = vstv %s3454_s0  ;;  %715 = vrot.lane.b32.xlu0 %v713_v28, %s1675_s3  ;;  %v3511_v58 = vstv %s3416_s22  ;;  %s3515_s0 = sld [smem:[#allocation78_spill]]  ;;  %s3544_s22 = sld [smem:[#allocation39_spill]] }
 0x158   : > { %v1066_v40 = vadd.f32 %v1065_v59, %v1064_v46  ;;  %v1067_v15 = vmul.f32 %v2480_v34, %v3508_v3  ;;  %v1022_v12 = vadd.f32 %v1021_v48, %v1020_v36  ;;  %v1051_v26 = vmul.f32 %v2557_v56, %v3511_v58  ;;  %v3532_v3 = vld [vmem:[#allocation132_spill] sm:$0xff] }
 0x159   : > { %v1050_v21 = vadd.f32 %v1049_v14, %v1048_v5  ;;  %v3512_v1 = vstv %s3505_s2  ;;  %v830_v30 = vadd.f32 %v829_v6, %v827_v31  ;;  %v3514_v47 = vstv %s3507_s16  ;;  %s3567_s2 = sld [smem:[#allocation47_spill]]  ;;  %s3574_s16 = sld [smem:[#allocation53_spill]] }
 0x15a   : > { %v1053_v27 = vmul.f32 %v2575_v61, %v3512_v1  ;;  %v1068_v44 = vadd.f32 %v1067_v15, %v1066_v40  ;;  %v1069_v46 = vmul.f32 %v2478_v63, %v3514_v47  ;;  %v3516_v51 = vstv %s3464_s28  ;;  %s3540_s28 = sld [smem:[#allocation49_spill]] }
 0x15b   : > { %v1071_v9 = vmul.f32 %v2508_v52, %v3516_v51  ;;  %v759_v23 = vadd.f32 %v2360_v49, %v756_v19  ;;  %v1024_v48 = vadd.f32 %v1023_v11, %v1022_v12  ;;  %v802_v18 = vadd.f32 %v2536_v41, %v799_v54 }
 0x15c   : > { %v1052_v39 = vadd.f32 %v1051_v26, %v1050_v21  ;;  %v833_v38 = vadd.f32 %v2262_v16, %v830_v30  ;;  %v3518_v6 = vstv %s3509_s17  ;;  %v1070_v20 = vadd.f32 %v1069_v46, %v1068_v44 }
 0x15d   : > { %v835_v33 = vmul.f32 %v3518_v6, %v2392_v43  ;;  %v3520_v17 = vstv %s3510_s18  ;;  %761 = vrot.lane.b32.xlu0 %v759_v23, %s1676_s9  ;;  %v1026_v49 = vadd.f32 %v1025_v57, %v1024_v48  ;;  %v3524_v41 = vstv %s3513_s19  ;;  %s3583_s19 = sld [smem:[#allocation77_spill]] }
 0x15e   : > { %v2642_v22 = vmul.f32 %v3520_v17, %v2276_v13  ;;  %v1054_v11 = vadd.f32 %v1053_v27, %v1052_v39  ;;  %v1055_v62 = vmul.f32 %v2573_v0, %v3524_v41  ;;  %v3525_v16 = vstv %s3515_s0  ;;  %v3538_v27 = vld [vmem:[#allocation117_spill] sm:$0xff] }
 0x15f   : > { %v847_v37 = vmul.f32 %v3525_v16, %v2340_v29  ;;  %v836_v14 = vadd.f32 %v835_v33, %v833_v38  ;;  %v1072_v45 = vadd.f32 %v1071_v9, %v1070_v20  ;;  %v3526_v10 = vstv %s3517_s30  ;;  %1028 = vrot.lane.b32.xlu1 %v1026_v49, %s1675_s3  ;;  %v3542_v9 = vld [vmem:[#allocation138_spill] sm:$0xff]  ;;  %v3551_v16 = vld [vmem:[#allocation135_spill] sm:$0xff]  ;;  %s3577_s3 = sld [smem:[#allocation110_spill]]  ;;  %s3587_s30 = sld [smem:[#allocation59_spill]] }
 0x160   : > { %v1073_v59 = vmul.f32 %v2506_v25, %v3526_v10  ;;  %v3528_v28 = vstv %s3465_s6  ;;  %v805_v57 = vadd.f32 %v2376_v32, %v802_v18  ;;  %v1056_v36 = vadd.f32 %v1055_v62, %v1054_v11  ;;  %s3558_s6 = sld [smem:[#allocation101_spill]] }
 0x161   : > { %v1075_v19 = vmul.f32 %v2528_v53, %v3528_v28  ;;  %v3530_v5 = vstv %s3519_s8  ;;  %v3531_v31 = vstv %s3521_s10  ;;  %v839_v15 = vadd.f32 %v3532_v3, %v836_v14  ;;  %s3588_s8 = sld [smem:[#allocation111_spill]] }
 0x162   : > { %v1057_v54 = vmul.f32 %v2577_v60, %v3530_v5  ;;  %v858_v40 = vmul.f32 %v3531_v31, %v2362_v50  ;;  %v1074_v12 = vadd.f32 %v1073_v59, %v1072_v45  ;;  %v3534_v21 = vstv %s3522_s12  ;;  %807 = vrot.lane.b32.xlu0 %v805_v57, %s1677_s21  ;;  %s3603_s12 = sld [smem:[#allocation85_spill]] }
 0x163   : > { %v1077_v58 = vmul.f32 %v2540_v7, %v3534_v21  ;;  %v3535_v26 = vstv %s3523_s13  ;;  %v3539_v44 = vstv %s3527_s1  ;;  %v3541_v46 = vstv %s3459_s14  ;;  %s3549_s14 = sld [smem:[#allocation57_spill]] }
 0x164   : > { %v2670_v32 = vmul.f32 %v3535_v26, %v2340_v29  ;;  %v1058_v1 = vadd.f32 %v1057_v54, %v1056_v36  ;;  %v861_v30 = vadd.f32 %v3538_v27, %v858_v40  ;;  %v863_v47 = vmul.f32 %v3539_v44, %v2364_v24  ;;  %v3556_v36 = vld [vmem:[#allocation121_spill] sm:$0xff] }
 0x165   : > { %v1096_v51 = vmul.f32 %v2438_v42, %v3541_v46  ;;  %v842_v23 = vadd.f32 %v3542_v9, %v839_v15  ;;  %v1076_v48 = vadd.f32 %v1075_v19, %v1074_v12  ;;  %v3545_v18 = vstv %s3529_s29  ;;  %v3566_v9 = vld [vmem:[#allocation139_spill] sm:$0xff]  ;;  %s3609_s29 = sld [smem:[#allocation79_spill]] }
 0x166   : > { %v1097_v39 = vmul.f32 %v2436_v2, %v3545_v18  ;;  %v3546_v38 = vstv %s3474_s15  ;;  %1060 = vrot.lane.b32.xlu1 %v1058_v1, %s1676_s9  ;;  %v3547_v33 = vstv %s3480_s24  ;;  %v3548_v17 = vstv %s3533_s26  ;;  %s3560_s15 = sld [smem:[#allocation43_spill]]  ;;  %s3564_s24 = sld [smem:[#allocation109_spill]] }
 0x167   : > { %v1099_v6 = vmul.f32 %v2480_v34, %v3546_v38  ;;  %v1079_v20 = vmul.f32 %v2538_v55, %v3547_v33  ;;  %v1081_v49 = vmul.f32 %v2559_v8, %v3548_v17  ;;  %v864_v11 = vadd.f32 %v863_v47, %v861_v30  ;;  %v3569_v38 = vld [vmem:[#allocation125_spill] sm:$0xff]  ;;  %s3599_s9 = sld [smem:[#allocation112_spill]]  ;;  %s3613_s26 = sld [smem:[#allocation86_spill]] }
 0x168   : > { %v3550_v41 = vstv %s3536_s4  ;;  %v845_v14 = vadd.f32 %v3551_v16, %v842_v23  ;;  %v1078_v45 = vadd.f32 %v1077_v58, %v1076_v48  ;;  %v3553_v10 = vstv %s3537_s23  ;;  %s3621_s23 = sld [smem:[#allocation113_spill]] }
 0x169   : > { %v2696_v62 = vmul.f32 %v3550_v41, %v2340_v29  ;;  %v1083_v59 = vmul.f32 %v2557_v56, %v3553_v10  ;;  %v1098_v28 = vadd.f32 %v1097_v39, %v1096_v51  ;;  %v3554_v19 = vstv %s3540_s28  ;;  %s3624_s28 = sld [smem:[#allocation87_spill]] }
 0x16a   : > { %v1085_v57 = vmul.f32 %v2575_v61, %v3554_v19  ;;  %v867_v5 = vadd.f32 %v3556_v36, %v864_v11  ;;  %v3557_v54 = vstv %s3543_s20  ;;  %v3559_v40 = vstv %s3544_s22  ;;  %s1679_s22 = smov 123  }
 0x16b   : > { %v869_v31 = vmul.f32 %v3557_v54, %v2366_v4  ;;  %v1101_v3 = vmul.f32 %v2478_v63, %v3559_v40  ;;  %v848_v15 = vadd.f32 %v847_v37, %v845_v14  ;;  %v1080_v12 = vadd.f32 %v1079_v20, %v1078_v45  ;;  %v3575_v45 = vld [vmem:[#allocation118_spill] sm:$0xff] }
 0x16c   : > { %v1100_v21 = vadd.f32 %v1099_v6, %v1098_v28  ;;  %v3561_v58 = vstv %s3484_s25  ;;  %v3562_v1 = vstv %s3481_s11  ;;  %v3563_v30 = vstv %s3549_s14  ;;  %s3571_s11 = sld [smem:[#allocation46_spill]]  ;;  %s1678_s25 = smov 124  }
 0x16d   : > { %v1103_v26 = vmul.f32 %v2508_v52, %v3561_v58  ;;  %v1087_v27 = vmul.f32 %v2573_v0, %v3562_v1  ;;  %v1089_v44 = vmul.f32 %v2577_v60, %v3563_v30  ;;  %v870_v47 = vadd.f32 %v869_v31, %v867_v5  ;;  %v3584_v1 = vld [vmem:[#allocation129_spill] sm:$0xff]  ;;  %s3630_s14 = sld [smem:[#allocation93_spill]] }
 0x16e   : > { %v3565_v46 = vstv %s3552_s27  ;;  %v851_v23 = vadd.f32 %v3566_v9, %v848_v15  ;;  %v1082_v37 = vadd.f32 %v1081_v49, %v1080_v12  ;;  %v1102_v48 = vadd.f32 %v1101_v3, %v1100_v21 }
 0x16f   : > { %v875_v51 = vmul.f32 %v3565_v46, %v2390_v35  ;;  %v3568_v18 = vstv %s3555_s5  ;;  %v873_v6 = vadd.f32 %v3569_v38, %v870_v47  ;;  %v3570_v33 = vstv %s3558_s6 }
 0x170   : > { %v904_v39 = vmul.f32 %v3568_v18, %v2362_v50  ;;  %v881_v20 = vmul.f32 %v3570_v33, %v2392_v43  ;;  %v3572_v17 = vstv %s3560_s15  ;;  %v3573_v41 = vstv %s3486_s7  ;;  %853 = vrot.lane.b32.xlu0 %v851_v23, %s1678_s25  ;;  %s3581_s7 = sld [smem:[#allocation55_spill]]  ;;  %s2860_s15 = sld [smem:[#allocation6 + $0x1c]] }
 0x171   : > { %v1105_v11 = vmul.f32 %v2506_v25, %v3572_v17  ;;  %v1107_v16 = vmul.f32 %v2528_v53, %v3573_v41  ;;  %v1084_v49 = vadd.f32 %v1083_v59, %v1082_v37  ;;  %v1104_v14 = vadd.f32 %v1103_v26, %v1102_v48 }
 0x172   : > { %v907_v10 = vadd.f32 %v3575_v45, %v904_v39  ;;  %v3576_v28 = vstv %s3564_s24  ;;  %v876_v36 = vadd.f32 %v875_v51, %v873_v6  ;;  %v3578_v5 = vstv %s3521_s10  ;;  %s3591_s10 = sld [smem:[#allocation61_spill]] }
 0x173   : > { %v909_v19 = vmul.f32 %v3576_v28, %v2364_v24  ;;  %v1128_v54 = vmul.f32 %v2438_v42, %v3578_v5  ;;  %v3579_v31 = vstv %s3567_s2  ;;  %v3580_v3 = vstv %s3527_s1  ;;  %v3596_v28 = vld [vmem:[#allocation133_spill] sm:$0xff]  ;;  %s3605_s1 = sld [smem:[#allocation91_spill]]  ;;  %s3648_s2 = sld [smem:[#allocation97_spill]] }
 0x174   : > { %v1129_v40 = vmul.f32 %v2436_v2, %v3579_v31  ;;  %v1131_v15 = vmul.f32 %v2480_v34, %v3580_v3  ;;  %v1086_v59 = vadd.f32 %v1085_v57, %v1084_v49  ;;  %v1106_v12 = vadd.f32 %v1105_v11, %v1104_v14  ;;  %v3589_v57 = vld [vmem:[#allocation122_spill] sm:$0xff] }
 0x175   : > { %v3582_v21 = vstv %s3571_s11  ;;  %v910_v26 = vadd.f32 %v909_v19, %v907_v10  ;;  %v879_v30 = vadd.f32 %v3584_v1, %v876_v36  ;;  %v3585_v47 = vstv %s3509_s17  ;;  %s3594_s17 = sld [smem:[#allocation90_spill]]  ;;  %s2878_s11 = sld [smem:[#allocation6 + $0x4d]] }
 0x176   : > { %v1109_v58 = vmul.f32 %v2540_v7, %v3582_v21  ;;  %v1111_v46 = vmul.f32 %v2538_v55, %v3585_v47  ;;  %v3586_v51 = vstv %s3574_s16  ;;  %v1130_v23 = vadd.f32 %v1129_v40, %v1128_v54  ;;  %v3600_v40 = vld [vmem:[#allocation127_spill] sm:$0xff]  ;;  %s2885_s16 = sld [smem:[#allocation6 + $0x23]] }
 0x177   : > { %v1113_v9 = vmul.f32 %v2559_v8, %v3586_v51  ;;  %v1088_v37 = vadd.f32 %v1087_v27, %v1086_v59  ;;  %v1108_v48 = vadd.f32 %v1107_v16, %v1106_v12  ;;  %v913_v18 = vadd.f32 %v3589_v57, %v910_v26 }
 0x178   : > { %v3590_v39 = vstv %s3577_s3  ;;  %v882_v6 = vadd.f32 %v881_v20, %v879_v30  ;;  %v1132_v33 = vadd.f32 %v1131_v15, %v1130_v23  ;;  %v3592_v17 = vstv %s3581_s7  ;;  %s3657_s7 = sld [smem:[#allocation105_spill]] }
 0x179   : > { %v915_v38 = vmul.f32 %v3590_v39, %v2366_v4  ;;  %v1133_v11 = vmul.f32 %v2478_v63, %v3592_v17  ;;  %v3593_v41 = vstv %s3543_s20  ;;  %v1090_v14 = vadd.f32 %v1089_v44, %v1088_v37  ;;  %s3629_s20 = sld [smem:[#allocation114_spill]] }
 0x17a   : > { %v1135_v49 = vmul.f32 %v2508_v52, %v3593_v41  ;;  %v1110_v27 = vadd.f32 %v1109_v58, %v1108_v48  ;;  %v3595_v16 = vstv %s3583_s19  ;;  %v885_v19 = vadd.f32 %v3596_v28, %v882_v6  ;;  %v3604_v58 = vld [vmem:[#allocation140_spill] sm:$0xff]  ;;  %s1680_s19 = smov 122  }
 0x17b   : > { %v1115_v45 = vmul.f32 %v2557_v56, %v3595_v16  ;;  %v916_v10 = vadd.f32 %v915_v38, %v913_v18  ;;  %v3597_v20 = vstv %s3587_s30  ;;  %v3598_v5 = vstv %s3588_s8  ;;  %1092 = vrot.lane.b32.xlu1 %v1090_v14, %s1677_s21  ;;  %v3611_v38 = vld [vmem:[#allocation136_spill] sm:$0xff]  ;;  %v3614_v14 = vld [vmem:[#allocation130_spill] sm:$0xff]  ;;  %s3618_s21 = sld [smem:[#allocation92_spill]]  ;;  %s3659_s30 = sld [smem:[#allocation102_spill]] }
 0x17c   : > { %v1117_v36 = vmul.f32 %v2575_v61, %v3597_v20  ;;  %v921_v54 = vmul.f32 %v3598_v5, %v2390_v35  ;;  %v1134_v31 = vadd.f32 %v1133_v11, %v1132_v33  ;;  %v1112_v44 = vadd.f32 %v1111_v46, %v1110_v27 }
 0x17d   : > { %v919_v3 = vadd.f32 %v3600_v40, %v916_v10  ;;  %v3601_v15 = vstv %s3591_s10  ;;  %v3602_v12 = vstv %s3552_s27  ;;  %v888_v26 = vadd.f32 %v3604_v58, %v885_v19  ;;  %s3633_s27 = sld [smem:[#allocation95_spill]]  ;;  %s2907_s10 = sld [smem:[#allocation6 + $0x2a]] }
 0x17e   : > { %v1137_v59 = vmul.f32 %v2506_v25, %v3601_v15  ;;  %v1139_v21 = vmul.f32 %v2528_v53, %v3602_v12  ;;  %v1136_v1 = vadd.f32 %v1135_v49, %v1134_v31  ;;  %v3606_v30 = vstv %s3555_s5  ;;  %v3623_v12 = vld [vmem:[#allocation141_spill] sm:$0xff]  ;;  %s2849_s5 = sld [smem:[#allocation6 + $0x46]] }
 0x17f   : > { %v1160_v47 = vmul.f32 %v2438_v42, %v3606_v30  ;;  %v3607_v51 = vstv %s3594_s17  ;;  %v1114_v46 = vadd.f32 %v1113_v9, %v1112_v44  ;;  %v3608_v37 = vstv %s3515_s0  ;;  %s3617_s0 = sld [smem:[#allocation88_spill]]  ;;  %s2921_s17 = sld [smem:[#allocation6 + $0x5b]] }
 0x180   : > { %v1161_v23 = vmul.f32 %v2436_v2, %v3607_v51  ;;  %v1119_v48 = vmul.f32 %v2573_v0, %v3608_v37  ;;  %v922_v57 = vadd.f32 %v921_v54, %v919_v3  ;;  %v3610_v18 = vstv %s3564_s24  ;;  %s3645_s24 = sld [smem:[#allocation103_spill]] }
 0x181   : > { %v1163_v39 = vmul.f32 %v2480_v34, %v3610_v18  ;;  %v891_v6 = vadd.f32 %v3611_v38, %v888_v26  ;;  %v3612_v33 = vstv %s3599_s9  ;;  %v1138_v11 = vadd.f32 %v1137_v59, %v1136_v1 }
 0x182   : > { %v927_v17 = vmul.f32 %v3612_v33, %v2392_v43  ;;  %v1162_v41 = vadd.f32 %v1161_v23, %v1160_v47  ;;  %v1116_v49 = vadd.f32 %v1115_v45, %v1114_v46  ;;  %v925_v9 = vadd.f32 %v3614_v14, %v922_v57 }
 0x183   : > { %v3615_v27 = vstv %s3603_s12  ;;  %v3616_v10 = vstv %s3605_s1  ;;  %v894_v19 = vadd.f32 %v2670_v32, %v891_v6  ;;  %v1140_v20 = vadd.f32 %v1139_v21, %v1138_v11  ;;  %s3673_s1 = sld [smem:[#allocation23_spill]] }
 0x184   : > { %v1141_v16 = vmul.f32 %v2540_v7, %v3615_v27  ;;  %v1165_v28 = vmul.f32 %v2478_v63, %v3616_v10  ;;  %v1164_v5 = vadd.f32 %v1163_v39, %v1162_v41  ;;  %v3619_v54 = vstv %s3577_s3  ;;  %v3638_v10 = vld [vmem:[#allocation119_spill] sm:$0xff]  ;;  %s3654_s3 = sld [smem:[#allocation116_spill]] }
 0x185   : > { %v1167_v31 = vmul.f32 %v2508_v52, %v3619_v54  ;;  %v1118_v44 = vadd.f32 %v1117_v36, %v1116_v49  ;;  %v3620_v40 = vstv %s3609_s29  ;;  %v928_v3 = vadd.f32 %v927_v17, %v925_v9  ;;  %v3626_v36 = vld [vmem:[#allocation134_spill] sm:$0xff] }
 0x186   : > { %v1121_v45 = vmul.f32 %v2577_v60, %v3620_v40  ;;  %v3622_v15 = vstv %s3558_s6  ;;  %v897_v58 = vadd.f32 %v3623_v12, %v894_v19  ;;  %v1142_v26 = vadd.f32 %v1141_v16, %v1140_v20  ;;  %v3634_v17 = vld [vmem:[#allocation142_spill] sm:$0xff]  ;;  %s3637_s6 = sld [smem:[#allocation89_spill]]  ;;  %v3640_v20 = vld [vmem:[#allocation137_spill] sm:$0xff] }
 0x187   : > { %v1143_v59 = vmul.f32 %v2538_v55, %v3622_v15  ;;  %v3625_v32 = vstv %s3613_s26  ;;  %v1166_v1 = vadd.f32 %v1165_v28, %v1164_v5  ;;  %v1120_v30 = vadd.f32 %v1119_v48, %v1118_v44 }
 0x188   : > { %v1145_v21 = vmul.f32 %v2559_v8, %v3625_v32  ;;  %v931_v47 = vadd.f32 %v3626_v36, %v928_v3  ;;  %v3627_v51 = vstv %s3617_s0  ;;  %v3628_v46 = vstv %s3618_s21  ;;  %899 = vrot.lane.b32.xlu0 %v897_v58, %s1679_s22 }
 0x189   : > { %v1147_v23 = vmul.f32 %v2557_v56, %v3627_v51  ;;  %v1169_v37 = vmul.f32 %v2506_v25, %v3628_v46  ;;  %v1144_v57 = vadd.f32 %v1143_v59, %v1142_v26  ;;  %v1168_v18 = vadd.f32 %v1167_v31, %v1166_v1  ;;  %p3675_p0 = scmp.ne.s32.totalorder %s3673_s1, 0 }
 0x18a   : > { %v3631_v39 = vstv %s3588_s8  ;;  %v3632_v48 = vstv %s3621_s23  ;;  %v1122_v33 = vadd.f32 %v1121_v45, %v1120_v30  ;;  %v934_v11 = vadd.f32 %v3634_v17, %v931_v47  ;;  %v3651_v47 = vld [vmem:[#allocation123_spill] sm:$0xff]  ;;  %s2900_s8 = sld [smem:[#allocation6 + $0x54]] }
 0x18b   : > { %v1171_v38 = vmul.f32 %v2528_v53, %v3631_v39  ;;  %v633_v6 = vmul.f32 %v3632_v48, %v2362_v50  ;;  %v3635_v41 = vstv %s3624_s28  ;;  %v3636_v14 = vstv %s3523_s13  ;;  %s3642_s13 = sld [smem:[#allocation115_spill]]  ;;  %s3674_s28 = sld [smem:[#allocation145_spill]] }
 0x18c   : > { %v1149_v49 = vmul.f32 %v2575_v61, %v3635_v41  ;;  %v1151_v9 = vmul.f32 %v2573_v0, %v3636_v14  ;;  %v1146_v27 = vadd.f32 %v1145_v21, %v1144_v57  ;;  %v1170_v16 = vadd.f32 %v1169_v37, %v1168_v18  ;;  %1124 = vrot.lane.b32.xlu1 %v1122_v33, %s1678_s25  ;;  %s3650_s25 = sld [smem:[#allocation104_spill]] }
 0x18d   : > { %v636_v28 = vadd.f32 %v3638_v10, %v633_v6  ;;  %v3639_v50 = vstv %s3629_s20  ;;  %v937_v5 = vadd.f32 %v3640_v20, %v934_v11  ;;  %v3641_v54 = vstv %s3630_s14 }
 0x18e   : > { %v638_v19 = vmul.f32 %v3639_v50, %v2364_v24  ;;  %v1173_v31 = vmul.f32 %v2540_v7, %v3641_v54  ;;  %v3643_v44 = vmov %v3632_v48  ;;  %v3644_v45 = vstv %s3633_s27  ;;  %s1681_s27 = smov [#allocation11]  }
 0x18f   : > { %v973_v40 = vmul.f32 %v2438_v42, %v3643_v44  ;;  %v974_v3 = vmul.f32 %v2436_v2, %v3644_v45  ;;  %v1148_v15 = vadd.f32 %v1147_v23, %v1146_v27  ;;  %v1172_v59 = vadd.f32 %v1171_v38, %v1170_v16 }
 0x190   : > { %v639_v24 = vadd.f32 %v638_v19, %v636_v28  ;;  %v3646_v12 = vmov %v3639_v50  ;;  %v940_v26 = vadd.f32 %v2696_v62, %v937_v5  ;;  %v3647_v32 = vstv %s3637_s6 }
 0x191   : > { %v976_v58 = vmul.f32 %v2480_v34, %v3646_v12  ;;  %v1153_v21 = vmul.f32 %v2577_v60, %v3647_v32  ;;  %v3649_v1 = vstv %s3599_s9  ;;  %v975_v2 = vadd.f32 %v974_v3, %v973_v40  ;;  %s3672_s9 = sld [smem:[#allocation18_spill]] }
 0x192   : > { %v1175_v42 = vmul.f32 %v2538_v55, %v3649_v1  ;;  %v1150_v30 = vadd.f32 %v1149_v49, %v1148_v15  ;;  %v1174_v36 = vadd.f32 %v1173_v31, %v1172_v59  ;;  %v642_v51 = vadd.f32 %v3651_v47, %v639_v24  ;;  %v3660_v49 = vld [vmem:[#allocation128_spill] sm:$0xff] }
 0x193   : > { %v3652_v34 = vstv %s3642_s13  ;;  %v943_v62 = vadd.f32 %v2642_v22, %v940_v26  ;;  %v977_v46 = vadd.f32 %v976_v58, %v975_v2  ;;  %v3653_v37 = vstv %s3645_s24  ;;  %v3668_v2 = vld [vmem:[#allocation124_spill] sm:$0xff] }
 0x194   : > { %v644_v23 = vmul.f32 %v3652_v34, %v2366_v4  ;;  %v978_v57 = vmul.f32 %v2478_v63, %v3653_v37  ;;  %v3655_v18 = vmov %v3652_v34  ;;  %v1152_v38 = vadd.f32 %v1151_v9, %v1150_v30 }
 0x195   : > { %v980_v39 = vmul.f32 %v2508_v52, %v3655_v18  ;;  %v1176_v48 = vadd.f32 %v1175_v42, %v1174_v36  ;;  %v3656_v6 = vstv %s3648_s2  ;;  %945 = vrot.lane.b32.xlu0 %v943_v62, %s1680_s19  ;;  %v3658_v22 = vstv %s3650_s25  ;;  %v3669_v62 = vld [vmem:[#allocation131_spill] sm:$0xff]  ;;  %v3670_v18 = vld [vmem:[#allocation126_spill] sm:$0xff] }
 0x196   : > { %v1177_v33 = vmul.f32 %v2559_v8, %v3656_v6  ;;  %v645_v4 = vadd.f32 %v644_v23, %v642_v51  ;;  %v1179_v17 = vmul.f32 %v2557_v56, %v3658_v22  ;;  %v652_v63 = vstv %s2849_s5  ;;  %s1578_s5 = sshll.u32 %s1681_s27, 4  ;;  %s1579_s5 = int_to_ptr.vmem [resolvable:$false] %s1578_s5 }
 0x197   : > { %v979_v52 = vadd.f32 %v978_v57, %v977_v46  ;;  %v1154_v11 = vadd.f32 %v1153_v21, %v1152_v38  ;;  %v3661_v9 = vstv %s3654_s3  ;;  %v655_v16 = vstv %s2860_s15  ;;  %s1427_s26 = sshll.u32 %s3672_s9, 8  ;;  %s1580_s6 = scalar_lea.vmem %s1579_s5, 512 }
 0x198   : > { %v1178_v41 = vadd.f32 %v1177_v33, %v1176_v48  ;;  %v648_v14 = vadd.f32 %v3660_v49, %v645_v4  ;;  %v650_v27 = vmul.f32 %v3661_v9, %v2390_v35  ;;  %v3662_v28 = vstv %s3657_s7  ;;  %v3665_v35 = vld [vmem:[#allocation120_spill] sm:$0xff]  ;;  %s2953_s20 = scalar_lea.hbm %s3674_s28, %s1427_s26 }
 0x199   : > { %v981_v10 = vadd.f32 %v980_v39, %v979_v52  ;;  %v982_v50 = vmul.f32 %v2506_v25, %v3662_v28  ;;  %v3663_v19 = vmov %v3661_v9  ;;  %1156 = vrot.lane.b32.xlu1 %v1154_v11, %s1679_s22  ;;  %v3664_v54 = vstv %s3659_s30 }
 0x19a   : > { %v984_v20 = vmul.f32 %v2528_v53, %v3663_v19  ;;  %v1180_v5 = vadd.f32 %v1179_v17, %v1178_v41  ;;  %v1181_v31 = vmul.f32 %v2575_v61, %v3664_v54  ;;  %v651_v44 = vadd.f32 %v650_v27, %v648_v14 }
 0x19b   : > { %v653_v40 = vmul.f32 %v652_v63, %v3665_v35  ;;  %v658_v45 = vstv %s2878_s11  ;;  %v983_v3 = vadd.f32 %v982_v50, %v981_v10  ;;  %v3666_v25 = vstv %s3536_s4  ;;  %s3671_s4 = sld [smem:[#allocation25_spill]] }
 0x19c   : > { %v1182_v15 = vadd.f32 %v1181_v31, %v1180_v5  ;;  %v1183_v59 = vmul.f32 %v2573_v0, %v3666_v25  ;;  %v656_v24 = vmul.f32 %v655_v16, %v2392_v43  ;;  %v661_v12 = vstv %s2885_s16 }
 0x19d   : > { %v654_v53 = vadd.f32 %v653_v40, %v651_v44  ;;  %v986_v58 = vmul.f32 %v2540_v7, %v652_v63  ;;  %v985_v26 = vadd.f32 %v984_v20, %v983_v3  ;;  %v3667_v21 = vstv %s3510_s18  ;;  %s617_s18 = sld [smem:[#allocation5]] }
 0x19e   : > { %v1184_v32 = vadd.f32 %v1183_v59, %v1182_v15  ;;  %v1185_v1 = vmul.f32 %v2577_v60, %v3667_v21  ;;  %v659_v30 = vmul.f32 %v658_v45, %v3668_v2  ;;  %v664_v36 = vstv %s2900_s8 }
 0x19f   : > { %v657_v42 = vadd.f32 %v656_v24, %v654_v53  ;;  %v988_v47 = vmul.f32 %v2538_v55, %v655_v16  ;;  %v987_v51 = vadd.f32 %v986_v58, %v985_v26  ;;  %v662_v43 = vmul.f32 %v661_v12, %v3669_v62 }
 0x1a0   : > { %v1186_v34 = vadd.f32 %v1185_v1, %v1184_v32  ;;  %v667_v46 = vstv %s2907_s10  ;;  %v990_v7 = vmul.f32 %v2559_v8, %v658_v45  ;;  %v665_v39 = vmul.f32 %v664_v36, %v3670_v18 }
 0x1a1   : > { %v660_v23 = vadd.f32 %v659_v30, %v657_v42  ;;  %v989_v37 = vadd.f32 %v988_v47, %v987_v51  ;;  %v670_v38 = vstv %s2921_s17  ;;  %v992_v48 = vmul.f32 %v2557_v56, %v661_v12  ;;  %s1321_s12 = sshll.u32 %s3671_s4, 4  ;;  %s1201_s22 = scalar_lea.sflag [#allocation8], %s3671_s4 }
 0x1a2   : > { %1188 = vrot.lane.b32.xlu1 %v1186_v34, %s1680_s19  ;;  %v668_v55 = vmul.f32 %v667_v46, %v2340_v29  ;;  %v994_v4 = vmul.f32 %v2575_v61, %v664_v36  ;;  %v671_v63 = vmul.f32 %v670_v38, %v2276_v13  ;;  %v996_v8 = vmul.f32 %v2573_v0, %v667_v46  ;;  %s217_s29 = scalar_lea.vmem [#allocation11], %s1321_s12 }
 0x1a3   : > { %v663_v57 = vadd.f32 %v662_v43, %v660_v23  ;;  %v991_v6 = vadd.f32 %v990_v7, %v989_v37  ;;  %v998_v41 = vmul.f32 %v2577_v60, %v670_v38  ;;  %v949_v54 = vstv %s617_s18  ;;  %s1214_s0 = sshll.u32 %s217_s29, 4  ;;  %s2955_s0 = int_to_ptr.vmem [resolvable:$true] %s1214_s0 }
 0x1a4   : > { %s1574_s14 = scalar_lea.vmem %s2955_s0, 256  ;;  %p1581_p4 = scmp.lt.s32.totalorder %s2955_s0, %s1579_s5 }
 0x1a5   : > { %v666_v33 = vadd.f32 %v665_v39, %v663_v57  ;;  %v993_v22 = vadd.f32 %v992_v48, %v991_v6  ;;  %p1575_p8 = scmp.ne.s32.totalorder %s2955_s0, %s1574_s14  ;;  %p1582_p9 = scmp.lt.s32.totalorder %s1580_s6, %s1574_s14 }
 0x1a7   : > { %v669_v17 = vadd.f32 %v668_v55, %v666_v33  ;;  %v995_v52 = vadd.f32 %v994_v4, %v993_v22  ;;  %p1576_p2 = pnand %p1575_p8, %p3675_p0  ;;  %p1583_p13 = por %p1582_p9, %p1581_p4 }
 0x1a9   : > { %v672_v11 = vadd.f32 %v671_v63, %v669_v17  ;;  %v997_v49 = vadd.f32 %v996_v8, %v995_v52  ;;  %p1577_p5 = pneg %p1576_p2 }
 0x1ab   : > { %v999_v14 = vadd.f32 %v998_v41, %v997_v49  ;;  %p1584_p11 = pnand %p1583_p13, %p1577_p5 }
 0x1c9   : > { %v716_v9 = vpop.permute.xlu0 %715 }
 0x1ca   : > { %v718_v28 = vadd.f32 %v716_v9, %v672_v11 }
 0x1cf   : > { %v762_v56 = vpop.permute.xlu0 %761 }
 0x1d0   : > { %v764_v61 = vadd.f32 %v762_v56, %v718_v28 }
 0x1d1   : > { %v1029_v27 = vpop.permute.xlu1 %1028 }
 0x1d2   : > { %v1031_v44 = vadd.f32 %v1029_v27, %v999_v14 }
 0x1d4   : > { %v808_v16 = vpop.permute.xlu0 %807 }
 0x1d5   : > { %v810_v13 = vadd.f32 %v808_v16, %v764_v61 }
 0x1d8   : > { %v1061_v10 = vpop.permute.xlu1 %1060 }
 0x1d9   : > { %v1063_v40 = vadd.f32 %v1061_v10, %v1031_v44 }
 0x1e2   : > { %v854_v29 = vpop.permute.xlu0 %853 }
 0x1e3   : > { %v856_v20 = vadd.f32 %v854_v29, %v810_v13 }
 0x1ed   : > { %v1093_v50 = vpop.permute.xlu1 %1092 }
 0x1ee   : > { %v1095_v15 = vadd.f32 %v1093_v50, %v1063_v40 }
 0x1fa   : > { %v900_v19 = vpop.permute.xlu0 %899 }
 0x1fb   : > { %v902_v0 = vadd.f32 %v900_v19, %v856_v20 }
 0x1fe   : > { %v1125_v5 = vpop.permute.xlu1 %1124 }
 0x1ff   : > { %v1127_v25 = vadd.f32 %v1125_v5, %v1095_v15 }
 0x207   : > { %v946_v31 = vpop.permute.xlu0 %945 }
 0x208   : > { %v948_v60 = vadd.f32 %v946_v31, %v902_v0 }
 0x20a   : > { %v950_v35 = vadd.f32 %v949_v54, %v948_v60 }
 0x20b   : > { %v1157_v3 = vpop.permute.xlu1 %1156 }
 0x20c   : > { %v1419_v45 = vmul.f32 -1.442695, %v950_v35  ;;  %v1159_v59 = vadd.f32 %v1157_v3, %v1127_v25 }
 0x20e   : > { %1521 = vpow2.f32 %v1419_v45 }
 0x214   : > { %v1189_v53 = vpop.permute.xlu1 %1188 }
 0x215   : > { %v1191_v24 = vadd.f32 %v1189_v53, %v1159_v59 }
 0x217   : > { %v1192_v12 = vadd.f32 %v1191_v24, %v949_v54 }
 0x218   : > { %v1522_v26 = vpop.eup %1521 }
 0x219   : > { %v1420_v58 = vmul.f32 -1.442695, %v1192_v12  ;;  %v954_v32 = vadd.f32 1.0, %v1522_v26 }
 0x21b   : > { %1523 = vpow2.f32 %v1420_v58 }
 0x21c   : > { %1525 = vrcp.f32 %v954_v32 }
 0x225   : > { %v1524_v21 = vpop.eup %1523 }
 0x226   : > { %v1196_v1 = vadd.f32 1.0, %v1524_v21  ;;  %v1526_v42 = vpop.eup %1525 }
 0x227   : > { %958 = vst.msk [vmem:[%s217_s29] sm:$0xff] %vm957_vm2, %v1526_v42 }
 0x228   : > { %1527 = vrcp.f32 %v1196_v1 }
 0x232   : > { %v1528_v2 = vpop.eup %1527 }
 0x233   : > { %1199 = vst.msk [vmem:[%s217_s29 + $0x8] sm:$0xff] %vm957_vm2, %v1528_v2 }
 0x234   : > { %1587 = shalt.err (!%p1584_p11)
}
 0x235   : > { %s1588_s13 = scalar_lea.hbm %s2953_s20, 256  ;;  %s1592_s2 = scalar_lea.hbm %s3674_s28, 512 }
 0x236   : > { %p1589_p3 = scmp.ne.s32.totalorder %s2953_s20, %s1588_s13  ;;  %p1593_p6 = scmp.lt.u32.totalorder %s2953_s20, %s3674_s28 }
 0x237   : > { %p1594_p12 = scmp.lt.u32.totalorder %s1592_s2, %s1588_s13  ;;  %p1596_p8 = scmp.lt.u32.totalorder %s1588_s13, %s2953_s20 }
 0x238   : > { %p1590_p7 = pnand %p1589_p3, %p3675_p0 }
 0x239   : > { %p1595_p1 = por %p1594_p12, %p1593_p6 }
 0x23a   : > { %p1591_p10 = pneg %p1590_p7 }
 0x23b   : > { %p1597_p2 = por %p1596_p8, %p1595_p1 }
 0x23d   : > { %p1598_p5 = pnand %p1597_p2, %p1591_p10 }
 0x23f   : > { %1601 = shalt.err (!%p1598_p5)
}
 0x240   : > { %s1682_s16 = smov 128   ;;  %s1683_s3 = smov 8  }
 0x241   : > { %1434 = dma.vmem_to_hbm [thread:$0]  (%p3675_p0), %s2955_s0, 256, %s2953_s20, %s1201_s22, %s1682_s16, %s1682_s16, %s1683_s3  }
 0x242 PF: > { %s3676_s7 = sld [smem:[#allocation15_spill]]  ;;  %s3677_s19 = sld [smem:[#allocation21_spill]] }
 0x243   : > { %s3678_s30 = sld [smem:[#allocation20_spill]] }
 0x248   : > { %s1229_s8 = sand.u32 1, %s3676_s7   ;;  %p3679_p4 = scmp.ne.s32.totalorder %s3677_s19, 0 }
 0x249   : > { %p3680_p9 = scmp.ge.s32.totalorder %s3678_s30, 2  ;;  %s1230_s10 = scalar_lea.sflag [#allocation8], %s1229_s8 }
 0x24b   : > { %p1445_p13 = pnand %p3680_p9, %p3679_p4 }
 0x24d   : > { %1635 = dma.done.wait (!%p1445_p13), %s1230_s10, 256  }
 0x24e   : > { %1637 = vsyncadd (!%p1445_p13), %s1230_s10, 4294967040  ;;  %s21_s19 = sadd.s32 1, %s3678_s30   ;;  %s3681_s14 = sld [smem:[#allocation16_spill]] }
 0x24f   : > { %p18_p11 = scmp.ge.s32.totalorder %s21_s19, 4   ;;  %s3682_s15 = sld [smem:[#allocation17_spill]] }
 0x250   : > { %s3683_s16 = sld [smem:[#allocation24_spill]]  ;;  %s3684_s17 = sld [smem:[#allocation19_spill]] }
 0x251   : > { %s3685_s18 = sld [smem:[#allocation22_spill]]  ;;  %20 = sbr.rel (!%p18_p11) target bundleno = 12 (0xc), region = 91 }
 0x258   :  { %1235 = vsyncpa [#allocation7], 1 }
 0x259   :  { %1237 = vsyncpa [#allocation7 + $0x1], 1 }
 0x25a   :  { %1238 = vsyncpa [#allocation8], 1 }
 0x25b   :  { %1240 = vsyncpa [#allocation8 + $0x1], 1 }
 0x25c   :  { %1241 = vsyncpa [#allocation9], 1 }
 0x25d   :  { %1243 = vsyncpa [#allocation9 + $0x1], 1 }

</bundles_post_ra>
